<compile_context>
chip_gen: v7x
topology: tpu7x:2x2x1
jax: 0.10.0
libtpu: 0.0.40
codegen_flags: <defaults>
</compile_context>

<pallas_src>
import jax
import jax.numpy as jnp
from jax.experimental import pallas as pl
from jax.experimental.pallas import tpu as pltpu


def nnue_kernel(x_ref, w1_ref, b1_ref, w2_ref, b2_ref, w3_ref, b3_ref, o_ref):
    # Layer 1: Linear(768 -> 256) + ReLU. bf16 operands on the MXU, f32
    # accumulation; bias add + ReLU on the f32 accumulator (VPU).
    h1 = jnp.dot(x_ref[...], w1_ref[...], preferred_element_type=jnp.float32)
    h1 = jnp.maximum(h1 + b1_ref[...], 0.0)

    # Layer 2: Linear(256 -> 32) + ReLU (bf16 operands, f32 accumulate).
    h2 = jnp.dot(h1.astype(jnp.bfloat16), w2_ref[...],
                 preferred_element_type=jnp.float32)
    h2 = jnp.maximum(h2 + b2_ref[...], 0.0)

    # Output layer: Linear(32 -> 1) + Tanh, emitted lane-dense as a (1, tb)
    # row: contract the 32-feature axis of h2 against the single W3 row
    # (same trans_b contraction pattern as flash attention's qk einsum), so
    # the store is full unmasked vst instead of tb masked single-lane stores.
    logits = jnp.einsum('ok,nk->on', w3_ref[...], h2,
                        preferred_element_type=jnp.float32)   # (1, tb)
    o_ref[...] = jnp.tanh(logits + b3_ref[...]).astype(o_ref.dtype)


def nnue_forward(x, w1, b1, w2, b2, w3, b3, *, tb=512):
    """NNUE forward pass: (B, 768) float32 -> (B, 1) float32.

    tb: batch tile (must be a multiple of 128). The batch is zero-padded up
    to a multiple of tb; padded rows are computed and discarded.
    """
    B, F = x.shape
    assert F == 768
    assert tb % 128 == 0
    n_tiles = pl.cdiv(B, tb)
    B_pad = n_tiles * tb
    if B_pad != B:
        x = jnp.pad(x, ((0, B_pad - B), (0, 0)))

    # bf16 matmul operands (halves HBM traffic on the streaming x input and
    # hits the fast MXU path); accumulation stays f32 inside the kernel.
    x_bf = x.astype(jnp.bfloat16)
    w1_bf = w1.astype(jnp.bfloat16)
    w2_bf = w2.astype(jnp.bfloat16)
    w3_row = w3.reshape(1, -1).astype(jnp.float32)   # (1, 32)
    b3_2d = b3.reshape(1, 1).astype(jnp.float32)     # (1, 1)

    out_row = pl.pallas_call(
        nnue_kernel,
        out_shape=jax.ShapeDtypeStruct((1, B_pad), jnp.float32),
        grid_spec=pltpu.PrefetchScalarGridSpec(
            num_scalar_prefetch=0,
            grid=(n_tiles,),
            in_specs=[
                pl.BlockSpec((tb, 768), lambda i: (i, 0)),    # x tile (streams)
                pl.BlockSpec((768, 256), lambda i: (0, 0)),   # W1 (resident)
                pl.BlockSpec((1, 256), lambda i: (0, 0)),     # b1
                pl.BlockSpec((256, 32), lambda i: (0, 0)),    # W2
                pl.BlockSpec((1, 32), lambda i: (0, 0)),      # b2
                pl.BlockSpec((1, 32), lambda i: (0, 0)),      # W3 as a row
                pl.BlockSpec((1, 1), lambda i: (0, 0)),       # b3
            ],
            out_specs=pl.BlockSpec((1, tb), lambda i: (0, i)),  # lane-dense out
        ),
        compiler_params=pltpu.CompilerParams(
            dimension_semantics=("parallel",),   # megacore-shard batch tiles
            vmem_limit_bytes=48 << 20,           # headroom if tb is pushed up
        ),
    )(x_bf, w1_bf, b1, w2_bf, b2, w3_row, b3_2d)

    return out_row[0, :B].reshape(B, 1)


def init_params(key):
    # Deterministic init mirroring nn.Linear's U(-1/sqrt(fan_in), 1/sqrt(fan_in))
    def linear(key, fan_in, fan_out):
        kw, kb = jax.random.split(key)
        bound = 1.0 / jnp.sqrt(fan_in)
        w = jax.random.uniform(kw, (fan_in, fan_out), jnp.float32, -bound, bound)
        b = jax.random.uniform(kb, (1, fan_out), jnp.float32, -bound, bound)
        return w, b

    k1, k2, k3 = jax.random.split(key, 3)
    w1, b1 = linear(k1, 768, 256)
    w2, b2 = linear(k2, 256, 32)
    w3, b3 = linear(k3, 32, 1)
    return w1, b1, w2, b2, w3, b3


if __name__ == "__main__":
    key = jax.random.PRNGKey(0)
    kx, kp = jax.random.split(key)
    B = 8
    x = jax.random.uniform(kx, (B, 768), jnp.float32)  # NNUE features (dense here)
    w1, b1, w2, b2, w3, b3 = init_params(kp)

    out = nnue_forward(x, w1, b1, w2, b2, w3, b3)
    out = jax.block_until_ready(out)

    # Reference in plain f32 JAX. The kernel uses bf16 matmul operands with
    # f32 accumulation, so compare with a bf16-appropriate tolerance.
    h = jnp.maximum(x @ w1 + b1, 0.0)
    h = jnp.maximum(h @ w2 + b2, 0.0)
    ref = jnp.tanh(h @ w3 + b3)
    assert out.shape == (B, 1)
    assert jnp.allclose(out, ref, atol=2e-2), "mismatch vs reference"

    print("KERNEL_OK")
</pallas_src>

<mosaic_0001>
module attributes {stable_mosaic.version = 11 : i64} {
  func.func @nnue_kernel(%arg0: i32, %arg1: memref<512x768xbf16, #tpu.memory_space<vmem>>, %arg2: memref<768x256xbf16, #tpu.memory_space<vmem>>, %arg3: memref<1x256xf32, #tpu.memory_space<vmem>>, %arg4: memref<256x32xbf16, #tpu.memory_space<vmem>>, %arg5: memref<1x32xf32, #tpu.memory_space<vmem>>, %arg6: memref<1x32xf32, #tpu.memory_space<vmem>>, %arg7: memref<1x1xf32, #tpu.memory_space<vmem>>, %arg8: memref<1x512xf32, #tpu.memory_space<vmem>>) attributes {dimension_semantics = [#tpu.dimension_semantics<parallel>], iteration_bounds = array<i64: 1>, scalar_prefetch = 0 : i64, scratch_operands = 0 : i64, tpu.core_type = #tpu.core_type<tc>, window_params = [{transform_indices = @transform_0, window_bounds = array<i64: 512, 768>}, {pipeline_mode = #tpu.pipeline_mode<synchronous>, transform_indices = @transform_1, window_bounds = array<i64: 768, 256>}, {pipeline_mode = #tpu.pipeline_mode<synchronous>, transform_indices = @transform_2, window_bounds = array<i64: 1, 256>}, {pipeline_mode = #tpu.pipeline_mode<synchronous>, transform_indices = @transform_3, window_bounds = array<i64: 256, 32>}, {pipeline_mode = #tpu.pipeline_mode<synchronous>, transform_indices = @transform_4, window_bounds = array<i64: 1, 32>}, {pipeline_mode = #tpu.pipeline_mode<synchronous>, transform_indices = @transform_5, window_bounds = array<i64: 1, 32>}, {pipeline_mode = #tpu.pipeline_mode<synchronous>, transform_indices = @transform_6, window_bounds = array<i64: 1, 1>}, {transform_indices = @transform_7, window_bounds = array<i64: 1, 512>}]} {
    %c0 = arith.constant 0 : index
    %c0_0 = arith.constant 0 : index
    %0 = vector.load %arg1[%c0, %c0_0] : memref<512x768xbf16, #tpu.memory_space<vmem>>, vector<512x768xbf16>
    %c0_1 = arith.constant 0 : index
    %c0_2 = arith.constant 0 : index
    %1 = vector.load %arg2[%c0_1, %c0_2] : memref<768x256xbf16, #tpu.memory_space<vmem>>, vector<768x256xbf16>
    %cst = arith.constant dense<0.000000e+00> : vector<512x256xf32>
    %2 = tpu.matmul %0, %1, %cst {dimension_numbers = #tpu.dot_dimension_numbers<[1], [0], [0], [1], [0, 0, 1, 1], [], []>} : vector<512x768xbf16>, vector<768x256xbf16>, vector<512x256xf32> -> vector<512x256xf32>
    %c0_3 = arith.constant 0 : index
    %c0_4 = arith.constant 0 : index
    %3 = vector.load %arg3[%c0_3, %c0_4] : memref<1x256xf32, #tpu.memory_space<vmem>>, vector<1x256xf32>
    %4 = vector.broadcast %3 : vector<1x256xf32> to vector<512x256xf32>
    %5 = arith.addf %2, %4 : vector<512x256xf32>
    %cst_5 = arith.constant 0.000000e+00 : f32
    %6 = vector.broadcast %cst_5 : f32 to vector<512x256xf32>
    %7 = arith.maximumf %5, %6 : vector<512x256xf32>
    %8 = arith.truncf %7 : vector<512x256xf32> to vector<512x256xbf16>
    %c0_6 = arith.constant 0 : index
    %c0_7 = arith.constant 0 : index
    %9 = vector.load %arg4[%c0_6, %c0_7] : memref<256x32xbf16, #tpu.memory_space<vmem>>, vector<256x32xbf16>
    %cst_8 = arith.constant dense<0.000000e+00> : vector<512x32xf32>
    %10 = tpu.matmul %8, %9, %cst_8 {dimension_numbers = #tpu.dot_dimension_numbers<[1], [0], [0], [1], [0, 0, 1, 1], [], []>} : vector<512x256xbf16>, vector<256x32xbf16>, vector<512x32xf32> -> vector<512x32xf32>
    %c0_9 = arith.constant 0 : index
    %c0_10 = arith.constant 0 : index
    %11 = vector.load %arg5[%c0_9, %c0_10] : memref<1x32xf32, #tpu.memory_space<vmem>>, vector<1x32xf32>
    %12 = vector.broadcast %11 : vector<1x32xf32> to vector<512x32xf32>
    %13 = arith.addf %10, %12 : vector<512x32xf32>
    %cst_11 = arith.constant 0.000000e+00 : f32
    %14 = vector.broadcast %cst_11 : f32 to vector<512x32xf32>
    %15 = arith.maximumf %13, %14 : vector<512x32xf32>
    %c0_12 = arith.constant 0 : index
    %c0_13 = arith.constant 0 : index
    %16 = vector.load %arg6[%c0_12, %c0_13] : memref<1x32xf32, #tpu.memory_space<vmem>>, vector<1x32xf32>
    "tpu.trace_start"() <{level = 10 : i32, message = "ok,nk->on"}> : () -> ()
    %cst_14 = arith.constant dense<0.000000e+00> : vector<1x512xf32>
    %17 = tpu.matmul %16, %15, %cst_14 {dimension_numbers = #tpu.dot_dimension_numbers<[1], [1], [0], [0], [0, 0, 1, 0], [], []>} : vector<1x32xf32>, vector<512x32xf32>, vector<1x512xf32> -> vector<1x512xf32>
    "tpu.trace_stop"() : () -> ()
    %c0_15 = arith.constant 0 : index
    %c0_16 = arith.constant 0 : index
    %18 = vector.load %arg7[%c0_15, %c0_16] : memref<1x1xf32, #tpu.memory_space<vmem>>, vector<1x1xf32>
    %19 = vector.broadcast %18 : vector<1x1xf32> to vector<1x512xf32>
    %20 = arith.addf %17, %19 : vector<1x512xf32>
    %21 = math.tanh %20 : vector<1x512xf32>
    %c0_17 = arith.constant 0 : index
    %c0_18 = arith.constant 0 : index
    %22 = vector.load %arg8[%c0_17, %c0_18] : memref<1x512xf32, #tpu.memory_space<vmem>>, vector<1x512xf32>
    tpu.vector_store %arg8[%c0_17, %c0_18], %21 {strides = array<i32>} : memref<1x512xf32, #tpu.memory_space<vmem>>, vector<1x512xf32>,
    return
  }
  func.func @transform_0(%arg0: i32) -> (i32, i32) {
    %c0_i32 = arith.constant 0 : i32
    %c0_i32_0 = arith.constant 0 : i32
    return %arg0, %c0_i32 : i32, i32
  }
  func.func @transform_1(%arg0: i32) -> (i32, i32) {
    %c0_i32 = arith.constant 0 : i32
    %c0_i32_0 = arith.constant 0 : i32
    %c0_i32_1 = arith.constant 0 : i32
    return %c0_i32, %c0_i32_0 : i32, i32
  }
  func.func @transform_2(%arg0: i32) -> (i32, i32) {
    %c0_i32 = arith.constant 0 : i32
    %c0_i32_0 = arith.constant 0 : i32
    %c0_i32_1 = arith.constant 0 : i32
    return %c0_i32, %c0_i32_0 : i32, i32
  }
  func.func @transform_3(%arg0: i32) -> (i32, i32) {
    %c0_i32 = arith.constant 0 : i32
    %c0_i32_0 = arith.constant 0 : i32
    %c0_i32_1 = arith.constant 0 : i32
    return %c0_i32, %c0_i32_0 : i32, i32
  }
  func.func @transform_4(%arg0: i32) -> (i32, i32) {
    %c0_i32 = arith.constant 0 : i32
    %c0_i32_0 = arith.constant 0 : i32
    %c0_i32_1 = arith.constant 0 : i32
    return %c0_i32, %c0_i32_0 : i32, i32
  }
  func.func @transform_5(%arg0: i32) -> (i32, i32) {
    %c0_i32 = arith.constant 0 : i32
    %c0_i32_0 = arith.constant 0 : i32
    %c0_i32_1 = arith.constant 0 : i32
    return %c0_i32, %c0_i32_0 : i32, i32
  }
  func.func @transform_6(%arg0: i32) -> (i32, i32) {
    %c0_i32 = arith.constant 0 : i32
    %c0_i32_0 = arith.constant 0 : i32
    %c0_i32_1 = arith.constant 0 : i32
    return %c0_i32, %c0_i32_0 : i32, i32
  }
  func.func @transform_7(%arg0: i32) -> (i32, i32) {
    %c0_i32 = arith.constant 0 : i32
    %c0_i32_0 = arith.constant 0 : i32
    return %c0_i32, %arg0 : i32, i32
  }
}

</mosaic_0001>

<bundles_post_ra>
// kernel: tpu_custom_call.1
= control target key start
LH: loop header
LB: loop body
LE: loop exit
PB: predicated region body
PF: predicated region fallthrough
CT: control target
= control target key end

     0   :  { %s6538_s0 = inlined_call_operand.hbm [shape: bf16[512,768], index: 0, kind: input, shape index: {}]   ;;  %s6539_s1 = inlined_call_operand.hbm [shape: bf16[768,256], index: 1, kind: input, shape index: {}]   ;;  %s6540_s2 = inlined_call_operand.vmem [shape: f32[1,256], index: 2, kind: input, shape index: {}]   ;;  %s6541_s3 = inlined_call_operand.vmem [shape: bf16[256,32], index: 3, kind: input, shape index: {}]   ;;  %s6542_s4 = inlined_call_operand.vmem [shape: f32[1,32], index: 4, kind: input, shape index: {}]   ;;  %s6543_s5 = inlined_call_operand.vmem [shape: f32[1,32], index: 5, kind: input, shape index: {}]   ;;  %s6544_s6 = inlined_call_operand.<no memory space> [shape: f32[1,1], index: 6, kind: input, shape index: {}]   ;;  %s6545_s7 = inlined_call_operand.hbm [shape: f32[1,512], index: 7, kind: output, shape index: {}]  }
   0x1   :  { %v12_v0 = vstv %s6544_s6 }
   0x2   :  { %13 = vst [vmem:[#allocation2] sm:$0x1] %v12_v0 }
   0x3   :  { %14 = vsyncpa [#allocation4], 0 }
   0x4   :  { %15 = vsyncpa [#allocation7], 0 }
   0x5   :  { %16 = vsyncpa [#allocation5], 0  ;;  %s5429_s26 = smov [#allocation3]   ;;  %s5357_s30 = scalar_lea.hbm %s6538_s0, 24576 }
   0x6   :  { %s22_s27 = sshll.u32 %s5429_s26, 4  ;;  %p5358_p0 = scmp.ne.s32.totalorder %s6538_s0, %s5357_s30  ;;  %s23_s27 = int_to_ptr.vmem [resolvable:$true] %s22_s27 }
   0x7   :  { %p5361_p1 = scmp.lt.u32.totalorder %s5357_s30, %s6538_s0 }
   0x9   :  { %p5363_p2 = pnand %p5361_p1, %p5358_p0 }
   0xb   :  { %5366 = shalt.err (!%p5363_p2)
}
   0xc   :  { %s5367_s6 = scalar_lea.vmem %s23_s27, 24576  ;;  %p5372_p4 = scmp.lt.s32.totalorder %s23_s27, %s23_s27 }
   0xd   :  { %p5368_p3 = scmp.ne.s32.totalorder %s23_s27, %s5367_s6  ;;  %p5373_p5 = scmp.lt.s32.totalorder %s5367_s6, %s5367_s6 }
   0xf   :  { %p5374_p6 = por %p5373_p5, %p5372_p4 }
  0x11   :  { %p5375_p7 = pnand %p5374_p6, %p5368_p3 }
  0x13   :  { %5378 = shalt.err (!%p5375_p7)
}
  0x14   :  { %s5430_s12 = smov 384   ;;  %s5431_s13 = smov 24  }
  0x15   :  { %28 = dma.hbm_to_vmem [thread:$0]  %s6538_s0, 24576, %s23_s27, [#allocation4], %s5430_s12, %s5430_s12, %s5431_s13  }
  0x16   :  { %s5432_s16 = smov [#allocation6]   ;;  %s5379_s20 = scalar_lea.hbm %s6539_s1, 12288 }
  0x17   :  { %s34_s17 = sshll.u32 %s5432_s16, 4  ;;  %p5380_p8 = scmp.ne.s32.totalorder %s6539_s1, %s5379_s20  ;;  %s35_s17 = int_to_ptr.vmem [resolvable:$true] %s34_s17 }
  0x18   :  { %p5383_p9 = scmp.lt.u32.totalorder %s5379_s20, %s6539_s1 }
  0x1a   :  { %p5385_p10 = pnand %p5383_p9, %p5380_p8 }
  0x1c   :  { %5388 = shalt.err (!%p5385_p10)
}
  0x1d   :  { %s5389_s25 = scalar_lea.vmem %s35_s17, 12288  ;;  %p5394_p12 = scmp.lt.s32.totalorder %s35_s17, %s35_s17 }
  0x1e   :  { %p5390_p11 = scmp.ne.s32.totalorder %s35_s17, %s5389_s25  ;;  %p5395_p13 = scmp.lt.s32.totalorder %s5389_s25, %s5389_s25 }
  0x20   :  { %p5396_p0 = por %p5395_p13, %p5394_p12 }
  0x22   :  { %p5397_p1 = pnand %p5396_p0, %p5390_p11 }
  0x24   :  { %5400 = shalt.err (!%p5397_p1)
}
  0x25   :  { %s5433_s0 = smov 128   ;;  %s5434_s26 = smov 8  }
  0x26   :  { %40 = dma.hbm_to_vmem [thread:$0]  %s6539_s1, 12288, %s35_s17, [#allocation7], %s5433_s0, %s5433_s0, %s5434_s26  }
  0x27   :  { %5423 = dma.done.wait [#allocation4], 24576  }
  0x28   :  { %5424 = vsyncadd [#allocation4], 4294942720 }
  0x29   :  { %5425 = dma.done.wait [#allocation7], 12288  }
  0x2a   :  { %5426 = vsyncadd [#allocation7], 4294955008  ;;  %v4901_v1 = vld [vmem:[#allocation6 + $0x4] ss:$8 sps:$4 sm:$0xff]   ;;  %v4903_v2 = vld [vmem:[#allocation6] ss:$8 sps:$4 sm:$0xff]  }
  0x2b   :  { %1798 = vmatprep.subr.bf16.mxu0 %v4901_v1  ;;  %v4904_v3 = vld [vmem:[#allocation6 + $0x14] ss:$8 sps:$4 sm:$0xff]   ;;  %v4906_v4 = vld [vmem:[#allocation6 + $0x10] ss:$8 sps:$4 sm:$0xff]   ;;  %v4907_v5 = vld [vmem:[#allocation6 + $0x24] ss:$8 sps:$4 sm:$0xff]  }
  0x2c   :  { %1799 = vmatpush1.bf16.msra.mxu0 %v4903_v2  ;;  %v4909_v6 = vld [vmem:[#allocation6 + $0x20] ss:$8 sps:$4 sm:$0xff]   ;;  %v4910_v7 = vld [vmem:[#allocation6 + $0x34] ss:$8 sps:$4 sm:$0xff]   ;;  %v4912_v8 = vld [vmem:[#allocation6 + $0x30] ss:$8 sps:$4 sm:$0xff]  }
  0x2d   :  { %1800 = vmatprep.subr.bf16.mxu0 %v4904_v3  ;;  %v4913_v9 = vld [vmem:[#allocation6 + $0x44] ss:$8 sps:$4 sm:$0xff]   ;;  %v4915_v10 = vld [vmem:[#allocation6 + $0x40] ss:$8 sps:$4 sm:$0xff]   ;;  %v4916_v11 = vld [vmem:[#allocation6 + $0x54] ss:$8 sps:$4 sm:$0xff]  }
  0x2e   :  { %v4918_v12 = vld [vmem:[#allocation6 + $0x50] ss:$8 sps:$4 sm:$0xff]   ;;  %v4919_v13 = vld [vmem:[#allocation6 + $0x64] ss:$8 sps:$4 sm:$0xff]   ;;  %v4921_v15 = vld [vmem:[#allocation6 + $0x60] ss:$8 sps:$4 sm:$0xff]  }
  0x2f   :  { %v4951_v14 = vld [vmem:[#allocation3 + $0x4] ss:$24 sps:$4 sm:$0xff]   ;;  %v4924_v17 = vld [vmem:[#allocation6 + $0x70] ss:$8 sps:$4 sm:$0xff]   ;;  %v4927_v19 = vld [vmem:[#allocation6 + $0x80] ss:$8 sps:$4 sm:$0xff]  }
  0x30   :  { %1801 = vmatpush1.bf16.msra.mxu0 %v4906_v4  ;;  %v4922_v16 = vld [vmem:[#allocation6 + $0x74] ss:$8 sps:$4 sm:$0xff]   ;;  %1830 = vmatprep.mubr.bf16.mxu0 %v4951_v14  ;;  %v4925_v18 = vld [vmem:[#allocation6 + $0x84] ss:$8 sps:$4 sm:$0xff]   ;;  %v4930_v21 = vld [vmem:[#allocation6 + $0x90] ss:$8 sps:$4 sm:$0xff]  }
  0x31   :  { %1802 = vmatprep.subr.bf16.mxu0 %v4907_v5  ;;  %v4928_v20 = vld [vmem:[#allocation6 + $0x94] ss:$8 sps:$4 sm:$0xff]   ;;  %v4931_v22 = vld [vmem:[#allocation6 + $0xa4] ss:$8 sps:$4 sm:$0xff]   ;;  %v4933_v23 = vld [vmem:[#allocation6 + $0xa0] ss:$8 sps:$4 sm:$0xff]  }
  0x32   :  { %v4934_v24 = vld [vmem:[#allocation6 + $0xb4] ss:$8 sps:$4 sm:$0xff]   ;;  %v4936_v25 = vld [vmem:[#allocation6 + $0xb0] ss:$8 sps:$4 sm:$0xff]   ;;  %v4937_v26 = vld [vmem:[#allocation6 + $0xc4] ss:$8 sps:$4 sm:$0xff]  }
  0x33   :  { %v4939_v27 = vld [vmem:[#allocation6 + $0xc0] ss:$8 sps:$4 sm:$0xff]   ;;  %v4940_v28 = vld [vmem:[#allocation6 + $0xd4] ss:$8 sps:$4 sm:$0xff]   ;;  %v4942_v29 = vld [vmem:[#allocation6 + $0xd0] ss:$8 sps:$4 sm:$0xff]  }
  0x34   :  { %1803 = vmatpush1.bf16.msra.mxu0 %v4909_v6  ;;  %v4943_v30 = vld [vmem:[#allocation6 + $0xe4] ss:$8 sps:$4 sm:$0xff]   ;;  %v4945_v31 = vld [vmem:[#allocation6 + $0xe0] ss:$8 sps:$4 sm:$0xff]   ;;  %v4946_v32 = vld [vmem:[#allocation6 + $0xf4] ss:$8 sps:$4 sm:$0xff]  }
  0x35   :  { %1804 = vmatprep.subr.bf16.mxu0 %v4910_v7  ;;  %v4948_v33 = vld [vmem:[#allocation6 + $0xf0] ss:$8 sps:$4 sm:$0xff]   ;;  %v5001_v34 = vld [vmem:[#allocation6 + $0x104] ss:$8 sps:$4 sm:$0xff]   ;;  %v4999_v37 = vld [vmem:[#allocation6 + $0x100] ss:$8 sps:$4 sm:$0xff]  }
  0x36   :  { %v4949_v35 = vld [vmem:[#allocation3] ss:$24 sps:$4 sm:$0xff]   ;;  %v4952_v36 = vld [vmem:[#allocation3 + $0x34] ss:$24 sps:$4 sm:$0xff]   ;;  %v4954_v38 = vld [vmem:[#allocation3 + $0x30] ss:$24 sps:$4 sm:$0xff]  }
  0x37   :  { %v4955_v39 = vld [vmem:[#allocation3 + $0x64] ss:$24 sps:$4 sm:$0xff]   ;;  %v5008_v40 = vld [vmem:[#allocation6 + $0x110] ss:$8 sps:$4 sm:$0xff]   ;;  %v4958_v43 = vld [vmem:[#allocation3 + $0x94] ss:$24 sps:$4 sm:$0xff]  }
  0x38   :  { %1805 = vmatpush1.bf16.msra.mxu0 %v4912_v8  ;;  %v5010_v41 = vld [vmem:[#allocation6 + $0x114] ss:$8 sps:$4 sm:$0xff]   ;;  %v4957_v42 = vld [vmem:[#allocation3 + $0x60] ss:$24 sps:$4 sm:$0xff]   ;;  %v4960_v44 = vld [vmem:[#allocation3 + $0x90] ss:$24 sps:$4 sm:$0xff]  }
  0x39   :  { %1806 = vmatprep.subr.bf16.mxu0 %v4913_v9  ;;  %v4961_v45 = vld [vmem:[#allocation3 + $0xc4] ss:$24 sps:$4 sm:$0xff]   ;;  %v5017_v46 = vld [vmem:[#allocation6 + $0x120] ss:$8 sps:$4 sm:$0xff]   ;;  %v4964_v49 = vld [vmem:[#allocation3 + $0xf4] ss:$24 sps:$4 sm:$0xff]  }
  0x3a   :  { %v5019_v47 = vld [vmem:[#allocation6 + $0x124] ss:$8 sps:$4 sm:$0xff]   ;;  %v4963_v48 = vld [vmem:[#allocation3 + $0xc0] ss:$24 sps:$4 sm:$0xff]   ;;  %v4966_v50 = vld [vmem:[#allocation3 + $0xf0] ss:$24 sps:$4 sm:$0xff]  }
  0x3b   :  { %v4967_v51 = vld [vmem:[#allocation3 + $0x124] ss:$24 sps:$4 sm:$0xff]   ;;  %v5026_v52 = vld [vmem:[#allocation6 + $0x130] ss:$8 sps:$4 sm:$0xff]   ;;  %v4970_v55 = vld [vmem:[#allocation3 + $0x154] ss:$24 sps:$4 sm:$0xff]  }
  0x3c   :  { %1807 = vmatpush1.bf16.msra.mxu0 %v4915_v10  ;;  %v5028_v53 = vld [vmem:[#allocation6 + $0x134] ss:$8 sps:$4 sm:$0xff]   ;;  %v4969_v54 = vld [vmem:[#allocation3 + $0x120] ss:$24 sps:$4 sm:$0xff]   ;;  %v4972_v56 = vld [vmem:[#allocation3 + $0x150] ss:$24 sps:$4 sm:$0xff]  }
  0x3d   :  { %1808 = vmatprep.subr.bf16.mxu0 %v4916_v11  ;;  %v4973_v57 = vld [vmem:[#allocation3 + $0x184] ss:$24 sps:$4 sm:$0xff]   ;;  %v5035_v58 = vld [vmem:[#allocation6 + $0x140] ss:$8 sps:$4 sm:$0xff]   ;;  %v4976_v61 = vld [vmem:[#allocation3 + $0x1b4] ss:$24 sps:$4 sm:$0xff]  }
  0x3e   :  { %v5037_v59 = vld [vmem:[#allocation6 + $0x144] ss:$8 sps:$4 sm:$0xff]   ;;  %v4975_v60 = vld [vmem:[#allocation3 + $0x180] ss:$24 sps:$4 sm:$0xff]   ;;  %v4978_v62 = vld [vmem:[#allocation3 + $0x1b0] ss:$24 sps:$4 sm:$0xff]  }
  0x3f   :  { %v4979_v63 = vld [vmem:[#allocation3 + $0x1e4] ss:$24 sps:$4 sm:$0xff]   ;;  %v5044_v0 = vld [vmem:[#allocation6 + $0x150] ss:$8 sps:$4 sm:$0xff]   ;;  %v4982_v3 = vld [vmem:[#allocation3 + $0x214] ss:$24 sps:$4 sm:$0xff]  }
  0x40   :  { %1809 = vmatpush1.bf16.msra.mxu0 %v4918_v12  ;;  %v5046_v1 = vld [vmem:[#allocation6 + $0x154] ss:$8 sps:$4 sm:$0xff]   ;;  %v4981_v2 = vld [vmem:[#allocation3 + $0x1e0] ss:$24 sps:$4 sm:$0xff]   ;;  %v4984_v4 = vld [vmem:[#allocation3 + $0x210] ss:$24 sps:$4 sm:$0xff]  }
  0x41   :  { %1810 = vmatprep.subr.bf16.mxu0 %v4919_v13  ;;  %v4985_v5 = vld [vmem:[#allocation3 + $0x244] ss:$24 sps:$4 sm:$0xff]   ;;  %v5051_v7 = vld [vmem:[#allocation6 + $0x160] ss:$8 sps:$4 sm:$0xff]   ;;  %v5054_v9 = vld [vmem:[#allocation6 + $0x170] ss:$8 sps:$4 sm:$0xff]  }
  0x42   :  { %v5053_v6 = vld [vmem:[#allocation6 + $0x164] ss:$8 sps:$4 sm:$0xff]   ;;  %v5056_v8 = vld [vmem:[#allocation6 + $0x174] ss:$8 sps:$4 sm:$0xff]   ;;  %v4987_v10 = vld [vmem:[#allocation3 + $0x240] ss:$24 sps:$4 sm:$0xff]  }
  0x43   :  { %v4988_v11 = vld [vmem:[#allocation3 + $0x274] ss:$24 sps:$4 sm:$0xff]   ;;  %v5060_v13 = vld [vmem:[#allocation6 + $0x180] ss:$8 sps:$4 sm:$0xff]   ;;  %vm3548_vm0 = vcmask 261120  }
  0x44   :  { %1811 = vmatpush1.bf16.msra.mxu0 %v4921_v15  ;;  %v5062_v12 = vld [vmem:[#allocation6 + $0x184] ss:$8 sps:$4 sm:$0xff]   ;;  %v5065_v14 = vld [vmem:[#allocation6 + $0x194] ss:$8 sps:$4 sm:$0xff]   ;;  %v5063_v15 = vld [vmem:[#allocation6 + $0x190] ss:$8 sps:$4 sm:$0xff]  }
  0x45   :  { %1812 = vmatprep.subr.bf16.mxu0 %v4922_v16  ;;  %v4990_v16 = vld [vmem:[#allocation3 + $0x270] ss:$24 sps:$4 sm:$0xff]   ;;  %vm6363_vm1 = vmpackc.low %vm3548_vm0, %vm3548_vm0 }
  0x48   :  { %1813 = vmatpush1.bf16.msra.mxu0 %v4924_v17  ;;  %v4991_v17 = vld [vmem:[#allocation3 + $0x2a4] ss:$24 sps:$4 sm:$0xff]  }
  0x49   :  { %1814 = vmatprep.subr.bf16.mxu0 %v4925_v18  ;;  %v5071_v18 = vld [vmem:[#allocation6 + $0x1a4] ss:$8 sps:$4 sm:$0xff]  }
  0x4c   :  { %1815 = vmatpush1.bf16.msra.mxu0 %v4927_v19  ;;  %v5069_v19 = vld [vmem:[#allocation6 + $0x1a0] ss:$8 sps:$4 sm:$0xff]  }
  0x4d   :  { %1816 = vmatprep.subr.bf16.mxu0 %v4928_v20  ;;  %v5072_v20 = vld [vmem:[#allocation6 + $0x204] ss:$8 sps:$4 sm:$0xff]  }
  0x4e   :  { %4475 = vmatprep.subr.bf16.mxu1 %v5072_v20 }
  0x50   :  { %1817 = vmatpush1.bf16.msra.mxu0 %v4930_v21  ;;  %v5505_v21 = vld [vmem:[#allocation6 + $0x200] ss:$8 sps:$4 sm:$0xff]  }
  0x51   :  { %1818 = vmatprep.subr.bf16.mxu0 %v4931_v22  ;;  %v5075_v22 = vld [vmem:[#allocation6 + $0x1b0] ss:$8 sps:$4 sm:$0xff]   ;;  %4491 = vmatpush1.bf16.msra.mxu1 %v5505_v21 }
  0x54   :  { %1819 = vmatpush1.bf16.msra.mxu0 %v4933_v23  ;;  %v5077_v23 = vld [vmem:[#allocation6 + $0x1b4] ss:$8 sps:$4 sm:$0xff]  }
  0x55   :  { %1820 = vmatprep.subr.bf16.mxu0 %v4934_v24  ;;  %v5507_v24 = vld [vmem:[#allocation6 + $0x214] ss:$8 sps:$4 sm:$0xff]  }
  0x56   :  { %4476 = vmatprep.subr.bf16.mxu1 %v5507_v24 }
  0x58   :  { %1821 = vmatpush1.bf16.msra.mxu0 %v4936_v25  ;;  %v5510_v25 = vld [vmem:[#allocation6 + $0x210] ss:$8 sps:$4 sm:$0xff]  }
  0x59   :  { %1822 = vmatprep.subr.bf16.mxu0 %v4937_v26  ;;  %v4993_v26 = vld [vmem:[#allocation3 + $0x2a0] ss:$24 sps:$4 sm:$0xff]   ;;  %4492 = vmatpush1.bf16.msra.mxu1 %v5510_v25 }
  0x5c   :  { %1823 = vmatpush1.bf16.msra.mxu0 %v4939_v27  ;;  %v4994_v27 = vld [vmem:[#allocation3 + $0x2d4] ss:$24 sps:$4 sm:$0xff]  }
  0x5d   :  { %1824 = vmatprep.subr.bf16.mxu0 %v4940_v28  ;;  %v5086_v28 = vld [vmem:[#allocation6 + $0x1c4] ss:$8 sps:$4 sm:$0xff]  }
  0x60   :  { %1825 = vmatpush1.bf16.msra.mxu0 %v4942_v29  ;;  %v5084_v29 = vld [vmem:[#allocation6 + $0x1c0] ss:$8 sps:$4 sm:$0xff]  }
  0x61   :  { %1826 = vmatprep.subr.bf16.mxu0 %v4943_v30  ;;  %v5514_v30 = vld [vmem:[#allocation6 + $0x224] ss:$8 sps:$4 sm:$0xff]  }
  0x62   :  { %4477 = vmatprep.subr.bf16.mxu1 %v5514_v30 }
  0x64   :  { %1827 = vmatpush1.bf16.msra.mxu0 %v4945_v31  ;;  %v5516_v31 = vld [vmem:[#allocation6 + $0x220] ss:$8 sps:$4 sm:$0xff]  }
  0x65   :  { %1828 = vmatprep.subr.bf16.mxu0 %v4946_v32  ;;  %v5090_v32 = vld [vmem:[#allocation6 + $0x1d0] ss:$8 sps:$4 sm:$0xff]   ;;  %4493 = vmatpush1.bf16.msra.mxu1 %v5516_v31 }
  0x68   :  { %1829 = vmatpush1.bf16.msra.mxu0 %v4948_v33  ;;  %v5092_v33 = vld [vmem:[#allocation6 + $0x1d4] ss:$8 sps:$4 sm:$0xff]  }
  0x69   :  { %2151 = vmatprep.subr.bf16.mxu0 %v5001_v34  ;;  %v5518_v34 = vld [vmem:[#allocation6 + $0x234] ss:$8 sps:$4 sm:$0xff]  }
  0x6a   :  { %4478 = vmatprep.subr.bf16.mxu1 %v5518_v34 }
  0x6b   :  { %1831 = vmatmul.mubr.bf16.vlgmr.msra.gmra.mrb[0].mxu0 %v4949_v35  ;;  %v5522_v35 = vld [vmem:[#allocation6 + $0x230] ss:$8 sps:$4 sm:$0xff]  }
  0x6c   :  { %1840 = vmatprep.mubr.bf16.mxu0 %v4952_v36  ;;  %2152 = vmatpush1.bf16.msra.mxu0 %v4999_v37  ;;  %v4996_v36 = vld [vmem:[#allocation3 + $0x2d0] ss:$24 sps:$4 sm:$0xff]   ;;  %v4997_v37 = vld [vmem:[#allocation3 + $0x304] ss:$24 sps:$4 sm:$0xff]  }
  0x6d   :  { %2153 = vmatprep.subr.bf16.mxu0 %v5010_v41  ;;  %4494 = vmatpush1.bf16.msra.mxu1 %v5522_v35  ;;  %v5528_v41 = vld [vmem:[#allocation6 + $0x240] ss:$8 sps:$4 sm:$0xff]  }
  0x70   :  { %2154 = vmatpush1.bf16.msra.mxu0 %v5008_v40  ;;  %v5526_v40 = vld [vmem:[#allocation6 + $0x244] ss:$8 sps:$4 sm:$0xff]  }
  0x71   :  { %2155 = vmatprep.subr.bf16.mxu0 %v5019_v47  ;;  %4479 = vmatprep.subr.bf16.mxu1 %v5526_v40  ;;  %v5003_v47 = vld [vmem:[#allocation3 + $0x334] ss:$24 sps:$4 sm:$0xff]  }
  0x72   :  { %4495 = vmatpush1.bf16.msra.mxu1 %v5528_v41 }
  0x73   :  { %1841 = vmatmul.mubr.bf16.gmra.mrb[4].mxu0 %v4954_v38  ;;  %v5101_v38 = vld [vmem:[#allocation6 + $0x1e4] ss:$8 sps:$4 sm:$0xff]  }
  0x74   :  { %1850 = vmatprep.mubr.bf16.mxu0 %v4955_v39  ;;  %2156 = vmatpush1.bf16.msra.mxu0 %v5017_v46  ;;  %v5099_v39 = vld [vmem:[#allocation6 + $0x1e0] ss:$8 sps:$4 sm:$0xff]  }
  0x75   :  { %2157 = vmatprep.subr.bf16.mxu0 %v5028_v53  ;;  %v5002_v46 = vld [vmem:[#allocation3 + $0x300] ss:$24 sps:$4 sm:$0xff]   ;;  %v5006_v53 = vld [vmem:[#allocation3 + $0x364] ss:$24 sps:$4 sm:$0xff]  }
  0x78   :  { %2158 = vmatpush1.bf16.msra.mxu0 %v5026_v52  ;;  %v5005_v52 = vld [vmem:[#allocation3 + $0x330] ss:$24 sps:$4 sm:$0xff]  }
  0x79   :  { %2159 = vmatprep.subr.bf16.mxu0 %v5037_v59  ;;  %v5012_v59 = vld [vmem:[#allocation3 + $0x394] ss:$24 sps:$4 sm:$0xff]  }
  0x7b   :  { %1851 = vmatmul.mubr.bf16.gmra.mrb[8].mxu0 %v4957_v42  ;;  %v5105_v42 = vld [vmem:[#allocation6 + $0x1f0] ss:$8 sps:$4 sm:$0xff]  }
  0x7c   :  { %1860 = vmatprep.mubr.bf16.mxu0 %v4958_v43  ;;  %2160 = vmatpush1.bf16.msra.mxu0 %v5035_v58  ;;  %v5107_v43 = vld [vmem:[#allocation6 + $0x1f4] ss:$8 sps:$4 sm:$0xff]   ;;  %v5011_v58 = vld [vmem:[#allocation3 + $0x360] ss:$24 sps:$4 sm:$0xff]  }
  0x7d   :  { %2161 = vmatprep.subr.bf16.mxu0 %v5046_v1  ;;  %v5015_v1 = vld [vmem:[#allocation3 + $0x3c4] ss:$24 sps:$4 sm:$0xff]  }
  0x80   :  { %2162 = vmatpush1.bf16.msra.mxu0 %v5044_v0  ;;  %v5014_v0 = vld [vmem:[#allocation3 + $0x390] ss:$24 sps:$4 sm:$0xff]  }
  0x81   :  { %2163 = vmatprep.subr.bf16.mxu0 %v5053_v6  ;;  %v5020_v6 = vld [vmem:[#allocation3 + $0x3c0] ss:$24 sps:$4 sm:$0xff]  }
  0x83   :  { %1861 = vmatmul.mubr.bf16.gmra.mrb[12].mxu0 %v4960_v44  ;;  %v5530_v44 = vld [vmem:[#allocation6 + $0x254] ss:$8 sps:$4 sm:$0xff]  }
  0x84   :  { %1870 = vmatprep.mubr.bf16.mxu0 %v4961_v45  ;;  %2164 = vmatpush1.bf16.msra.mxu0 %v5051_v7  ;;  %v5534_v45 = vld [vmem:[#allocation6 + $0x250] ss:$8 sps:$4 sm:$0xff]   ;;  %v5021_v7 = vld [vmem:[#allocation3 + $0x3f4] ss:$24 sps:$4 sm:$0xff]  }
  0x85   :  { %2165 = vmatprep.subr.bf16.mxu0 %v5056_v8  ;;  %4480 = vmatprep.subr.bf16.mxu1 %v5530_v44  ;;  %v5586_v8 = vld [vmem:[#allocation6 + $0x2e4] ss:$8 sps:$4 sm:$0xff]  }
  0x86   :  { %4496 = vmatpush1.bf16.msra.mxu1 %v5534_v45 }
  0x88   :  { %2166 = vmatpush1.bf16.msra.mxu0 %v5054_v9  ;;  %v5588_v9 = vld [vmem:[#allocation6 + $0x2e0] ss:$8 sps:$4 sm:$0xff]  }
  0x89   :  { %2167 = vmatprep.subr.bf16.mxu0 %v5062_v12  ;;  %v5023_v12 = vld [vmem:[#allocation3 + $0x3f0] ss:$24 sps:$4 sm:$0xff]  }
  0x8b   :  { %1871 = vmatmul.mubr.bf16.gmra.mrb[16].mxu0 %v4963_v48  ;;  %v5538_v48 = vld [vmem:[#allocation6 + $0x264] ss:$8 sps:$4 sm:$0xff]  }
  0x8c   :  { %1880 = vmatprep.mubr.bf16.mxu0 %v4964_v49  ;;  %2168 = vmatpush1.bf16.msra.mxu0 %v5060_v13  ;;  %v5540_v49 = vld [vmem:[#allocation6 + $0x260] ss:$8 sps:$4 sm:$0xff]   ;;  %v5024_v13 = vld [vmem:[#allocation3 + $0x424] ss:$24 sps:$4 sm:$0xff]  }
  0x8d   :  { %2169 = vmatprep.subr.bf16.mxu0 %v5065_v14  ;;  %4481 = vmatprep.subr.bf16.mxu1 %v5538_v48  ;;  %v5161_v14 = vld [vmem:[#allocation3 + $0x104] ss:$24 sps:$4 sm:$0xff]  }
  0x8e   :  { %4497 = vmatpush1.bf16.msra.mxu1 %v5540_v49  ;;  %2586 = vmatprep.mubr.bf16.mxu1 %v5161_v14  ;;  %v5209_v14 = vld [vmem:[#allocation3 + $0x280] ss:$24 sps:$4 sm:$0xff]  }
  0x90   :  { %2170 = vmatpush1.bf16.msra.mxu0 %v5063_v15  ;;  %v5159_v15 = vld [vmem:[#allocation3 + $0x100] ss:$24 sps:$4 sm:$0xff]  }
  0x91   :  { %2171 = vmatprep.subr.bf16.mxu0 %v5071_v18  ;;  %v5165_v18 = vld [vmem:[#allocation3 + $0x134] ss:$24 sps:$4 sm:$0xff]  }
  0x93   :  { %1881 = vmatmul.mubr.bf16.gmra.mrb[20].mxu0 %v4966_v50  ;;  %v5542_v50 = vld [vmem:[#allocation6 + $0x274] ss:$8 sps:$4 sm:$0xff]  }
  0x94   :  { %1890 = vmatprep.mubr.bf16.mxu0 %v4967_v51  ;;  %2172 = vmatpush1.bf16.msra.mxu0 %v5069_v19  ;;  %v5546_v51 = vld [vmem:[#allocation6 + $0x270] ss:$8 sps:$4 sm:$0xff]  }
  0x95   :  { %2173 = vmatprep.subr.bf16.mxu0 %v5077_v23  ;;  %4482 = vmatprep.subr.bf16.mxu1 %v5542_v50  ;;  %v5167_v19 = vld [vmem:[#allocation3 + $0x130] ss:$24 sps:$4 sm:$0xff]   ;;  %v5171_v23 = vld [vmem:[#allocation3 + $0x164] ss:$24 sps:$4 sm:$0xff]  }
  0x96   :  { %4498 = vmatpush1.bf16.msra.mxu1 %v5546_v51 }
  0x98   :  { %2174 = vmatpush1.bf16.msra.mxu0 %v5075_v22  ;;  %v5033_v22 = vld [vmem:[#allocation3 + $0x484] ss:$24 sps:$4 sm:$0xff]  }
  0x99   :  { %2175 = vmatprep.subr.bf16.mxu0 %v5086_v28  ;;  %v5039_v28 = vld [vmem:[#allocation3 + $0x4b4] ss:$24 sps:$4 sm:$0xff]  }
  0x9b   :  { %1891 = vmatmul.mubr.bf16.gmra.mrb[24].mxu0 %v4969_v54  ;;  %v5550_v54 = vld [vmem:[#allocation6 + $0x284] ss:$8 sps:$4 sm:$0xff]  }
  0x9c   :  { %1900 = vmatprep.mubr.bf16.mxu0 %v4970_v55  ;;  %2176 = vmatpush1.bf16.msra.mxu0 %v5084_v29  ;;  %v5552_v55 = vld [vmem:[#allocation6 + $0x280] ss:$8 sps:$4 sm:$0xff]   ;;  %v5177_v29 = vld [vmem:[#allocation3 + $0x194] ss:$24 sps:$4 sm:$0xff]  }
  0x9d   :  { %2177 = vmatprep.subr.bf16.mxu0 %v5092_v33  ;;  %4483 = vmatprep.subr.bf16.mxu1 %v5550_v54  ;;  %v5041_v33 = vld [vmem:[#allocation3 + $0x4b0] ss:$24 sps:$4 sm:$0xff]  }
  0x9e   :  { %4499 = vmatpush1.bf16.msra.mxu1 %v5552_v55 }
  0xa0   :  { %2178 = vmatpush1.bf16.msra.mxu0 %v5090_v32  ;;  %v5179_v32 = vld [vmem:[#allocation3 + $0x190] ss:$24 sps:$4 sm:$0xff]  }
  0xa1   :  { %2179 = vmatprep.subr.bf16.mxu0 %v5101_v38  ;;  %v5185_v38 = vld [vmem:[#allocation3 + $0x1c0] ss:$24 sps:$4 sm:$0xff]  }
  0xa3   :  { %1901 = vmatmul.mubr.bf16.gmra.mrb[28].mxu0 %v4972_v56  ;;  %v5554_v56 = vld [vmem:[#allocation6 + $0x294] ss:$8 sps:$4 sm:$0xff]  }
  0xa4   :  { %1910 = vmatprep.mubr.bf16.mxu0 %v4973_v57  ;;  %2180 = vmatpush1.bf16.msra.mxu0 %v5099_v39  ;;  %v5558_v57 = vld [vmem:[#allocation6 + $0x290] ss:$8 sps:$4 sm:$0xff]  }
  0xa5   :  { %2181 = vmatprep.subr.bf16.mxu0 %v5107_v43  ;;  %4484 = vmatprep.subr.bf16.mxu1 %v5554_v56  ;;  %v5047_v39 = vld [vmem:[#allocation3 + $0x4e0] ss:$24 sps:$4 sm:$0xff]   ;;  %v5189_v43 = vld [vmem:[#allocation3 + $0x1f4] ss:$24 sps:$4 sm:$0xff]  }
  0xa6   :  { %4500 = vmatpush1.bf16.msra.mxu1 %v5558_v57 }
  0xa8   :  { %2182 = vmatpush1.bf16.msra.mxu0 %v5105_v42  ;;  %v5048_v42 = vld [vmem:[#allocation3 + $0x514] ss:$24 sps:$4 sm:$0xff]  }
  0xa9   :  { %2504 = vmatprep.subr.bf16.mxu0 %v5072_v20  ;;  %v5032_v20 = vld [vmem:[#allocation3 + $0x450] ss:$24 sps:$4 sm:$0xff]  }
  0xab   :  { %1911 = vmatmul.mubr.bf16.gmra.mrb[32].mxu0 %v4975_v60  ;;  %v5562_v60 = vld [vmem:[#allocation6 + $0x2a4] ss:$8 sps:$4 sm:$0xff]  }
  0xac   :  { %1920 = vmatprep.mubr.bf16.mxu0 %v4976_v61  ;;  %v5564_v61 = vld [vmem:[#allocation6 + $0x2a0] ss:$8 sps:$4 sm:$0xff]   ;;  %4485 = vmatprep.subr.bf16.mxu1 %v5562_v60 }
  0xad   :  { %4501 = vmatpush1.bf16.msra.mxu1 %v5564_v61 }
  0xb3   :  { %1921 = vmatmul.mubr.bf16.gmra.mrb[36].mxu0 %v4978_v62  ;;  %v5566_v62 = vld [vmem:[#allocation6 + $0x2b4] ss:$8 sps:$4 sm:$0xff]  }
  0xb4   :  { %1930 = vmatprep.mubr.bf16.mxu0 %v4979_v63  ;;  %v5570_v63 = vld [vmem:[#allocation6 + $0x2b0] ss:$8 sps:$4 sm:$0xff]   ;;  %4486 = vmatprep.subr.bf16.mxu1 %v5566_v62 }
  0xb5   :  { %4502 = vmatpush1.bf16.msra.mxu1 %v5570_v63 }
  0xbb   :  { %1931 = vmatmul.mubr.bf16.gmra.mrb[40].mxu0 %v4981_v2  ;;  %v5574_v2 = vld [vmem:[#allocation6 + $0x2c4] ss:$8 sps:$4 sm:$0xff]  }
  0xbc   :  { %1940 = vmatprep.mubr.bf16.mxu0 %v4982_v3  ;;  %v5576_v3 = vld [vmem:[#allocation6 + $0x2c0] ss:$8 sps:$4 sm:$0xff]   ;;  %4487 = vmatprep.subr.bf16.mxu1 %v5574_v2 }
  0xbd   :  { %4503 = vmatpush1.bf16.msra.mxu1 %v5576_v3 }
  0xc3   :  { %1941 = vmatmul.mubr.bf16.gmra.mrb[44].mxu0 %v4984_v4  ;;  %v5578_v4 = vld [vmem:[#allocation6 + $0x2d4] ss:$8 sps:$4 sm:$0xff]  }
  0xc4   :  { %1950 = vmatprep.mubr.bf16.mxu0 %v4985_v5  ;;  %v5582_v5 = vld [vmem:[#allocation6 + $0x2d0] ss:$8 sps:$4 sm:$0xff]   ;;  %4488 = vmatprep.subr.bf16.mxu1 %v5578_v4 }
  0xc5   :  { %4504 = vmatpush1.bf16.msra.mxu1 %v5582_v5 }
  0xc6   :  { %4489 = vmatprep.subr.bf16.mxu1 %v5586_v8 }
  0xc9   :  { %4505 = vmatpush1.bf16.msra.mxu1 %v5588_v9 }
  0xcb   :  { %1951 = vmatmul.mubr.bf16.gmra.mrb[48].mxu0 %v4987_v10  ;;  %v5590_v10 = vld [vmem:[#allocation6 + $0x2f4] ss:$8 sps:$4 sm:$0xff]  }
  0xcc   :  { %1960 = vmatprep.mubr.bf16.mxu0 %v4988_v11  ;;  %v5594_v11 = vld [vmem:[#allocation6 + $0x2f0] ss:$8 sps:$4 sm:$0xff]   ;;  %4490 = vmatprep.subr.bf16.mxu1 %v5590_v10 }
  0xcd   :  { %4506 = vmatpush1.bf16.msra.mxu1 %v5594_v11 }
  0xd0   :  { %2587 = vmatmul.mubr.bf16.vlgmr.msra.gmra.mrb[0].mxu1 %v5159_v15  ;;  %v5083_v15 = vld [vmem:[#allocation3 + $0x5a0] ss:$24 sps:$4 sm:$0xff]  }
  0xd1   :  { %2596 = vmatprep.mubr.bf16.mxu1 %v5165_v18  ;;  %v5215_v18 = vld [vmem:[#allocation3 + $0x2b0] ss:$24 sps:$4 sm:$0xff]  }
  0xd3   :  { %1961 = vmatmul.mubr.bf16.gmra.mrb[52].mxu0 %v4990_v16  ;;  %v5029_v16 = vld [vmem:[#allocation3 + $0x420] ss:$24 sps:$4 sm:$0xff]  }
  0xd4   :  { %1970 = vmatprep.mubr.bf16.mxu0 %v4991_v17  ;;  %v5030_v17 = vld [vmem:[#allocation3 + $0x454] ss:$24 sps:$4 sm:$0xff]  }
  0xd8   :  { %2597 = vmatmul.mubr.bf16.gmra.mrb[4].mxu1 %v5167_v19  ;;  %v5098_v19 = vld [vmem:[#allocation3 + $0x5d0] ss:$24 sps:$4 sm:$0xff]  }
  0xd9   :  { %2606 = vmatprep.mubr.bf16.mxu1 %v5171_v23  ;;  %v5221_v23 = vld [vmem:[#allocation3 + $0x2e0] ss:$24 sps:$4 sm:$0xff]  }
  0xdb   :  { %1971 = vmatmul.mubr.bf16.gmra.mrb[56].mxu0 %v4993_v26  ;;  %v5173_v26 = vld [vmem:[#allocation3 + $0x160] ss:$24 sps:$4 sm:$0xff]  }
  0xdc   :  { %1980 = vmatprep.mubr.bf16.mxu0 %v4994_v27  ;;  %v5038_v27 = vld [vmem:[#allocation3 + $0x480] ss:$24 sps:$4 sm:$0xff]  }
  0xe0   :  { %2607 = vmatmul.mubr.bf16.gmra.mrb[8].mxu1 %v5173_v26  ;;  %v5110_v26 = vld [vmem:[#allocation3 + $0x8] ss:$24 sps:$4 sm:$0xff]  }
  0xe1   :  { %2616 = vmatprep.mubr.bf16.mxu1 %v5177_v29  ;;  %v5227_v29 = vld [vmem:[#allocation3 + $0x310] ss:$24 sps:$4 sm:$0xff]  }
  0xe3   :  { %1981 = vmatmul.mubr.bf16.gmra.mrb[60].mxu0 %v4996_v36  ;;  %v5042_v36 = vld [vmem:[#allocation3 + $0x4e4] ss:$24 sps:$4 sm:$0xff]  }
  0xe4   :  { %1990 = vmatprep.mubr.bf16.mxu0 %v4997_v37  ;;  %v5183_v37 = vld [vmem:[#allocation3 + $0x1c4] ss:$24 sps:$4 sm:$0xff]  }
  0xe8   :  { %2617 = vmatmul.mubr.bf16.gmra.mrb[12].mxu1 %v5179_v32  ;;  %v5122_v32 = vld [vmem:[#allocation3 + $0x38] ss:$24 sps:$4 sm:$0xff]  }
  0xe9   :  { %2626 = vmatprep.mubr.bf16.mxu1 %v5183_v37  ;;  %v5233_v37 = vld [vmem:[#allocation3 + $0x340] ss:$24 sps:$4 sm:$0xff]  }
  0xeb   :  { %1991 = vmatmul.mubr.bf16.gmra.mrb[64].mxu0 %v5002_v46  ;;  %v5191_v46 = vld [vmem:[#allocation3 + $0x1f0] ss:$24 sps:$4 sm:$0xff]  }
  0xec   :  { %2000 = vmatprep.mubr.bf16.mxu0 %v5003_v47  ;;  %v5050_v47 = vld [vmem:[#allocation3 + $0x510] ss:$24 sps:$4 sm:$0xff]  }
  0xf0   :  { %2627 = vmatmul.mubr.bf16.gmra.mrb[16].mxu1 %v5185_v38  ;;  %v5137_v38 = vld [vmem:[#allocation3 + $0x9c] ss:$24 sps:$4 sm:$0xff]  }
  0xf1   :  { %2636 = vmatprep.mubr.bf16.mxu1 %v5189_v43  ;;  %v5281_v43 = vld [vmem:[#allocation3 + $0x4c0] ss:$24 sps:$4 sm:$0xff]  }
  0xf3   :  { %2001 = vmatmul.mubr.bf16.gmra.mrb[68].mxu0 %v5005_v52  ;;  %v5057_v52 = vld [vmem:[#allocation3 + $0x544] ss:$24 sps:$4 sm:$0xff]  }
  0xf4   :  { %2010 = vmatprep.mubr.bf16.mxu0 %v5006_v53  ;;  %v5195_v53 = vld [vmem:[#allocation3 + $0x224] ss:$24 sps:$4 sm:$0xff]  }
  0xf8   :  { %2637 = vmatmul.mubr.bf16.gmra.mrb[20].mxu1 %v5191_v46  ;;  %v5285_v46 = vld [vmem:[#allocation3 + $0x4f4] ss:$24 sps:$4 sm:$0xff]  }
  0xf9   :  { %2646 = vmatprep.mubr.bf16.mxu1 %v5195_v53  ;;  %v5291_v53 = vld [vmem:[#allocation3 + $0x524] ss:$24 sps:$4 sm:$0xff]  }
  0xfb   :  { %2011 = vmatmul.mubr.bf16.gmra.mrb[72].mxu0 %v5011_v58  ;;  %v5197_v58 = vld [vmem:[#allocation3 + $0x220] ss:$24 sps:$4 sm:$0xff]  }
  0xfc   :  { %2020 = vmatprep.mubr.bf16.mxu0 %v5012_v59  ;;  %v5059_v59 = vld [vmem:[#allocation3 + $0x540] ss:$24 sps:$4 sm:$0xff]  }
 0x100   :  { %2647 = vmatmul.mubr.bf16.gmra.mrb[24].mxu1 %v5197_v58  ;;  %v5293_v58 = vld [vmem:[#allocation3 + $0x520] ss:$24 sps:$4 sm:$0xff]  }
 0x103   :  { %2021 = vmatmul.mubr.bf16.gmra.mrb[76].mxu0 %v5014_v0  ;;  %v5066_v0 = vld [vmem:[#allocation3 + $0x574] ss:$24 sps:$4 sm:$0xff]  }
 0x104   :  { %2030 = vmatprep.mubr.bf16.mxu0 %v5015_v1  ;;  %v5201_v1 = vld [vmem:[#allocation3 + $0x254] ss:$24 sps:$4 sm:$0xff]  }
 0x105   :  { %2656 = vmatprep.mubr.bf16.mxu1 %v5201_v1  ;;  %v5297_v1 = vld [vmem:[#allocation3 + $0x554] ss:$24 sps:$4 sm:$0xff]  }
 0x10b   :  { %2031 = vmatmul.mubr.bf16.gmra.mrb[80].mxu0 %v5020_v6  ;;  %v5203_v6 = vld [vmem:[#allocation3 + $0x250] ss:$24 sps:$4 sm:$0xff]  }
 0x10c   :  { %2040 = vmatprep.mubr.bf16.mxu0 %v5021_v7  ;;  %2657 = vmatmul.mubr.bf16.gmra.mrb[28].mxu1 %v5203_v6  ;;  %v5068_v7 = vld [vmem:[#allocation3 + $0x570] ss:$24 sps:$4 sm:$0xff]  }
 0x10d   :  { %v5299_v6 = vld [vmem:[#allocation3 + $0x550] ss:$24 sps:$4 sm:$0xff]  }
 0x113   :  { %2041 = vmatmul.mubr.bf16.gmra.mrb[84].mxu0 %v5023_v12  ;;  %v5080_v12 = vld [vmem:[#allocation3 + $0x5a4] ss:$24 sps:$4 sm:$0xff]  }
 0x114   :  { %2050 = vmatprep.mubr.bf16.mxu0 %v5024_v13  ;;  %v5207_v13 = vld [vmem:[#allocation3 + $0x284] ss:$24 sps:$4 sm:$0xff]  }
 0x115   :  { %2666 = vmatprep.mubr.bf16.mxu1 %v5207_v13  ;;  %v5303_v13 = vld [vmem:[#allocation3 + $0x584] ss:$24 sps:$4 sm:$0xff]  }
 0x116   :  { %2667 = vmatmul.mubr.bf16.gmra.mrb[32].mxu1 %v5209_v14  ;;  %v5305_v14 = vld [vmem:[#allocation3 + $0x580] ss:$24 sps:$4 sm:$0xff]  }
 0x11b   :  { %2051 = vmatmul.mubr.bf16.gmra.mrb[88].mxu0 %v5029_v16  ;;  %v5095_v16 = vld [vmem:[#allocation3 + $0x5d4] ss:$24 sps:$4 sm:$0xff]  }
 0x11c   :  { %2060 = vmatprep.mubr.bf16.mxu0 %v5030_v17  ;;  %v5213_v17 = vld [vmem:[#allocation3 + $0x2b4] ss:$24 sps:$4 sm:$0xff]  }
 0x11d   :  { %2676 = vmatprep.mubr.bf16.mxu1 %v5213_v17  ;;  %v5309_v17 = vld [vmem:[#allocation3 + $0x5b4] ss:$24 sps:$4 sm:$0xff]  }
 0x11e   :  { %2677 = vmatmul.mubr.bf16.gmra.mrb[36].mxu1 %v5215_v18  ;;  %v5311_v18 = vld [vmem:[#allocation3 + $0x5b0] ss:$24 sps:$4 sm:$0xff]  }
 0x123   :  { %2061 = vmatmul.mubr.bf16.gmra.mrb[92].mxu0 %v5032_v20  ;;  %v5112_v20 = vld [vmem:[#allocation3 + $0xc] ss:$24 sps:$4 sm:$0xff]  }
 0x124   :  { %2070 = vmatprep.mubr.bf16.mxu0 %v5033_v22  ;;  %v5219_v22 = vld [vmem:[#allocation3 + $0x2e4] ss:$24 sps:$4 sm:$0xff]  }
 0x125   :  { %2686 = vmatprep.mubr.bf16.mxu1 %v5219_v22  ;;  %v5315_v22 = vld [vmem:[#allocation3 + $0x5e4] ss:$24 sps:$4 sm:$0xff]  }
 0x126   :  { %2687 = vmatmul.mubr.bf16.gmra.mrb[40].mxu1 %v5221_v23  ;;  %v5317_v23 = vld [vmem:[#allocation3 + $0x5e0] ss:$24 sps:$4 sm:$0xff]  }
 0x12b   :  { %2071 = vmatmul.mubr.bf16.gmra.mrb[96].mxu0 %v5038_v27  ;;  %v5119_v27 = vld [vmem:[#allocation3 + $0x3c] ss:$24 sps:$4 sm:$0xff]  }
 0x12c   :  { %2080 = vmatprep.mubr.bf16.mxu0 %v5039_v28  ;;  %v5225_v28 = vld [vmem:[#allocation3 + $0x314] ss:$24 sps:$4 sm:$0xff]  }
 0x12d   :  { %2696 = vmatprep.mubr.bf16.mxu1 %v5225_v28 }
 0x12e   :  { %2697 = vmatmul.mubr.bf16.gmra.mrb[44].mxu1 %v5227_v29 }
 0x133   :  { %2081 = vmatmul.mubr.bf16.gmra.mrb[100].mxu0 %v5041_v33  ;;  %v5128_v33 = vld [vmem:[#allocation3 + $0x6c] ss:$24 sps:$4 sm:$0xff]  }
 0x134   :  { %2090 = vmatprep.mubr.bf16.mxu0 %v5042_v36  ;;  %v5231_v36 = vld [vmem:[#allocation3 + $0x344] ss:$24 sps:$4 sm:$0xff]  }
 0x135   :  { %2706 = vmatprep.mubr.bf16.mxu1 %v5231_v36  ;;  %v5230_v36 = vld [vmem:[#allocation3 + $0x338] ss:$24 sps:$4 sm:$0xff]  }
 0x136   :  { %2707 = vmatmul.mubr.bf16.gmra.mrb[48].mxu1 %v5233_v37  ;;  %v5234_v37 = vld [vmem:[#allocation3 + $0x36c] ss:$24 sps:$4 sm:$0xff]  }
 0x13b   :  { %2091 = vmatmul.mubr.bf16.gmra.mrb[104].mxu0 %v5047_v39  ;;  %v5275_v39 = vld [vmem:[#allocation3 + $0x490] ss:$24 sps:$4 sm:$0xff]  }
 0x13c   :  { %2100 = vmatprep.mubr.bf16.mxu0 %v5048_v42  ;;  %v5279_v42 = vld [vmem:[#allocation3 + $0x4c4] ss:$24 sps:$4 sm:$0xff]  }
 0x143   :  { %2101 = vmatmul.mubr.bf16.gmra.mrb[108].mxu0 %v5050_v47  ;;  %v5287_v47 = vld [vmem:[#allocation3 + $0x4f0] ss:$24 sps:$4 sm:$0xff]  }
 0x144   :  { %2110 = vmatprep.mubr.bf16.mxu0 %v5057_v52  ;;  %v5198_v52 = vld [vmem:[#allocation3 + $0x24c] ss:$24 sps:$4 sm:$0xff]  }
 0x14b   :  { %2111 = vmatmul.mubr.bf16.gmra.mrb[112].mxu0 %v5059_v59  ;;  %v5200_v59 = vld [vmem:[#allocation3 + $0x248] ss:$24 sps:$4 sm:$0xff]  }
 0x14c   :  { %2120 = vmatprep.mubr.bf16.mxu0 %v5066_v0  ;;  %v5204_v0 = vld [vmem:[#allocation3 + $0x27c] ss:$24 sps:$4 sm:$0xff]  }
 0x153   :  { %2121 = vmatmul.mubr.bf16.gmra.mrb[116].mxu0 %v5068_v7  ;;  %v5206_v7 = vld [vmem:[#allocation3 + $0x278] ss:$24 sps:$4 sm:$0xff]  }
 0x154   :  { %2130 = vmatprep.mubr.bf16.mxu0 %v5080_v12  ;;  %v5210_v12 = vld [vmem:[#allocation3 + $0x2ac] ss:$24 sps:$4 sm:$0xff]  }
 0x15b   :  { %2131 = vmatmul.mubr.bf16.gmra.mrb[120].mxu0 %v5083_v15  ;;  %v5212_v15 = vld [vmem:[#allocation3 + $0x2a8] ss:$24 sps:$4 sm:$0xff]  }
 0x15c   :  { %2140 = vmatprep.mubr.bf16.mxu0 %v5095_v16  ;;  %v5216_v16 = vld [vmem:[#allocation3 + $0x2dc] ss:$24 sps:$4 sm:$0xff]  }
 0x163   :  { %2141 = vmatmul.mubr.bf16.gmra.mrb[124].mxu0 %v5098_v19  ;;  %v5218_v19 = vld [vmem:[#allocation3 + $0x2d8] ss:$24 sps:$4 sm:$0xff]  }
 0x164   :  { %2183 = vmatprep.mubr.bf16.mxu0 %v5112_v20  ;;  %v5222_v20 = vld [vmem:[#allocation3 + $0x30c] ss:$24 sps:$4 sm:$0xff]  }
 0x16b   :  { %2184 = vmatmul.mubr.bf16.vlgmr.msra.gmra.mrb[0].mxu0 %v5110_v26  ;;  %v5224_v26 = vld [vmem:[#allocation3 + $0x308] ss:$24 sps:$4 sm:$0xff]  }
 0x16c   :  { %2193 = vmatprep.mubr.bf16.mxu0 %v5119_v27  ;;  %2505 = vmatpush1.bf16.msra.mxu0 %v5505_v21  ;;  %v5131_v21 = vld [vmem:[#allocation3 + $0x68] ss:$24 sps:$4 sm:$0xff]   ;;  %v5228_v27 = vld [vmem:[#allocation3 + $0x33c] ss:$24 sps:$4 sm:$0xff]  }
 0x16d   :  { %2506 = vmatprep.subr.bf16.mxu0 %v5507_v24  ;;  %v5237_v24 = vld [vmem:[#allocation3 + $0x374] ss:$24 sps:$4 sm:$0xff]  }
 0x16e   :  { %2716 = vmatprep.mubr.bf16.mxu1 %v5237_v24 }
 0x170   :  { %2507 = vmatpush1.bf16.msra.mxu0 %v5510_v25  ;;  %v5239_v25 = vld [vmem:[#allocation3 + $0x370] ss:$24 sps:$4 sm:$0xff]  }
 0x171   :  { %2508 = vmatprep.subr.bf16.mxu0 %v5514_v30  ;;  %2717 = vmatmul.mubr.bf16.gmra.mrb[52].mxu1 %v5239_v25  ;;  %v5140_v30 = vld [vmem:[#allocation3 + $0x98] ss:$24 sps:$4 sm:$0xff]  }
 0x173   :  { %2194 = vmatmul.mubr.bf16.gmra.mrb[4].mxu0 %v5122_v32 }
 0x174   :  { %2203 = vmatprep.mubr.bf16.mxu0 %v5128_v33  ;;  %2509 = vmatpush1.bf16.msra.mxu0 %v5516_v31  ;;  %v5146_v31 = vld [vmem:[#allocation3 + $0xcc] ss:$24 sps:$4 sm:$0xff]  }
 0x175   :  { %2510 = vmatprep.subr.bf16.mxu0 %v5518_v34  ;;  %v5243_v34 = vld [vmem:[#allocation3 + $0x3a4] ss:$24 sps:$4 sm:$0xff]  }
 0x176   :  { %2726 = vmatprep.mubr.bf16.mxu1 %v5243_v34 }
 0x178   :  { %2511 = vmatpush1.bf16.msra.mxu0 %v5522_v35  ;;  %v5245_v35 = vld [vmem:[#allocation3 + $0x3a0] ss:$24 sps:$4 sm:$0xff]  }
 0x179   :  { %2512 = vmatprep.subr.bf16.mxu0 %v5526_v40  ;;  %2727 = vmatmul.mubr.bf16.gmra.mrb[56].mxu1 %v5245_v35  ;;  %v5149_v40 = vld [vmem:[#allocation3 + $0xc8] ss:$24 sps:$4 sm:$0xff]  }
 0x17b   :  { %2204 = vmatmul.mubr.bf16.gmra.mrb[8].mxu0 %v5131_v21 }
 0x17c   :  { %2213 = vmatprep.mubr.bf16.mxu0 %v5137_v38  ;;  %2513 = vmatpush1.bf16.msra.mxu0 %v5528_v41  ;;  %v5155_v41 = vld [vmem:[#allocation3 + $0xfc] ss:$24 sps:$4 sm:$0xff]  }
 0x17d   :  { %2514 = vmatprep.subr.bf16.mxu0 %v5530_v44  ;;  %v5249_v44 = vld [vmem:[#allocation3 + $0x3d4] ss:$24 sps:$4 sm:$0xff]  }
 0x17e   :  { %2736 = vmatprep.mubr.bf16.mxu1 %v5249_v44  ;;  %v5242_v44 = vld [vmem:[#allocation3 + $0x398] ss:$24 sps:$4 sm:$0xff]  }
 0x180   :  { %2515 = vmatpush1.bf16.msra.mxu0 %v5534_v45  ;;  %v5251_v45 = vld [vmem:[#allocation3 + $0x3d0] ss:$24 sps:$4 sm:$0xff]  }
 0x181   :  { %2516 = vmatprep.subr.bf16.mxu0 %v5538_v48  ;;  %2737 = vmatmul.mubr.bf16.gmra.mrb[60].mxu1 %v5251_v45  ;;  %v5158_v48 = vld [vmem:[#allocation3 + $0xf8] ss:$24 sps:$4 sm:$0xff]   ;;  %v5246_v45 = vld [vmem:[#allocation3 + $0x3cc] ss:$24 sps:$4 sm:$0xff]  }
 0x183   :  { %2214 = vmatmul.mubr.bf16.gmra.mrb[12].mxu0 %v5140_v30  ;;  %v5236_v30 = vld [vmem:[#allocation3 + $0x368] ss:$24 sps:$4 sm:$0xff]  }
 0x184   :  { %2223 = vmatprep.mubr.bf16.mxu0 %v5146_v31  ;;  %2517 = vmatpush1.bf16.msra.mxu0 %v5540_v49  ;;  %v5162_v49 = vld [vmem:[#allocation3 + $0x12c] ss:$24 sps:$4 sm:$0xff]   ;;  %v5240_v31 = vld [vmem:[#allocation3 + $0x39c] ss:$24 sps:$4 sm:$0xff]  }
 0x185   :  { %2518 = vmatprep.subr.bf16.mxu0 %v5542_v50  ;;  %v5255_v50 = vld [vmem:[#allocation3 + $0x404] ss:$24 sps:$4 sm:$0xff]  }
 0x186   :  { %2746 = vmatprep.mubr.bf16.mxu1 %v5255_v50 }
 0x188   :  { %2519 = vmatpush1.bf16.msra.mxu0 %v5546_v51  ;;  %v5257_v51 = vld [vmem:[#allocation3 + $0x400] ss:$24 sps:$4 sm:$0xff]  }
 0x189   :  { %2520 = vmatprep.subr.bf16.mxu0 %v5550_v54  ;;  %2747 = vmatmul.mubr.bf16.gmra.mrb[64].mxu1 %v5257_v51  ;;  %v5164_v54 = vld [vmem:[#allocation3 + $0x128] ss:$24 sps:$4 sm:$0xff]  }
 0x18b   :  { %2224 = vmatmul.mubr.bf16.gmra.mrb[16].mxu0 %v5149_v40 }
 0x18c   :  { %2233 = vmatprep.mubr.bf16.mxu0 %v5155_v41  ;;  %2521 = vmatpush1.bf16.msra.mxu0 %v5552_v55  ;;  %v5168_v55 = vld [vmem:[#allocation3 + $0x15c] ss:$24 sps:$4 sm:$0xff]  }
 0x18d   :  { %2522 = vmatprep.subr.bf16.mxu0 %v5554_v56  ;;  %v5261_v56 = vld [vmem:[#allocation3 + $0x434] ss:$24 sps:$4 sm:$0xff]  }
 0x18e   :  { %2756 = vmatprep.mubr.bf16.mxu1 %v5261_v56 }
 0x190   :  { %2523 = vmatpush1.bf16.msra.mxu0 %v5558_v57  ;;  %v5263_v57 = vld [vmem:[#allocation3 + $0x430] ss:$24 sps:$4 sm:$0xff]  }
 0x191   :  { %2524 = vmatprep.subr.bf16.mxu0 %v5562_v60  ;;  %2757 = vmatmul.mubr.bf16.gmra.mrb[68].mxu1 %v5263_v57  ;;  %v5170_v60 = vld [vmem:[#allocation3 + $0x158] ss:$24 sps:$4 sm:$0xff]  }
 0x193   :  { %2234 = vmatmul.mubr.bf16.gmra.mrb[20].mxu0 %v5158_v48 }
 0x194   :  { %2243 = vmatprep.mubr.bf16.mxu0 %v5162_v49  ;;  %2525 = vmatpush1.bf16.msra.mxu0 %v5564_v61  ;;  %v5174_v61 = vld [vmem:[#allocation3 + $0x18c] ss:$24 sps:$4 sm:$0xff]  }
 0x195   :  { %2526 = vmatprep.subr.bf16.mxu0 %v5566_v62  ;;  %v5267_v62 = vld [vmem:[#allocation3 + $0x464] ss:$24 sps:$4 sm:$0xff]  }
 0x196   :  { %2766 = vmatprep.mubr.bf16.mxu1 %v5267_v62  ;;  %v5254_v62 = vld [vmem:[#allocation3 + $0x3f8] ss:$24 sps:$4 sm:$0xff]  }
 0x198   :  { %2527 = vmatpush1.bf16.msra.mxu0 %v5570_v63  ;;  %v5269_v63 = vld [vmem:[#allocation3 + $0x460] ss:$24 sps:$4 sm:$0xff]  }
 0x199   :  { %2528 = vmatprep.subr.bf16.mxu0 %v5574_v2  ;;  %2767 = vmatmul.mubr.bf16.gmra.mrb[72].mxu1 %v5269_v63  ;;  %v5176_v2 = vld [vmem:[#allocation3 + $0x188] ss:$24 sps:$4 sm:$0xff]   ;;  %v5258_v63 = vld [vmem:[#allocation3 + $0x42c] ss:$24 sps:$4 sm:$0xff]  }
 0x19b   :  { %2244 = vmatmul.mubr.bf16.gmra.mrb[24].mxu0 %v5164_v54  ;;  %v5248_v54 = vld [vmem:[#allocation3 + $0x3c8] ss:$24 sps:$4 sm:$0xff]  }
 0x19c   :  { %2253 = vmatprep.mubr.bf16.mxu0 %v5168_v55  ;;  %2529 = vmatpush1.bf16.msra.mxu0 %v5576_v3  ;;  %v5180_v3 = vld [vmem:[#allocation3 + $0x1bc] ss:$24 sps:$4 sm:$0xff]  }
 0x19d   :  { %2530 = vmatprep.subr.bf16.mxu0 %v5578_v4  ;;  %v5273_v4 = vld [vmem:[#allocation3 + $0x494] ss:$24 sps:$4 sm:$0xff]  }
 0x19e   :  { %2776 = vmatprep.mubr.bf16.mxu1 %v5273_v4  ;;  %v5252_v55 = vld [vmem:[#allocation3 + $0x3fc] ss:$24 sps:$4 sm:$0xff]  }
 0x1a0   :  { %2531 = vmatpush1.bf16.msra.mxu0 %v5582_v5  ;;  %v5182_v5 = vld [vmem:[#allocation3 + $0x1b8] ss:$24 sps:$4 sm:$0xff]  }
 0x1a1   :  { %2532 = vmatprep.subr.bf16.mxu0 %v5586_v8  ;;  %2777 = vmatmul.mubr.bf16.gmra.mrb[76].mxu1 %v5275_v39  ;;  %v5186_v8 = vld [vmem:[#allocation3 + $0x1ec] ss:$24 sps:$4 sm:$0xff]  }
 0x1a2   :  { %2786 = vmatprep.mubr.bf16.mxu1 %v5279_v42 }
 0x1a3   :  { %2254 = vmatmul.mubr.bf16.gmra.mrb[28].mxu0 %v5170_v60  ;;  %v5629_v28 = vpop.f32.mrb[0].mxu1 }
 0x1a4   :  { %2263 = vmatprep.mubr.bf16.mxu0 %v5174_v61  ;;  %2533 = vmatpush1.bf16.msra.mxu0 %v5588_v9  ;;  %v5188_v9 = vld [vmem:[#allocation3 + $0x1e8] ss:$24 sps:$4 sm:$0xff]   ;;  %v5631_v29 = vpop.f32.mrb[1].mxu1 }
 0x1a5   :  { %2534 = vmatprep.subr.bf16.mxu0 %v5590_v10  ;;  %v5192_v10 = vld [vmem:[#allocation3 + $0x21c] ss:$24 sps:$4 sm:$0xff]   ;;  %v5633_v32 = vpop.f32.mrb[2].mxu1 }
 0x1a6   :  { %v5635_v33 = vpop.f32.mrb[3].mxu1 }
 0x1a8   :  { %2535 = vmatpush1.bf16.msra.mxu0 %v5594_v11  ;;  %v5194_v11 = vld [vmem:[#allocation3 + $0x218] ss:$24 sps:$4 sm:$0xff]  }
 0x1a9   :  { %2787 = vmatmul.mubr.bf16.gmra.mrb[80].mxu1 %v5281_v43 }
 0x1aa   :  { %2796 = vmatprep.mubr.bf16.mxu1 %v5285_v46  ;;  %v5266_v46 = vld [vmem:[#allocation3 + $0x458] ss:$24 sps:$4 sm:$0xff]  }
 0x1ab   :  { %2264 = vmatmul.mubr.bf16.gmra.mrb[32].mxu0 %v5176_v2  ;;  %v5637_v21 = vpop.f32.mrb[4].mxu1 }
 0x1ac   :  { %2273 = vmatprep.mubr.bf16.mxu0 %v5180_v3  ;;  %v5639_v38 = vpop.f32.mrb[5].mxu1 }
 0x1ad   :  { %v5641_v24 = vpop.f32.mrb[6].mxu1 }
 0x1ae   :  { %v5643_v25 = vpop.f32.mrb[7].mxu1 }
 0x1b1   :  { %2797 = vmatmul.mubr.bf16.gmra.mrb[84].mxu1 %v5287_v47  ;;  %v5270_v47 = vld [vmem:[#allocation3 + $0x48c] ss:$24 sps:$4 sm:$0xff]  }
 0x1b2   :  { %2806 = vmatprep.mubr.bf16.mxu1 %v5291_v53 }
 0x1b3   :  { %2274 = vmatmul.mubr.bf16.gmra.mrb[36].mxu0 %v5182_v5  ;;  %v5645_v34 = vpop.f32.mrb[8].mxu1  ;;  %v5260_v5 = vld [vmem:[#allocation3 + $0x428] ss:$24 sps:$4 sm:$0xff]  }
 0x1b4   :  { %2283 = vmatprep.mubr.bf16.mxu0 %v5186_v8  ;;  %v5647_v35 = vpop.f32.mrb[9].mxu1  ;;  %v5264_v8 = vld [vmem:[#allocation3 + $0x45c] ss:$24 sps:$4 sm:$0xff]  }
 0x1b5   :  { %v5649_v40 = vpop.f32.mrb[10].mxu1 }
 0x1b6   :  { %v5651_v41 = vpop.f32.mrb[11].mxu1 }
 0x1b9   :  { %2807 = vmatmul.mubr.bf16.gmra.mrb[88].mxu1 %v5293_v58 }
 0x1ba   :  { %2816 = vmatprep.mubr.bf16.mxu1 %v5297_v1 }
 0x1bb   :  { %2284 = vmatmul.mubr.bf16.gmra.mrb[40].mxu0 %v5188_v9  ;;  %v5653_v48 = vpop.f32.mrb[12].mxu1 }
 0x1bc   :  { %2293 = vmatprep.mubr.bf16.mxu0 %v5192_v10  ;;  %v5655_v49 = vpop.f32.mrb[13].mxu1 }
 0x1bd   :  { %v5657_v50 = vpop.f32.mrb[14].mxu1 }
 0x1be   :  { %v5659_v51 = vpop.f32.mrb[15].mxu1 }
 0x1c1   :  { %2817 = vmatmul.mubr.bf16.gmra.mrb[92].mxu1 %v5299_v6 }
 0x1c2   :  { %2826 = vmatprep.mubr.bf16.mxu1 %v5303_v13  ;;  %v5278_v13 = vld [vmem:[#allocation3 + $0x4b8] ss:$24 sps:$4 sm:$0xff]  }
 0x1c3   :  { %2294 = vmatmul.mubr.bf16.gmra.mrb[44].mxu0 %v5194_v11  ;;  %v5661_v56 = vpop.f32.mrb[16].mxu1 }
 0x1c4   :  { %2303 = vmatprep.mubr.bf16.mxu0 %v5198_v52  ;;  %v5663_v57 = vpop.f32.mrb[17].mxu1 }
 0x1c5   :  { %v5665_v60 = vpop.f32.mrb[18].mxu1 }
 0x1c6   :  { %v5667_v61 = vpop.f32.mrb[19].mxu1 }
 0x1c9   :  { %2827 = vmatmul.mubr.bf16.gmra.mrb[96].mxu1 %v5305_v14  ;;  %v5282_v14 = vld [vmem:[#allocation3 + $0x4ec] ss:$24 sps:$4 sm:$0xff]  }
 0x1ca   :  { %2836 = vmatprep.mubr.bf16.mxu1 %v5309_v17 }
 0x1cb   :  { %2304 = vmatmul.mubr.bf16.gmra.mrb[48].mxu0 %v5200_v59  ;;  %v5669_v2 = vpop.f32.mrb[20].mxu1  ;;  %v5272_v59 = vld [vmem:[#allocation3 + $0x488] ss:$24 sps:$4 sm:$0xff]  }
 0x1cc   :  { %2313 = vmatprep.mubr.bf16.mxu0 %v5204_v0  ;;  %v5671_v3 = vpop.f32.mrb[21].mxu1  ;;  %v5276_v0 = vld [vmem:[#allocation3 + $0x4bc] ss:$24 sps:$4 sm:$0xff]  }
 0x1cd   :  { %v5673_v4 = vpop.f32.mrb[22].mxu1 }
 0x1ce   :  { %v5675_v39 = vpop.f32.mrb[23].mxu1 }
 0x1d1   :  { %2837 = vmatmul.mubr.bf16.gmra.mrb[100].mxu1 %v5311_v18 }
 0x1d2   :  { %2846 = vmatprep.mubr.bf16.mxu1 %v5315_v22 }
 0x1d3   :  { %2314 = vmatmul.mubr.bf16.gmra.mrb[52].mxu0 %v5206_v7  ;;  %v5677_v42 = vpop.f32.mrb[24].mxu1 }
 0x1d4   :  { %2323 = vmatprep.mubr.bf16.mxu0 %v5210_v12  ;;  %v5679_v43 = vpop.f32.mrb[25].mxu1 }
 0x1d5   :  { %v5681_v9 = vpop.f32.mrb[26].mxu1 }
 0x1d6   :  { %v5683_v10 = vpop.f32.mrb[27].mxu1 }
 0x1d9   :  { %2847 = vmatmul.mubr.bf16.gmra.mrb[104].mxu1 %v5317_v23 }
 0x1db   :  { %2324 = vmatmul.mubr.bf16.gmra.mrb[56].mxu0 %v5212_v15 }
 0x1dc   :  { %2333 = vmatprep.mubr.bf16.mxu0 %v5216_v16 }
 0x1df   :  { %v5685_v11 = vpop.f32.mrb[28].mxu1 }
 0x1e0   :  { %v5687_v52 = vpop.f32.mrb[29].mxu1 }
 0x1e1   :  { %v5689_v53 = vpop.f32.mrb[30].mxu1 }
 0x1e2   :  { %v5691_v58 = vpop.f32.mrb[31].mxu1 }
 0x1e3   :  { %2334 = vmatmul.mubr.bf16.gmra.mrb[60].mxu0 %v5218_v19  ;;  %v5284_v19 = vld [vmem:[#allocation3 + $0x4e8] ss:$24 sps:$4 sm:$0xff]  }
 0x1e4   :  { %2343 = vmatprep.mubr.bf16.mxu0 %v5222_v20  ;;  %v5288_v20 = vld [vmem:[#allocation3 + $0x51c] ss:$24 sps:$4 sm:$0xff]  }
 0x1e9   :  { %v5693_v1 = vpop.f32.mrb[32].mxu1 }
 0x1ea   :  { %v5695_v6 = vpop.f32.mrb[33].mxu1 }
 0x1eb   :  { %2344 = vmatmul.mubr.bf16.gmra.mrb[64].mxu0 %v5224_v26  ;;  %v5697_v7 = vpop.f32.mrb[34].mxu1 }
 0x1ec   :  { %2353 = vmatprep.mubr.bf16.mxu0 %v5228_v27  ;;  %v5699_v12 = vpop.f32.mrb[35].mxu1 }
 0x1f1   :  { %v5701_v15 = vpop.f32.mrb[36].mxu1 }
 0x1f2   :  { %v5703_v16 = vpop.f32.mrb[37].mxu1 }
 0x1f3   :  { %2354 = vmatmul.mubr.bf16.gmra.mrb[68].mxu0 %v5230_v36  ;;  %v5705_v17 = vpop.f32.mrb[38].mxu1  ;;  %v5290_v36 = vld [vmem:[#allocation3 + $0x518] ss:$24 sps:$4 sm:$0xff]  }
 0x1f4   :  { %2363 = vmatprep.mubr.bf16.mxu0 %v5234_v37  ;;  %v5707_v18 = vpop.f32.mrb[39].mxu1  ;;  %v5294_v37 = vld [vmem:[#allocation3 + $0x54c] ss:$24 sps:$4 sm:$0xff]  }
 0x1f9   :  { %v5709_v22 = vpop.f32.mrb[40].mxu1 }
 0x1fa   :  { %v5711_v23 = vpop.f32.mrb[41].mxu1 }
 0x1fb   :  { %2364 = vmatmul.mubr.bf16.gmra.mrb[72].mxu0 %v5236_v30  ;;  %v5713_v26 = vpop.f32.mrb[42].mxu1 }
 0x1fc   :  { %2373 = vmatprep.mubr.bf16.mxu0 %v5240_v31  ;;  %v5715_v27 = vpop.f32.mrb[43].mxu1 }
 0x201   :  { %v5717_v30 = vpop.f32.mrb[44].mxu1 }
 0x202   :  { %v5719_v31 = vpop.f32.mrb[45].mxu1 }
 0x203   :  { %2374 = vmatmul.mubr.bf16.gmra.mrb[76].mxu0 %v5242_v44  ;;  %6552 = vst [vmem:[#allocation12_spill] sm:$0xff] %v5719_v31  ;;  %v5721_v44 = vpop.f32.mrb[46].mxu1 }
 0x204   :  { %2383 = vmatprep.mubr.bf16.mxu0 %v5246_v45  ;;  %6553 = vst [vmem:[#allocation13_spill] sm:$0xff] %v5721_v44  ;;  %v5723_v45 = vpop.f32.mrb[47].mxu1 }
 0x205   :  { %6554 = vst [vmem:[#allocation14_spill] sm:$0xff] %v5723_v45 }
 0x20b   :  { %2384 = vmatmul.mubr.bf16.gmra.mrb[80].mxu0 %v5248_v54  ;;  %v5296_v54 = vld [vmem:[#allocation3 + $0x548] ss:$24 sps:$4 sm:$0xff]  }
 0x20c   :  { %2393 = vmatprep.mubr.bf16.mxu0 %v5252_v55  ;;  %v5300_v55 = vld [vmem:[#allocation3 + $0x57c] ss:$24 sps:$4 sm:$0xff]  }
 0x213   :  { %2394 = vmatmul.mubr.bf16.gmra.mrb[84].mxu0 %v5254_v62  ;;  %v5725_v62 = vpop.f32.mrb[48].mxu1 }
 0x214   :  { %2403 = vmatprep.mubr.bf16.mxu0 %v5258_v63  ;;  %6555 = vst [vmem:[#allocation15_spill] sm:$0xff] %v5725_v62  ;;  %v5727_v63 = vpop.f32.mrb[49].mxu1  ;;  %v5318_v62 = vld [vmem:[#allocation3 + $0x10] ss:$24 sps:$4 sm:$0xff]  }
 0x215   :  { %6556 = vst [vmem:[#allocation16_spill] sm:$0xff] %v5727_v63 }
 0x21b   :  { %2404 = vmatmul.mubr.bf16.gmra.mrb[88].mxu0 %v5260_v5  ;;  %v5729_v5 = vpop.f32.mrb[50].mxu1 }
 0x21c   :  { %2413 = vmatprep.mubr.bf16.mxu0 %v5264_v8  ;;  %6557 = vst [vmem:[#allocation17_spill] sm:$0xff] %v5729_v5  ;;  %v5731_v8 = vpop.f32.mrb[51].mxu1 }
 0x21d   :  { %6558 = vst [vmem:[#allocation18_spill] sm:$0xff] %v5731_v8 }
 0x223   :  { %2414 = vmatmul.mubr.bf16.gmra.mrb[92].mxu0 %v5266_v46  ;;  %v5302_v46 = vld [vmem:[#allocation3 + $0x578] ss:$24 sps:$4 sm:$0xff]  }
 0x224   :  { %2423 = vmatprep.mubr.bf16.mxu0 %v5270_v47  ;;  %v5306_v47 = vld [vmem:[#allocation3 + $0x5ac] ss:$24 sps:$4 sm:$0xff]  }
 0x22b   :  { %2424 = vmatmul.mubr.bf16.gmra.mrb[96].mxu0 %v5272_v59 }
 0x22c   :  { %2433 = vmatprep.mubr.bf16.mxu0 %v5276_v0 }
 0x233   :  { %2434 = vmatmul.mubr.bf16.gmra.mrb[100].mxu0 %v5278_v13 }
 0x234   :  { %2443 = vmatprep.mubr.bf16.mxu0 %v5282_v14 }
 0x23b   :  { %2444 = vmatmul.mubr.bf16.gmra.mrb[104].mxu0 %v5284_v19  ;;  %v5308_v19 = vld [vmem:[#allocation3 + $0x5a8] ss:$24 sps:$4 sm:$0xff]  }
 0x23c   :  { %2453 = vmatprep.mubr.bf16.mxu0 %v5288_v20  ;;  %v6546_v20 = vlaneseq }
 0x243   :  { %2454 = vmatmul.mubr.bf16.gmra.mrb[108].mxu0 %v5290_v36  ;;  %v5312_v36 = vld [vmem:[#allocation3 + $0x5dc] ss:$24 sps:$4 sm:$0xff]  }
 0x244   :  { %2463 = vmatprep.mubr.bf16.mxu0 %v5294_v37  ;;  %v5733_v59 = vpop.f32.mrb[52].mxu1 }
 0x245   :  { %6559 = vst [vmem:[#allocation19_spill] sm:$0xff] %v5733_v59  ;;  %v5735_v0 = vpop.f32.mrb[53].mxu1 }
 0x246   :  { %6560 = vst [vmem:[#allocation20_spill] sm:$0xff] %v5735_v0  ;;  %v5737_v13 = vpop.f32.mrb[54].mxu1  ;;  %v5320_v0 = vld [vmem:[#allocation3 + $0x14] ss:$24 sps:$4 sm:$0xff]  }
 0x247   :  { %6561 = vst [vmem:[#allocation21_spill] sm:$0xff] %v5737_v13  ;;  %v5739_v14 = vpop.f32.mrb[55].mxu1  ;;  %v5314_v13 = vld [vmem:[#allocation3 + $0x5d8] ss:$24 sps:$4 sm:$0xff]  }
 0x248   :  { %6562 = vst [vmem:[#allocation22_spill] sm:$0xff] %v5739_v14  ;;  %v346_v14 = vld [vmem:[%s6540_s2] sm:$0x3] }
 0x24b   :  { %2464 = vmatmul.mubr.bf16.gmra.mrb[112].mxu0 %v5296_v54 }
 0x24c   :  { %2473 = vmatprep.mubr.bf16.mxu0 %v5300_v55  ;;  %v5741_v37 = vpop.f32.mrb[56].mxu1  ;;  %v5746_v55 = vshrl.u32 %v6546_v20, 7 }
 0x24d   :  { %6563 = vst [vmem:[#allocation23_spill] sm:$0xff] %v5741_v37  ;;  %v5743_v54 = vpop.f32.mrb[57].mxu1 }
 0x24e   :  { %6564 = vst [vmem:[#allocation24_spill] sm:$0xff] %v5743_v54  ;;  %6565 = vst [vmem:[#allocation25_spill] sm:$0xff] %v5746_v55  ;;  %v5748_v59 = vpop.f32.mrb[58].mxu1  ;;  %v354_v37 = vsub.s32 1, %v5746_v55 }
 0x24f   :  { %6566 = vst [vmem:[#allocation26_spill] sm:$0xff] %v5748_v59 }
 0x253   :  { %2474 = vmatmul.mubr.bf16.gmra.mrb[116].mxu0 %v5302_v46  ;;  %v5750_v46 = vpop.f32.mrb[59].mxu1 }
 0x254   :  { %2483 = vmatprep.mubr.bf16.mxu0 %v5306_v47  ;;  %6567 = vst [vmem:[#allocation27_spill] sm:$0xff] %v5750_v46  ;;  %v6549_v47 = vsub.s32 0, %v5746_v55  ;;  %v5757_v54 = vpop.f32.mrb[60].mxu1  ;;  %v5767_v46 = vrot.slane %v346_v14, %v354_v37 }
 0x255   :  { %6568 = vst [vmem:[#allocation28_spill] sm:$0xff] %v5757_v54 }
 0x25b   :  { %2484 = vmatmul.mubr.bf16.gmra.mrb[120].mxu0 %v5308_v19  ;;  %v5759_v19 = vpop.f32.mrb[61].mxu1 }
 0x25c   :  { %2493 = vmatprep.mubr.bf16.mxu0 %v5312_v36  ;;  %6569 = vst [vmem:[#allocation29_spill] sm:$0xff] %v5759_v19  ;;  %v5763_v36 = vrot.slane %v346_v14, %v6549_v47  ;;  %v5765_v20 = vpop.f32.mrb[62].mxu1 }
 0x25d   :  { %6570 = vst [vmem:[#allocation30_spill] sm:$0xff] %v5765_v20  ;;  %v5769_v59 = vpop.f32.mrb[63].mxu1 }
 0x25e   :  { %6571 = vst [vmem:[#allocation31_spill] sm:$0xff] %v5769_v59  ;;  %v5775_v20 = vpop.f32.mrb[64].mxu1 }
 0x25f   :  { %6572 = vst [vmem:[#allocation32_spill] sm:$0xff] %v5775_v20  ;;  %v5779_v37 = vpop.f32.mrb[65].mxu1 }
 0x260   :  { %6573 = vst [vmem:[#allocation33_spill] sm:$0xff] %v5779_v37  ;;  %v5782_v59 = vpop.f32.mrb[66].mxu1  ;;  %v5323_v37 = vld [vmem:[#allocation3 + $0x40] ss:$24 sps:$4 sm:$0xff]  }
 0x263   :  { %2494 = vmatmul.mubr.bf16.gmra.mrb[124].mxu0 %v5314_v13  ;;  %v5321_v13 = vld [vmem:[#allocation3 + $0x44] ss:$24 sps:$4 sm:$0xff]  }
 0x264   :  { %2536 = vmatprep.mubr.bf16.mxu0 %v5320_v0 }
 0x266   :  { %v2235_v8 = vpop.f32.mrb[20].mxu0 }
 0x267   :  { %v4527_v5 = vadd.f32 %v2235_v8, %v5763_v36  ;;  %v2237_v63 = vpop.f32.mrb[21].mxu0 }
 0x268   :  { %v4529_v54 = vadd.f32 %v2237_v63, %v5767_v46  ;;  %v2239_v19 = vpop.f32.mrb[22].mxu0 }
 0x269   :  { %v4531_v55 = vadd.f32 %v2239_v19, %v5763_v36  ;;  %v4528_v47 = vadd.f32 %v4527_v5, %v5629_v28  ;;  %v2241_v45 = vpop.f32.mrb[23].mxu0  ;;  %v5785_v19 = vpop.f32.mrb[67].mxu1 }
 0x26a   :  { %v4533_v0 = vadd.f32 %v2241_v45, %v5767_v46  ;;  %v4530_v14 = vadd.f32 %v4529_v54, %v5631_v29 }
 0x26b   :  { %v4532_v8 = vadd.f32 %v4531_v55, %v5633_v32  ;;  %2537 = vmatmul.mubr.bf16.vlgmr.msra.gmra.mrb[0].mxu0 %v5318_v62  ;;  %v2877_v28 = vmax.f32 %v4528_v47, 0.0 }
 0x26c   :  { %v4534_v63 = vadd.f32 %v4533_v0, %v5635_v33  ;;  %2546 = vmatprep.mubr.bf16.mxu0 %v5321_v13  ;;  %v2878_v44 = vmax.f32 %v4530_v14, 0.0  ;;  %v5324_v33 = vld [vmem:[#allocation3 + $0x74] ss:$24 sps:$4 sm:$0xff]   ;;  %v5795_v14 = vpop.f32.mrb[68].mxu1 }
 0x26d   :  { %v2879_v5 = vmax.f32 %v4532_v8, 0.0 }
 0x26e   :  { %v2880_v20 = vmax.f32 %v4534_v63, 0.0  ;;  %v2245_v31 = vpop.f32.mrb[24].mxu0 }
 0x26f   :  { %v5787_v45 = vpack.c.bf16 %v2879_v5, %v2877_v28  ;;  %v4535_v29 = vadd.f32 %v2245_v31, %v5763_v36  ;;  %v2247_v54 = vpop.f32.mrb[25].mxu0  ;;  %v5799_v31 = vpop.f32.mrb[69].mxu1  ;;  %v6550_v5 = vmov 0  }
 0x270   :  { %v5790_v32 = vpack.c.bf16 %v2880_v20, %v2878_v44  ;;  %v4537_v62 = vadd.f32 %v2247_v54, %v5767_v46  ;;  %v2249_v55 = vpop.f32.mrb[26].mxu0  ;;  %v5802_v20 = vpop.f32.mrb[70].mxu1  ;;  %3184 = vmatprep.subr.bf16.mxu1 %v6550_v5  ;;  %4900 = vset.pattern.permute.xlu0 %v6550_v5 }
 0x271   :  { %6574 = vst [vmem:[#allocation34_spill] sm:$0xff] %v5787_v45  ;;  %v4539_v13 = vadd.f32 %v2249_v55, %v5763_v36  ;;  %v4536_v47 = vadd.f32 %v4535_v29, %v5637_v21  ;;  %v2251_v0 = vpop.f32.mrb[27].mxu0  ;;  %v5333_v21 = vld [vmem:[%s6541_s3] sm:$0xff]   ;;  %v5809_v29 = vpop.f32.mrb[71].mxu1 }
 0x272   :  { %6575 = vst [vmem:[#allocation35_spill] sm:$0xff] %v5790_v32  ;;  %v4541_v8 = vadd.f32 %v2251_v0, %v5767_v46  ;;  %v4538_v63 = vadd.f32 %v4537_v62, %v5639_v38  ;;  %3185 = vmatpush1.bf16.msra.mxu1 %v5333_v21  ;;  %v5821_v21 = vpop.f32.mrb[72].mxu1  ;;  %v5329_v32 = vld [vmem:[#allocation3 + $0xa0] ss:$24 sps:$4 sm:$0xff]  }
 0x273   :  { %v4540_v44 = vadd.f32 %v4539_v13, %v5641_v24  ;;  %2547 = vmatmul.mubr.bf16.gmra.mrb[4].mxu0 %v5323_v37  ;;  %v2881_v38 = vmax.f32 %v4536_v47, 0.0  ;;  %v5326_v13 = vld [vmem:[#allocation3 + $0x70] ss:$24 sps:$4 sm:$0xff]   ;;  %3186 = vmatprep.subr.bf16.mxu1 %v6550_v5 }
 0x274   :  { %v4542_v28 = vadd.f32 %v4541_v8, %v5643_v25  ;;  %2556 = vmatprep.mubr.bf16.mxu0 %v5324_v33  ;;  %v2882_v24 = vmax.f32 %v4538_v63, 0.0 }
 0x275   :  { %v2883_v54 = vmax.f32 %v4540_v44, 0.0  ;;  %v5327_v44 = vld [vmem:[#allocation3 + $0xa4] ss:$24 sps:$4 sm:$0xff]  }
 0x276   :  { %v2884_v37 = vmax.f32 %v4542_v28, 0.0  ;;  %v2255_v62 = vpop.f32.mrb[28].mxu0 }
 0x277   :  { %v5812_v55 = vpack.c.bf16 %v2883_v54, %v2881_v38  ;;  %v4543_v25 = vadd.f32 %v2255_v62, %v5763_v36  ;;  %v2257_v33 = vpop.f32.mrb[29].mxu0  ;;  %v5825_v62 = vpop.f32.mrb[73].mxu1 }
 0x278   :  { %v5816_v0 = vpack.c.bf16 %v2884_v37, %v2882_v24  ;;  %v4545_v8 = vadd.f32 %v2257_v33, %v5767_v46  ;;  %v2259_v47 = vpop.f32.mrb[30].mxu0  ;;  %v5828_v37 = vpop.f32.mrb[74].mxu1 }
 0x279   :  { %6576 = vst [vmem:[#allocation36_spill] sm:$0xff] %v5812_v55  ;;  %v4547_v45 = vadd.f32 %v2259_v47, %v5763_v36  ;;  %v4544_v63 = vadd.f32 %v4543_v25, %v5645_v34  ;;  %v2261_v28 = vpop.f32.mrb[31].mxu0  ;;  %v5831_v47 = vpop.f32.mrb[75].mxu1 }
 0x27a   :  { %6577 = vst [vmem:[#allocation37_spill] sm:$0xff] %v5816_v0  ;;  %v4549_v38 = vadd.f32 %v2261_v28, %v5767_v46  ;;  %v4546_v54 = vadd.f32 %v4545_v8, %v5647_v35 }
 0x27b   :  { %v4548_v24 = vadd.f32 %v4547_v45, %v5649_v40  ;;  %2557 = vmatmul.mubr.bf16.gmra.mrb[8].mxu0 %v5326_v13  ;;  %v2885_v34 = vmax.f32 %v4544_v63, 0.0 }
 0x27c   :  { %v4550_v33 = vadd.f32 %v4549_v38, %v5651_v41  ;;  %2566 = vmatprep.mubr.bf16.mxu0 %v5327_v44  ;;  %v2886_v5 = vmax.f32 %v4546_v54, 0.0  ;;  %v5330_v41 = vld [vmem:[#allocation3 + $0xd4] ss:$24 sps:$4 sm:$0xff]  }
 0x27d   :  { %v2887_v25 = vmax.f32 %v4548_v24, 0.0  ;;  %v5334_v44 = vld [vmem:[%s6541_s3 + $0x8] sm:$0xff]   ;;  %v5844_v24 = vpop.f32.mrb[76].mxu1 }
 0x27e   :  { %v2888_v55 = vmax.f32 %v4550_v33, 0.0  ;;  %v2265_v0 = vpop.f32.mrb[32].mxu0  ;;  %3187 = vmatpush1.bf16.msra.mxu1 %v5334_v44 }
 0x27f   :  { %v5833_v28 = vpack.c.bf16 %v2887_v25, %v2885_v34  ;;  %v4551_v35 = vadd.f32 %v2265_v0, %v5763_v36  ;;  %v2267_v8 = vpop.f32.mrb[33].mxu0  ;;  %v6581_v25 = vmov 0  }
 0x280   :  { %v5836_v40 = vpack.c.bf16 %v2888_v55, %v2886_v5  ;;  %v4553_v45 = vadd.f32 %v2267_v8, %v5767_v46  ;;  %v2269_v13 = vpop.f32.mrb[34].mxu0  ;;  %v5848_v55 = vpop.f32.mrb[77].mxu1  ;;  %3188 = vmatprep.subr.bf16.mxu1 %v6581_v25 }
 0x281   :  { %6578 = vst [vmem:[#allocation38_spill] sm:$0xff] %v5833_v28  ;;  %v4555_v63 = vadd.f32 %v2269_v13, %v5763_v36  ;;  %v4552_v38 = vadd.f32 %v4551_v35, %v5653_v48  ;;  %v2271_v54 = vpop.f32.mrb[35].mxu0  ;;  %v5851_v34 = vpop.f32.mrb[78].mxu1 }
 0x282   :  { %6579 = vst [vmem:[#allocation39_spill] sm:$0xff] %v5836_v40  ;;  %v4557_v0 = vadd.f32 %v2271_v54, %v5767_v46  ;;  %v4554_v5 = vadd.f32 %v4553_v45, %v5655_v49  ;;  %6580 = vst [vmem:[#allocation40_spill] sm:$0xff] %v5851_v34  ;;  %v5855_v48 = vpop.f32.mrb[79].mxu1 }
 0x283   :  { %v4556_v33 = vadd.f32 %v4555_v63, %v5657_v50  ;;  %2567 = vmatmul.mubr.bf16.gmra.mrb[12].mxu0 %v5329_v32  ;;  %v2889_v35 = vmax.f32 %v4552_v38, 0.0  ;;  %v5332_v32 = vld [vmem:[#allocation3 + $0xd0] ss:$24 sps:$4 sm:$0xff]  }
 0x284   :  { %v4558_v8 = vadd.f32 %v4557_v0, %v5659_v51  ;;  %2576 = vmatprep.mubr.bf16.mxu0 %v5330_v41  ;;  %v2890_v54 = vmax.f32 %v4554_v5, 0.0  ;;  %v5865_v0 = vpop.f32.mrb[80].mxu1 }
 0x285   :  { %v2891_v13 = vmax.f32 %v4556_v33, 0.0 }
 0x286   :  { %v2892_v28 = vmax.f32 %v4558_v8, 0.0  ;;  %v2275_v49 = vpop.f32.mrb[36].mxu0  ;;  %v5869_v8 = vpop.f32.mrb[81].mxu1 }
 0x287   :  { %v5857_v45 = vpack.c.bf16 %v2891_v13, %v2889_v35  ;;  %v4559_v44 = vadd.f32 %v2275_v49, %v5763_v36  ;;  %v2277_v50 = vpop.f32.mrb[37].mxu0 }
 0x288   :  { %v5860_v63 = vpack.c.bf16 %v2892_v28, %v2890_v54  ;;  %v4561_v40 = vadd.f32 %v2277_v50, %v5767_v46  ;;  %v2279_v34 = vpop.f32.mrb[38].mxu0  ;;  %v5872_v28 = vpop.f32.mrb[82].mxu1 }
 0x289   :  { %6582 = vst [vmem:[#allocation41_spill] sm:$0xff] %v5857_v45  ;;  %v4563_v51 = vadd.f32 %v2279_v34, %v5763_v36  ;;  %v4560_v41 = vadd.f32 %v4559_v44, %v5661_v56  ;;  %v2281_v38 = vpop.f32.mrb[39].mxu0  ;;  %v5875_v54 = vpop.f32.mrb[83].mxu1 }
 0x28a   :  { %6583 = vst [vmem:[#allocation42_spill] sm:$0xff] %v5860_v63  ;;  %v4565_v5 = vadd.f32 %v2281_v38, %v5767_v46  ;;  %v4562_v33 = vadd.f32 %v4561_v40, %v5663_v57 }
 0x28b   :  { %v4564_v35 = vadd.f32 %v4563_v51, %v5665_v60  ;;  %2577 = vmatmul.mubr.bf16.gmra.mrb[16].mxu0 %v5332_v32  ;;  %v2893_v34 = vmax.f32 %v4560_v41, 0.0 }
 0x28c   :  { %v4566_v13 = vadd.f32 %v4565_v5, %v5667_v61  ;;  %v2894_v49 = vmax.f32 %v4562_v33, 0.0  ;;  %v5335_v61 = vld [vmem:[%s6541_s3 + $0x10] sm:$0xff]   ;;  %v5888_v33 = vpop.f32.mrb[84].mxu1 }
 0x28d   :  { %v2895_v56 = vmax.f32 %v4564_v35, 0.0  ;;  %3189 = vmatpush1.bf16.msra.mxu1 %v5335_v61 }
 0x28e   :  { %v2896_v44 = vmax.f32 %v4566_v13, 0.0  ;;  %v2285_v50 = vpop.f32.mrb[40].mxu0  ;;  %3190 = vmatprep.subr.bf16.mxu1 %v6581_v25 }
 0x28f   :  { %v5877_v45 = vpack.c.bf16 %v2895_v56, %v2893_v34  ;;  %v4567_v57 = vadd.f32 %v2285_v50, %v5763_v36  ;;  %v2287_v40 = vpop.f32.mrb[41].mxu0  ;;  %v5892_v34 = vpop.f32.mrb[85].mxu1 }
 0x290   :  { %v5880_v38 = vpack.c.bf16 %v2896_v44, %v2894_v49  ;;  %v4569_v60 = vadd.f32 %v2287_v40, %v5767_v46  ;;  %v2289_v32 = vpop.f32.mrb[42].mxu0  ;;  %v5895_v49 = vpop.f32.mrb[86].mxu1 }
 0x291   :  { %6584 = vst [vmem:[#allocation43_spill] sm:$0xff] %v5877_v45  ;;  %v4571_v51 = vadd.f32 %v2289_v32, %v5763_v36  ;;  %v4568_v41 = vadd.f32 %v4567_v57, %v5669_v2  ;;  %v2291_v5 = vpop.f32.mrb[43].mxu0  ;;  %v5899_v50 = vpop.f32.mrb[87].mxu1  ;;  %v5336_v2 = vld [vmem:[%s6541_s3 + $0x18] sm:$0xff]  }
 0x292   :  { %6585 = vst [vmem:[#allocation44_spill] sm:$0xff] %v5880_v38  ;;  %v4573_v35 = vadd.f32 %v2291_v5, %v5767_v46  ;;  %v4570_v13 = vadd.f32 %v4569_v60, %v5671_v3  ;;  %3191 = vmatpush1.bf16.msra.mxu1 %v5336_v2  ;;  %v5916_v2 = vpop.f32.mrb[88].mxu1 }
 0x293   :  { %v4572_v56 = vadd.f32 %v4571_v51, %v5673_v4  ;;  %v2897_v57 = vmax.f32 %v4568_v41, 0.0  ;;  %3192 = vmatprep.subr.bf16.mxu1 %v6581_v25  ;;  %v5337_v41 = vld [vmem:[%s6541_s3 + $0x20] sm:$0xff]  }
 0x294   :  { %v4574_v44 = vadd.f32 %v4573_v35, %v5675_v39  ;;  %v2898_v3 = vmax.f32 %v4570_v13, 0.0 }
 0x295   :  { %v2899_v40 = vmax.f32 %v4572_v56, 0.0 }
 0x296   :  { %v2900_v60 = vmax.f32 %v4574_v44, 0.0  ;;  %v2295_v32 = vpop.f32.mrb[44].mxu0  ;;  %3193 = vmatpush1.bf16.msra.mxu1 %v5337_v41 }
 0x297   :  { %v5904_v61 = vpack.c.bf16 %v2899_v40, %v2897_v57  ;;  %v4575_v4 = vadd.f32 %v2295_v32, %v5763_v36  ;;  %v2297_v51 = vpop.f32.mrb[45].mxu0  ;;  %3194 = vmatprep.subr.bf16.mxu1 %v6581_v25 }
 0x298   :  { %v5908_v39 = vpack.c.bf16 %v2900_v60, %v2898_v3  ;;  %v4577_v5 = vadd.f32 %v2297_v51, %v5767_v46  ;;  %v2299_v35 = vpop.f32.mrb[46].mxu0  ;;  %v5920_v3 = vpop.f32.mrb[89].mxu1 }
 0x299   :  { %6586 = vst [vmem:[#allocation45_spill] sm:$0xff] %v5904_v61  ;;  %v4579_v13 = vadd.f32 %v2299_v35, %v5763_v36  ;;  %v4576_v56 = vadd.f32 %v4575_v4, %v5677_v42  ;;  %v2301_v44 = vpop.f32.mrb[47].mxu0  ;;  %v5923_v32 = vpop.f32.mrb[90].mxu1  ;;  %v5338_v42 = vld [vmem:[%s6541_s3 + $0x28] sm:$0xff]  }
 0x29a   :  { %6587 = vst [vmem:[#allocation46_spill] sm:$0xff] %v5908_v39  ;;  %v4581_v57 = vadd.f32 %v2301_v44, %v5767_v46  ;;  %v4578_v40 = vadd.f32 %v4577_v5, %v5679_v43  ;;  %v5927_v35 = vpop.f32.mrb[91].mxu1  ;;  %3195 = vmatpush1.bf16.msra.mxu1 %v5338_v42 }
 0x29b   :  { %v4580_v60 = vadd.f32 %v4579_v13, %v5681_v9  ;;  %v2901_v4 = vmax.f32 %v4576_v56, 0.0  ;;  %3196 = vmatprep.subr.bf16.mxu1 %v6581_v25  ;;  %v5339_v56 = vld [vmem:[%s6541_s3 + $0x30] sm:$0xff]   ;;  %v5944_v42 = vpop.f32.mrb[92].mxu1 }
 0x29c   :  { %v4582_v51 = vadd.f32 %v4581_v57, %v5683_v10  ;;  %v2902_v43 = vmax.f32 %v4578_v40, 0.0 }
 0x29d   :  { %v2903_v44 = vmax.f32 %v4580_v60, 0.0 }
 0x29e   :  { %v2904_v5 = vmax.f32 %v4582_v51, 0.0  ;;  %v2305_v61 = vpop.f32.mrb[48].mxu0  ;;  %3197 = vmatpush1.bf16.msra.mxu1 %v5339_v56 }
 0x29f   :  { %v5932_v41 = vpack.c.bf16 %v2903_v44, %v2901_v4  ;;  %v4583_v9 = vadd.f32 %v2305_v61, %v5763_v36  ;;  %v2307_v13 = vpop.f32.mrb[49].mxu0  ;;  %v5948_v44 = vpop.f32.mrb[93].mxu1  ;;  %3198 = vmatprep.subr.bf16.mxu1 %v6581_v25 }
 0x2a0   :  { %v5936_v10 = vpack.c.bf16 %v2904_v5, %v2902_v43  ;;  %v4585_v57 = vadd.f32 %v2307_v13, %v5767_v46  ;;  %v2309_v39 = vpop.f32.mrb[50].mxu0  ;;  %v5951_v5 = vpop.f32.mrb[94].mxu1 }
 0x2a1   :  { %6588 = vst [vmem:[#allocation47_spill] sm:$0xff] %v5932_v41  ;;  %v4587_v40 = vadd.f32 %v2309_v39, %v5763_v36  ;;  %v4584_v60 = vadd.f32 %v4583_v9, %v5685_v11  ;;  %v2311_v51 = vpop.f32.mrb[51].mxu0  ;;  %v5955_v13 = vpop.f32.mrb[95].mxu1  ;;  %v5340_v11 = vld [vmem:[%s6541_s3 + $0x38] sm:$0xff]  }
 0x2a2   :  { %6589 = vst [vmem:[#allocation48_spill] sm:$0xff] %v5936_v10  ;;  %v4589_v61 = vadd.f32 %v2311_v51, %v5767_v46  ;;  %v4586_v4 = vadd.f32 %v4585_v57, %v5687_v52  ;;  %3199 = vmatpush1.bf16.msra.mxu1 %v5340_v11  ;;  %v5972_v11 = vpop.f32.mrb[96].mxu1 }
 0x2a3   :  { %v4588_v43 = vadd.f32 %v4587_v40, %v5689_v53  ;;  %v2905_v9 = vmax.f32 %v4584_v60, 0.0  ;;  %3200 = vmatprep.subr.bf16.mxu1 %v6581_v25  ;;  %v5341_v60 = vld [vmem:[%s6541_s3 + $0x40] sm:$0xff]  }
 0x2a4   :  { %v4590_v39 = vadd.f32 %v4589_v61, %v5691_v58  ;;  %v2906_v52 = vmax.f32 %v4586_v4, 0.0 }
 0x2a5   :  { %v2907_v51 = vmax.f32 %v4588_v43, 0.0 }
 0x2a6   :  { %v2908_v57 = vmax.f32 %v4590_v39, 0.0  ;;  %v2315_v41 = vpop.f32.mrb[52].mxu0  ;;  %3201 = vmatpush1.bf16.msra.mxu1 %v5341_v60 }
 0x2a7   :  { %v5960_v56 = vpack.c.bf16 %v2907_v51, %v2905_v9  ;;  %v4591_v53 = vadd.f32 %v2315_v41, %v5763_v36  ;;  %v2317_v40 = vpop.f32.mrb[53].mxu0  ;;  %v5976_v51 = vpop.f32.mrb[97].mxu1  ;;  %3202 = vmatprep.subr.bf16.mxu1 %v6581_v25 }
 0x2a8   :  { %v5964_v58 = vpack.c.bf16 %v2908_v57, %v2906_v52  ;;  %v4593_v61 = vadd.f32 %v2317_v40, %v5767_v46  ;;  %v2319_v10 = vpop.f32.mrb[54].mxu0  ;;  %v5979_v57 = vpop.f32.mrb[98].mxu1 }
 0x2a9   :  { %6590 = vst [vmem:[#allocation49_spill] sm:$0xff] %v5960_v56  ;;  %v4595_v4 = vadd.f32 %v2319_v10, %v5763_v36  ;;  %v4592_v43 = vadd.f32 %v4591_v53, %v5693_v1  ;;  %v2321_v39 = vpop.f32.mrb[55].mxu0  ;;  %v5983_v40 = vpop.f32.mrb[99].mxu1  ;;  %v5342_v1 = vld [vmem:[%s6541_s3 + $0x48] sm:$0xff]  }
 0x2aa   :  { %6591 = vst [vmem:[#allocation50_spill] sm:$0xff] %v5964_v58  ;;  %v4597_v41 = vadd.f32 %v2321_v39, %v5767_v46  ;;  %v4594_v9 = vadd.f32 %v4593_v61, %v5695_v6  ;;  %3203 = vmatpush1.bf16.msra.mxu1 %v5342_v1  ;;  %v6000_v1 = vpop.f32.mrb[100].mxu1 }
 0x2ab   :  { %v4596_v52 = vadd.f32 %v4595_v4, %v5697_v7  ;;  %v2909_v53 = vmax.f32 %v4592_v43, 0.0  ;;  %3204 = vmatprep.subr.bf16.mxu1 %v6581_v25  ;;  %v5343_v43 = vld [vmem:[%s6541_s3 + $0x50] sm:$0xff]  }
 0x2ac   :  { %v4598_v10 = vadd.f32 %v4597_v41, %v5699_v12  ;;  %v2910_v6 = vmax.f32 %v4594_v9, 0.0 }
 0x2ad   :  { %v2911_v39 = vmax.f32 %v4596_v52, 0.0 }
 0x2ae   :  { %v2912_v61 = vmax.f32 %v4598_v10, 0.0  ;;  %v2325_v56 = vpop.f32.mrb[56].mxu0  ;;  %3205 = vmatpush1.bf16.msra.mxu1 %v5343_v43 }
 0x2af   :  { %v5988_v60 = vpack.c.bf16 %v2911_v39, %v2909_v53  ;;  %v4599_v7 = vadd.f32 %v2325_v56, %v5763_v36  ;;  %v2327_v4 = vpop.f32.mrb[57].mxu0  ;;  %v6004_v39 = vpop.f32.mrb[101].mxu1  ;;  %3206 = vmatprep.subr.bf16.mxu1 %v6581_v25 }
 0x2b0   :  { %v5992_v12 = vpack.c.bf16 %v2912_v61, %v2910_v6  ;;  %v4601_v41 = vadd.f32 %v2327_v4, %v5767_v46  ;;  %v2329_v58 = vpop.f32.mrb[58].mxu0  ;;  %v6007_v61 = vpop.f32.mrb[102].mxu1 }
 0x2b1   :  { %6592 = vst [vmem:[#allocation51_spill] sm:$0xff] %v5988_v60  ;;  %v4603_v9 = vadd.f32 %v2329_v58, %v5763_v36  ;;  %v4600_v52 = vadd.f32 %v4599_v7, %v5701_v15  ;;  %v2331_v10 = vpop.f32.mrb[59].mxu0  ;;  %v6011_v4 = vpop.f32.mrb[103].mxu1  ;;  %v5344_v15 = vld [vmem:[%s6541_s3 + $0x58] sm:$0xff]  }
 0x2b2   :  { %6593 = vst [vmem:[#allocation52_spill] sm:$0xff] %v5992_v12  ;;  %v4605_v56 = vadd.f32 %v2331_v10, %v5767_v46  ;;  %v4602_v53 = vadd.f32 %v4601_v41, %v5703_v16  ;;  %3207 = vmatpush1.bf16.msra.mxu1 %v5344_v15  ;;  %v6028_v15 = vpop.f32.mrb[104].mxu1 }
 0x2b3   :  { %v4604_v6 = vadd.f32 %v4603_v9, %v5705_v17  ;;  %v2913_v7 = vmax.f32 %v4600_v52, 0.0  ;;  %3208 = vmatprep.subr.bf16.mxu1 %v6581_v25  ;;  %v5345_v52 = vld [vmem:[%s6541_s3 + $0x60] sm:$0xff]  }
 0x2b4   :  { %v4606_v58 = vadd.f32 %v4605_v56, %v5707_v18  ;;  %v2914_v16 = vmax.f32 %v4602_v53, 0.0 }
 0x2b5   :  { %v2915_v10 = vmax.f32 %v4604_v6, 0.0 }
 0x2b6   :  { %v2916_v41 = vmax.f32 %v4606_v58, 0.0  ;;  %v2335_v60 = vpop.f32.mrb[60].mxu0  ;;  %3209 = vmatpush1.bf16.msra.mxu1 %v5345_v52 }
 0x2b7   :  { %v6016_v43 = vpack.c.bf16 %v2915_v10, %v2913_v7  ;;  %v4607_v17 = vadd.f32 %v2335_v60, %v5763_v36  ;;  %v2337_v9 = vpop.f32.mrb[61].mxu0  ;;  %v6032_v10 = vpop.f32.mrb[105].mxu1  ;;  %3210 = vmatprep.subr.bf16.mxu1 %v6581_v25 }
 0x2b8   :  { %v6020_v18 = vpack.c.bf16 %v2916_v41, %v2914_v16  ;;  %v4609_v56 = vadd.f32 %v2337_v9, %v5767_v46  ;;  %v2339_v12 = vpop.f32.mrb[62].mxu0  ;;  %v6035_v41 = vpop.f32.mrb[106].mxu1 }
 0x2b9   :  { %6594 = vst [vmem:[#allocation53_spill] sm:$0xff] %v6016_v43  ;;  %v4611_v53 = vadd.f32 %v2339_v12, %v5763_v36  ;;  %v4608_v6 = vadd.f32 %v4607_v17, %v5709_v22  ;;  %v2341_v58 = vpop.f32.mrb[63].mxu0  ;;  %v6039_v9 = vpop.f32.mrb[107].mxu1  ;;  %v5346_v22 = vld [vmem:[%s6541_s3 + $0x68] sm:$0xff]  }
 0x2ba   :  { %6595 = vst [vmem:[#allocation54_spill] sm:$0xff] %v6020_v18  ;;  %v4613_v60 = vadd.f32 %v2341_v58, %v5767_v46  ;;  %v4610_v7 = vadd.f32 %v4609_v56, %v5711_v23  ;;  %3211 = vmatpush1.bf16.msra.mxu1 %v5346_v22 }
 0x2bb   :  { %v4612_v16 = vadd.f32 %v4611_v53, %v5713_v26  ;;  %v2917_v17 = vmax.f32 %v4608_v6, 0.0  ;;  %3212 = vmatprep.subr.bf16.mxu1 %v6581_v25  ;;  %v5347_v6 = vld [vmem:[%s6541_s3 + $0x70] sm:$0xff]  }
 0x2bc   :  { %v4614_v12 = vadd.f32 %v4613_v60, %v5715_v27  ;;  %v2918_v23 = vmax.f32 %v4610_v7, 0.0 }
 0x2bd   :  { %v2919_v58 = vmax.f32 %v4612_v16, 0.0 }
 0x2be   :  { %v2920_v56 = vmax.f32 %v4614_v12, 0.0  ;;  %v2345_v43 = vpop.f32.mrb[64].mxu0  ;;  %3213 = vmatpush1.bf16.msra.mxu1 %v5347_v6 }
 0x2bf   :  { %v6044_v52 = vpack.c.bf16 %v2919_v58, %v2917_v17  ;;  %v4615_v26 = vadd.f32 %v2345_v43, %v5763_v36  ;;  %v2347_v53 = vpop.f32.mrb[65].mxu0  ;;  %v6598_v43 = vld [vmem:[#allocation12_spill] sm:$0xff]  ;;  %v6599_v58 = vld [vmem:[#allocation13_spill] sm:$0xff]  ;;  %3214 = vmatprep.subr.bf16.mxu1 %v6581_v25 }
 0x2c0   :  { %v6048_v27 = vpack.c.bf16 %v2920_v56, %v2918_v23  ;;  %v4617_v60 = vadd.f32 %v2347_v53, %v5767_v46  ;;  %v2349_v18 = vpop.f32.mrb[66].mxu0  ;;  %v6600_v56 = vld [vmem:[#allocation14_spill] sm:$0xff] }
 0x2c1   :  { %6596 = vst [vmem:[#allocation55_spill] sm:$0xff] %v6044_v52  ;;  %v4619_v7 = vadd.f32 %v2349_v18, %v5763_v36  ;;  %v4616_v16 = vadd.f32 %v4615_v26, %v5717_v30  ;;  %v2351_v12 = vpop.f32.mrb[67].mxu0  ;;  %v5348_v52 = vld [vmem:[%s6541_s3 + $0x78] sm:$0xff]  }
 0x2c2   :  { %6597 = vst [vmem:[#allocation56_spill] sm:$0xff] %v6048_v27  ;;  %v4621_v22 = vadd.f32 %v2351_v12, %v5767_v46  ;;  %v4618_v17 = vadd.f32 %v4617_v60, %v6598_v43  ;;  %3215 = vmatpush1.bf16.msra.mxu1 %v5348_v52  ;;  %v6605_v52 = vld [vmem:[#allocation17_spill] sm:$0xff] }
 0x2c3   :  { %v4620_v23 = vadd.f32 %v4619_v7, %v6599_v58  ;;  %v2921_v27 = vmax.f32 %v4616_v16, 0.0  ;;  %v6603_v58 = vld [vmem:[#allocation15_spill] sm:$0xff] }
 0x2c4   :  { %v4622_v53 = vadd.f32 %v4621_v22, %v6600_v56  ;;  %v2922_v45 = vmax.f32 %v4618_v17, 0.0 }
 0x2c5   :  { %v2923_v18 = vmax.f32 %v4620_v23, 0.0  ;;  %v6604_v23 = vld [vmem:[#allocation16_spill] sm:$0xff] }
 0x2c6   :  { %v2924_v30 = vmax.f32 %v4622_v53, 0.0  ;;  %v2355_v26 = vpop.f32.mrb[68].mxu0 }
 0x2c7   :  { %v6064_v12 = vpack.c.bf16 %v2923_v18, %v2921_v27  ;;  %v4623_v60 = vadd.f32 %v2355_v26, %v5763_v36  ;;  %v2357_v6 = vpop.f32.mrb[69].mxu0  ;;  %v6606_v18 = vld [vmem:[#allocation18_spill] sm:$0xff] }
 0x2c8   :  { %v6067_v7 = vpack.c.bf16 %v2924_v30, %v2922_v45  ;;  %v4625_v25 = vadd.f32 %v2357_v6, %v5767_v46  ;;  %v2359_v22 = vpop.f32.mrb[70].mxu0 }
 0x2c9   :  { %6601 = vst [vmem:[#allocation12_spill] sm:$0xff] %v6064_v12  ;;  %v4627_v43 = vadd.f32 %v2359_v22, %v5763_v36  ;;  %v4624_v56 = vadd.f32 %v4623_v60, %v6603_v58  ;;  %v2361_v16 = vpop.f32.mrb[71].mxu0 }
 0x2ca   :  { %6602 = vst [vmem:[#allocation13_spill] sm:$0xff] %v6067_v7  ;;  %v4629_v17 = vadd.f32 %v2361_v16, %v5767_v46  ;;  %v4626_v53 = vadd.f32 %v4625_v25, %v6604_v23 }
 0x2cb   :  { %v4628_v27 = vadd.f32 %v4627_v43, %v6605_v52  ;;  %v2925_v26 = vmax.f32 %v4624_v56, 0.0  ;;  %v6609_v43 = vld [vmem:[#allocation19_spill] sm:$0xff]  ;;  %v6611_v52 = vld [vmem:[#allocation21_spill] sm:$0xff] }
 0x2cc   :  { %v4630_v12 = vadd.f32 %v4629_v17, %v6606_v18  ;;  %v2926_v45 = vmax.f32 %v4626_v53, 0.0  ;;  %v6610_v53 = vld [vmem:[#allocation20_spill] sm:$0xff] }
 0x2cd   :  { %v2927_v38 = vmax.f32 %v4628_v27, 0.0  ;;  %v6612_v27 = vld [vmem:[#allocation22_spill] sm:$0xff] }
 0x2ce   :  { %v2928_v30 = vmax.f32 %v4630_v12, 0.0  ;;  %v2365_v7 = vpop.f32.mrb[72].mxu0 }
 0x2cf   :  { %v6076_v6 = vpack.c.bf16 %v2927_v38, %v2925_v26  ;;  %v4631_v22 = vadd.f32 %v2365_v7, %v5763_v36  ;;  %v2367_v63 = vpop.f32.mrb[73].mxu0 }
 0x2d0   :  { %v6079_v60 = vpack.c.bf16 %v2928_v30, %v2926_v45  ;;  %v4633_v58 = vadd.f32 %v2367_v63, %v5767_v46  ;;  %v2369_v16 = vpop.f32.mrb[74].mxu0 }
 0x2d1   :  { %6607 = vst [vmem:[#allocation14_spill] sm:$0xff] %v6076_v6  ;;  %v4635_v25 = vadd.f32 %v2369_v16, %v5763_v36  ;;  %v4632_v23 = vadd.f32 %v4631_v22, %v6609_v43  ;;  %v2371_v17 = vpop.f32.mrb[75].mxu0 }
 0x2d2   :  { %6608 = vst [vmem:[#allocation15_spill] sm:$0xff] %v6079_v60  ;;  %v4637_v56 = vadd.f32 %v2371_v17, %v5767_v46  ;;  %v4634_v12 = vadd.f32 %v4633_v58, %v6610_v53 }
 0x2d3   :  { %v4636_v38 = vadd.f32 %v4635_v25, %v6611_v52  ;;  %v2929_v7 = vmax.f32 %v4632_v23, 0.0  ;;  %v6615_v25 = vld [vmem:[#allocation23_spill] sm:$0xff] }
 0x2d4   :  { %v4638_v18 = vadd.f32 %v4637_v56, %v6612_v27  ;;  %v2930_v45 = vmax.f32 %v4634_v12, 0.0  ;;  %v6616_v12 = vld [vmem:[#allocation24_spill] sm:$0xff] }
 0x2d5   :  { %v2931_v26 = vmax.f32 %v4636_v38, 0.0  ;;  %v6617_v38 = vld [vmem:[#allocation26_spill] sm:$0xff] }
 0x2d6   :  { %v2932_v30 = vmax.f32 %v4638_v18, 0.0  ;;  %v2375_v6 = vpop.f32.mrb[76].mxu0  ;;  %v6618_v18 = vld [vmem:[#allocation27_spill] sm:$0xff] }
 0x2d7   :  { %v6088_v63 = vpack.c.bf16 %v2931_v26, %v2929_v7  ;;  %v4639_v16 = vadd.f32 %v2375_v6, %v5763_v36  ;;  %v2377_v60 = vpop.f32.mrb[77].mxu0 }
 0x2d8   :  { %v6091_v22 = vpack.c.bf16 %v2932_v30, %v2930_v45  ;;  %v4641_v43 = vadd.f32 %v2377_v60, %v5767_v46  ;;  %v2379_v17 = vpop.f32.mrb[78].mxu0 }
 0x2d9   :  { %6613 = vst [vmem:[#allocation16_spill] sm:$0xff] %v6088_v63  ;;  %v4643_v58 = vadd.f32 %v2379_v17, %v5763_v36  ;;  %v4640_v53 = vadd.f32 %v4639_v16, %v6615_v25  ;;  %v2381_v56 = vpop.f32.mrb[79].mxu0 }
 0x2da   :  { %6614 = vst [vmem:[#allocation17_spill] sm:$0xff] %v6091_v22  ;;  %v4645_v23 = vadd.f32 %v2381_v56, %v5767_v46  ;;  %v4642_v52 = vadd.f32 %v4641_v43, %v6616_v12 }
 0x2db   :  { %v4644_v27 = vadd.f32 %v4643_v58, %v6617_v38  ;;  %v2933_v6 = vmax.f32 %v4640_v53, 0.0  ;;  %v6621_v58 = vld [vmem:[#allocation28_spill] sm:$0xff] }
 0x2dc   :  { %v4646_v7 = vadd.f32 %v4645_v23, %v6618_v18  ;;  %v2934_v45 = vmax.f32 %v4642_v52, 0.0  ;;  %v6622_v52 = vld [vmem:[#allocation29_spill] sm:$0xff] }
 0x2dd   :  { %v2935_v26 = vmax.f32 %v4644_v27, 0.0  ;;  %v6623_v27 = vld [vmem:[#allocation30_spill] sm:$0xff] }
 0x2de   :  { %v2936_v30 = vmax.f32 %v4646_v7, 0.0  ;;  %v2385_v63 = vpop.f32.mrb[80].mxu0  ;;  %v6624_v7 = vld [vmem:[#allocation31_spill] sm:$0xff] }
 0x2df   :  { %v6100_v60 = vpack.c.bf16 %v2935_v26, %v2933_v6  ;;  %v4647_v17 = vadd.f32 %v2385_v63, %v5763_v36  ;;  %v2387_v22 = vpop.f32.mrb[81].mxu0 }
 0x2e0   :  { %v6103_v16 = vpack.c.bf16 %v2936_v30, %v2934_v45  ;;  %v4649_v25 = vadd.f32 %v2387_v22, %v5767_v46  ;;  %v2389_v56 = vpop.f32.mrb[82].mxu0 }
 0x2e1   :  { %6619 = vst [vmem:[#allocation18_spill] sm:$0xff] %v6100_v60  ;;  %v4651_v43 = vadd.f32 %v2389_v56, %v5763_v36  ;;  %v4648_v12 = vadd.f32 %v4647_v17, %v6621_v58  ;;  %v2391_v23 = vpop.f32.mrb[83].mxu0 }
 0x2e2   :  { %6620 = vst [vmem:[#allocation19_spill] sm:$0xff] %v6103_v16  ;;  %v4653_v53 = vadd.f32 %v2391_v23, %v5767_v46  ;;  %v4650_v38 = vadd.f32 %v4649_v25, %v6622_v52 }
 0x2e3   :  { %v4652_v18 = vadd.f32 %v4651_v43, %v6623_v27  ;;  %v2937_v63 = vmax.f32 %v4648_v12, 0.0  ;;  %v6625_v43 = vld [vmem:[#allocation32_spill] sm:$0xff] }
 0x2e4   :  { %v4654_v6 = vadd.f32 %v4653_v53, %v6624_v7  ;;  %v2938_v45 = vmax.f32 %v4650_v38, 0.0  ;;  %v6626_v38 = vld [vmem:[#allocation33_spill] sm:$0xff] }
 0x2e5   :  { %v2939_v26 = vmax.f32 %v4652_v18, 0.0 }
 0x2e6   :  { %v2940_v30 = vmax.f32 %v4654_v6, 0.0  ;;  %v2395_v60 = vpop.f32.mrb[84].mxu0 }
 0x2e7   :  { %v6112_v22 = vpack.c.bf16 %v2939_v26, %v2937_v63  ;;  %v4655_v56 = vadd.f32 %v2395_v60, %v5763_v36  ;;  %v2397_v16 = vpop.f32.mrb[85].mxu0 }
 0x2e8   :  { %v6115_v17 = vpack.c.bf16 %v2940_v30, %v2938_v45  ;;  %v4657_v58 = vadd.f32 %v2397_v16, %v5767_v46  ;;  %v2399_v23 = vpop.f32.mrb[86].mxu0 }
 0x2e9   :  { %v4659_v25 = vadd.f32 %v2399_v23, %v5763_v36  ;;  %v4656_v52 = vadd.f32 %v4655_v56, %v6625_v43  ;;  %v2401_v53 = vpop.f32.mrb[87].mxu0 }
 0x2ea   :  { %v4661_v12 = vadd.f32 %v2401_v53, %v5767_v46  ;;  %v4658_v27 = vadd.f32 %v4657_v58, %v6626_v38 }
 0x2eb   :  { %v4660_v18 = vadd.f32 %v4659_v25, %v5782_v59  ;;  %v2941_v60 = vmax.f32 %v4656_v52, 0.0 }
 0x2ec   :  { %v4662_v7 = vadd.f32 %v4661_v12, %v5785_v19  ;;  %v2942_v63 = vmax.f32 %v4658_v27, 0.0 }
 0x2ed   :  { %v2943_v6 = vmax.f32 %v4660_v18, 0.0 }
 0x2ee   :  { %v2944_v26 = vmax.f32 %v4662_v7, 0.0  ;;  %v2405_v45 = vpop.f32.mrb[88].mxu0 }
 0x2ef   :  { %v6124_v16 = vpack.c.bf16 %v2943_v6, %v2941_v60  ;;  %v4663_v30 = vadd.f32 %v2405_v45, %v5763_v36  ;;  %v2407_v23 = vpop.f32.mrb[89].mxu0 }
 0x2f0   :  { %v6127_v56 = vpack.c.bf16 %v2944_v26, %v2942_v63  ;;  %v4665_v43 = vadd.f32 %v2407_v23, %v5767_v46  ;;  %v2409_v53 = vpop.f32.mrb[90].mxu0 }
 0x2f1   :  { %v4667_v58 = vadd.f32 %v2409_v53, %v5763_v36  ;;  %v4664_v59 = vadd.f32 %v4663_v30, %v5795_v14  ;;  %v2411_v19 = vpop.f32.mrb[91].mxu0 }
 0x2f2   :  { %v4669_v25 = vadd.f32 %v2411_v19, %v5767_v46  ;;  %v4666_v52 = vadd.f32 %v4665_v43, %v5799_v31 }
 0x2f3   :  { %v4668_v12 = vadd.f32 %v4667_v58, %v5802_v20  ;;  %v2945_v27 = vmax.f32 %v4664_v59, 0.0 }
 0x2f4   :  { %v4670_v38 = vadd.f32 %v4669_v25, %v5809_v29  ;;  %v2946_v7 = vmax.f32 %v4666_v52, 0.0 }
 0x2f5   :  { %v2947_v18 = vmax.f32 %v4668_v12, 0.0 }
 0x2f6   :  { %v2948_v60 = vmax.f32 %v4670_v38, 0.0  ;;  %v2415_v6 = vpop.f32.mrb[92].mxu0 }
 0x2f7   :  { %v6136_v63 = vpack.c.bf16 %v2947_v18, %v2945_v27  ;;  %v4671_v26 = vadd.f32 %v2415_v6, %v5763_v36  ;;  %v2417_v45 = vpop.f32.mrb[93].mxu0 }
 0x2f8   :  { %v6139_v14 = vpack.c.bf16 %v2948_v60, %v2946_v7  ;;  %v4673_v30 = vadd.f32 %v2417_v45, %v5767_v46  ;;  %v2419_v23 = vpop.f32.mrb[94].mxu0 }
 0x2f9   :  { %v4675_v31 = vadd.f32 %v2419_v23, %v5763_v36  ;;  %v4672_v20 = vadd.f32 %v4671_v26, %v5821_v21  ;;  %v2421_v29 = vpop.f32.mrb[95].mxu0 }
 0x2fa   :  { %v4677_v43 = vadd.f32 %v2421_v29, %v5767_v46  ;;  %v4674_v53 = vadd.f32 %v4673_v30, %v5825_v62  ;;  %v6627_v30 = vld [vmem:[#allocation40_spill] sm:$0xff] }
 0x2fb   :  { %v4676_v58 = vadd.f32 %v4675_v31, %v5828_v37  ;;  %v2949_v19 = vmax.f32 %v4672_v20, 0.0 }
 0x2fc   :  { %v4678_v59 = vadd.f32 %v4677_v43, %v5831_v47  ;;  %v2950_v52 = vmax.f32 %v4674_v53, 0.0 }
 0x2fd   :  { %v2951_v25 = vmax.f32 %v4676_v58, 0.0 }
 0x2fe   :  { %v2952_v12 = vmax.f32 %v4678_v59, 0.0  ;;  %v2425_v38 = vpop.f32.mrb[96].mxu0 }
 0x2ff   :  { %v6148_v27 = vpack.c.bf16 %v2951_v25, %v2949_v19  ;;  %v4679_v18 = vadd.f32 %v2425_v38, %v5763_v36  ;;  %v2427_v7 = vpop.f32.mrb[97].mxu0 }
 0x300   :  { %v6151_v21 = vpack.c.bf16 %v2952_v12, %v2950_v52  ;;  %v4681_v60 = vadd.f32 %v2427_v7, %v5767_v46  ;;  %v2429_v6 = vpop.f32.mrb[98].mxu0 }
 0x301   :  { %v4683_v62 = vadd.f32 %v2429_v6, %v5763_v36  ;;  %v4680_v37 = vadd.f32 %v4679_v18, %v5844_v24  ;;  %v2431_v47 = vpop.f32.mrb[99].mxu0 }
 0x302   :  { %v4685_v26 = vadd.f32 %v2431_v47, %v5767_v46  ;;  %v4682_v45 = vadd.f32 %v4681_v60, %v5848_v55 }
 0x303   :  { %v4684_v23 = vadd.f32 %v4683_v62, %v6627_v30  ;;  %v2953_v20 = vmax.f32 %v4680_v37, 0.0 }
 0x304   :  { %v4686_v31 = vadd.f32 %v4685_v26, %v5855_v48  ;;  %v2954_v43 = vmax.f32 %v4682_v45, 0.0 }
 0x305   :  { %v2955_v29 = vmax.f32 %v4684_v23, 0.0 }
 0x306   :  { %v2956_v53 = vmax.f32 %v4686_v31, 0.0  ;;  %v2435_v58 = vpop.f32.mrb[100].mxu0 }
 0x307   :  { %v6160_v59 = vpack.c.bf16 %v2955_v29, %v2953_v20  ;;  %v4687_v19 = vadd.f32 %v2435_v58, %v5763_v36  ;;  %v2437_v25 = vpop.f32.mrb[101].mxu0 }
 0x308   :  { %v6163_v24 = vpack.c.bf16 %v2956_v53, %v2954_v43  ;;  %v4689_v52 = vadd.f32 %v2437_v25, %v5767_v46  ;;  %v2439_v12 = vpop.f32.mrb[102].mxu0 }
 0x309   :  { %v4691_v55 = vadd.f32 %v2439_v12, %v5763_v36  ;;  %v4688_v38 = vadd.f32 %v4687_v19, %v5865_v0  ;;  %v2441_v48 = vpop.f32.mrb[103].mxu0 }
 0x30a   :  { %v4693_v18 = vadd.f32 %v2441_v48, %v5767_v46  ;;  %v4690_v7 = vadd.f32 %v4689_v52, %v5869_v8 }
 0x30b   :  { %v4692_v60 = vadd.f32 %v4691_v55, %v5872_v28  ;;  %v2957_v62 = vmax.f32 %v4688_v38, 0.0 }
 0x30c   :  { %v4694_v6 = vadd.f32 %v4693_v18, %v5875_v54  ;;  %v2958_v47 = vmax.f32 %v4690_v7, 0.0 }
 0x30d   :  { %v2959_v37 = vmax.f32 %v4692_v60, 0.0 }
 0x30e   :  { %v2960_v26 = vmax.f32 %v4694_v6, 0.0  ;;  %v2445_v45 = vpop.f32.mrb[104].mxu0 }
 0x30f   :  { %v6172_v30 = vpack.c.bf16 %v2959_v37, %v2957_v62  ;;  %v4695_v23 = vadd.f32 %v2445_v45, %v5763_v36  ;;  %v2447_v31 = vpop.f32.mrb[105].mxu0 }
 0x310   :  { %v6175_v0 = vpack.c.bf16 %v2960_v26, %v2958_v47  ;;  %v4697_v20 = vadd.f32 %v2447_v31, %v5767_v46  ;;  %v2449_v29 = vpop.f32.mrb[106].mxu0 }
 0x311   :  { %v4699_v8 = vadd.f32 %v2449_v29, %v5763_v36  ;;  %v4696_v28 = vadd.f32 %v4695_v23, %v5888_v33  ;;  %v2451_v54 = vpop.f32.mrb[107].mxu0 }
 0x312   :  { %v4701_v43 = vadd.f32 %v2451_v54, %v5767_v46  ;;  %v4698_v53 = vadd.f32 %v4697_v20, %v5892_v34 }
 0x313   :  { %v4700_v58 = vadd.f32 %v4699_v8, %v5895_v49  ;;  %v2961_v25 = vmax.f32 %v4696_v28, 0.0 }
 0x314   :  { %v4702_v19 = vadd.f32 %v4701_v43, %v5899_v50  ;;  %v2962_v12 = vmax.f32 %v4698_v53, 0.0 }
 0x315   :  { %v2963_v52 = vmax.f32 %v4700_v58, 0.0 }
 0x316   :  { %v2964_v55 = vmax.f32 %v4702_v19, 0.0  ;;  %v2455_v38 = vpop.f32.mrb[108].mxu0 }
 0x317   :  { %v6184_v48 = vpack.c.bf16 %v2963_v52, %v2961_v25  ;;  %v4703_v18 = vadd.f32 %v2455_v38, %v5763_v36  ;;  %v2457_v7 = vpop.f32.mrb[109].mxu0 }
 0x318   :  { %v6187_v33 = vpack.c.bf16 %v2964_v55, %v2962_v12  ;;  %v4705_v60 = vadd.f32 %v2457_v7, %v5767_v46  ;;  %v2459_v6 = vpop.f32.mrb[110].mxu0 }
 0x319   :  { %v4707_v34 = vadd.f32 %v2459_v6, %v5763_v36  ;;  %v4704_v49 = vadd.f32 %v4703_v18, %v5916_v2  ;;  %v2461_v50 = vpop.f32.mrb[111].mxu0 }
 0x31a   :  { %v4709_v62 = vadd.f32 %v2461_v50, %v5767_v46  ;;  %v4706_v37 = vadd.f32 %v4705_v60, %v5920_v3 }
 0x31b   :  { %v4708_v47 = vadd.f32 %v4707_v34, %v5923_v32  ;;  %v2965_v45 = vmax.f32 %v4704_v49, 0.0 }
 0x31c   :  { %v4710_v26 = vadd.f32 %v4709_v62, %v5927_v35  ;;  %v2966_v31 = vmax.f32 %v4706_v37, 0.0 }
 0x31d   :  { %v2967_v23 = vmax.f32 %v4708_v47, 0.0 }
 0x31e   :  { %v2968_v20 = vmax.f32 %v4710_v26, 0.0  ;;  %v2465_v29 = vpop.f32.mrb[112].mxu0 }
 0x31f   :  { %v6196_v8 = vpack.c.bf16 %v2967_v23, %v2965_v45  ;;  %v4711_v28 = vadd.f32 %v2465_v29, %v5763_v36  ;;  %v2467_v54 = vpop.f32.mrb[113].mxu0 }
 0x320   :  { %v6199_v2 = vpack.c.bf16 %v2968_v20, %v2966_v31  ;;  %v4713_v43 = vadd.f32 %v2467_v54, %v5767_v46  ;;  %v2469_v53 = vpop.f32.mrb[114].mxu0 }
 0x321   :  { %v4715_v3 = vadd.f32 %v2469_v53, %v5763_v36  ;;  %v4712_v32 = vadd.f32 %v4711_v28, %v5944_v42  ;;  %v2471_v35 = vpop.f32.mrb[115].mxu0 }
 0x322   :  { %v4717_v58 = vadd.f32 %v2471_v35, %v5767_v46  ;;  %v4714_v19 = vadd.f32 %v4713_v43, %v5948_v44 }
 0x323   :  { %v4716_v25 = vadd.f32 %v4715_v3, %v5951_v5  ;;  %v2969_v12 = vmax.f32 %v4712_v32, 0.0 }
 0x324   :  { %v4718_v52 = vadd.f32 %v4717_v58, %v5955_v13  ;;  %v2970_v38 = vmax.f32 %v4714_v19, 0.0 }
 0x325   :  { %v2971_v55 = vmax.f32 %v4716_v25, 0.0 }
 0x326   :  { %v2972_v18 = vmax.f32 %v4718_v52, 0.0  ;;  %v2475_v7 = vpop.f32.mrb[116].mxu0 }
 0x327   :  { %v6208_v60 = vpack.c.bf16 %v2971_v55, %v2969_v12  ;;  %v4719_v6 = vadd.f32 %v2475_v7, %v5763_v36  ;;  %v2477_v34 = vpop.f32.mrb[117].mxu0 }
 0x328   :  { %v6211_v42 = vpack.c.bf16 %v2972_v18, %v2970_v38  ;;  %v4721_v49 = vadd.f32 %v2477_v34, %v5767_v46  ;;  %v2479_v50 = vpop.f32.mrb[118].mxu0 }
 0x329   :  { %v4723_v44 = vadd.f32 %v2479_v50, %v5763_v36  ;;  %v4720_v5 = vadd.f32 %v4719_v6, %v5972_v11  ;;  %v2481_v13 = vpop.f32.mrb[119].mxu0 }
 0x32a   :  { %v4725_v62 = vadd.f32 %v2481_v13, %v5767_v46  ;;  %v4722_v37 = vadd.f32 %v4721_v49, %v5976_v51 }
 0x32b   :  { %v4724_v47 = vadd.f32 %v4723_v44, %v5979_v57  ;;  %v2973_v45 = vmax.f32 %v4720_v5, 0.0 }
 0x32c   :  { %v4726_v26 = vadd.f32 %v4725_v62, %v5983_v40  ;;  %v2974_v31 = vmax.f32 %v4722_v37, 0.0 }
 0x32d   :  { %v2975_v23 = vmax.f32 %v4724_v47, 0.0 }
 0x32e   :  { %v2976_v20 = vmax.f32 %v4726_v26, 0.0  ;;  %v2485_v29 = vpop.f32.mrb[120].mxu0 }
 0x32f   :  { %v6220_v28 = vpack.c.bf16 %v2975_v23, %v2973_v45  ;;  %v4727_v54 = vadd.f32 %v2485_v29, %v5763_v36  ;;  %v2487_v43 = vpop.f32.mrb[121].mxu0 }
 0x330   :  { %v6223_v11 = vpack.c.bf16 %v2976_v20, %v2974_v31  ;;  %v4729_v53 = vadd.f32 %v2487_v43, %v5767_v46  ;;  %v2489_v3 = vpop.f32.mrb[122].mxu0 }
 0x331   :  { %v4731_v51 = vadd.f32 %v2489_v3, %v5763_v36  ;;  %v4728_v57 = vadd.f32 %v4727_v54, %v6000_v1  ;;  %v2491_v40 = vpop.f32.mrb[123].mxu0 }
 0x332   :  { %v4733_v32 = vadd.f32 %v2491_v40, %v5767_v46  ;;  %v4730_v35 = vadd.f32 %v4729_v53, %v6004_v39 }
 0x333   :  { %v4732_v58 = vadd.f32 %v4731_v51, %v6007_v61  ;;  %v2977_v25 = vmax.f32 %v4728_v57, 0.0 }
 0x334   :  { %v4734_v19 = vadd.f32 %v4733_v32, %v6011_v4  ;;  %v2978_v12 = vmax.f32 %v4730_v35, 0.0 }
 0x335   :  { %v2979_v52 = vmax.f32 %v4732_v58, 0.0 }
 0x336   :  { %v2980_v55 = vmax.f32 %v4734_v19, 0.0  ;;  %v2495_v38 = vpop.f32.mrb[124].mxu0 }
 0x337   :  { %v6232_v18 = vpack.c.bf16 %v2979_v52, %v2977_v25  ;;  %v4735_v7 = vadd.f32 %v2495_v38, %v5763_v36  ;;  %v2497_v6 = vpop.f32.mrb[125].mxu0 }
 0x338   :  { %v6235_v1 = vpack.c.bf16 %v2980_v55, %v2978_v12  ;;  %v4737_v34 = vadd.f32 %v2497_v6, %v5767_v46  ;;  %v2499_v49 = vpop.f32.mrb[126].mxu0 }
 0x339   :  { %v4739_v39 = vadd.f32 %v2499_v49, %v5763_v36  ;;  %v4736_v61 = vadd.f32 %v4735_v7, %v6028_v15  ;;  %v2501_v4 = vpop.f32.mrb[127].mxu0 }
 0x33a   :  { %v4741_v50 = vadd.f32 %v2501_v4, %v5767_v46  ;;  %v4738_v44 = vadd.f32 %v4737_v34, %v6032_v10 }
 0x33b   :  { %v4740_v5 = vadd.f32 %v4739_v39, %v6035_v41  ;;  %v2981_v62 = vmax.f32 %v4736_v61, 0.0 }
 0x33c   :  { %v4742_v13 = vadd.f32 %v4741_v50, %v6039_v9  ;;  %v2982_v47 = vmax.f32 %v4738_v44, 0.0 }
 0x33d   :  { %v2983_v37 = vmax.f32 %v4740_v5, 0.0 }
 0x33e   :  { %v2984_v26 = vmax.f32 %v4742_v13, 0.0  ;;  %v2538_v45 = vpop.f32.mrb[0].mxu0 }
 0x33f   :  { %v6244_v23 = vpack.c.bf16 %v2983_v37, %v2981_v62  ;;  %v4507_v31 = vadd.f32 %v2538_v45, %v5763_v36  ;;  %v2540_v20 = vpop.f32.mrb[1].mxu0 }
 0x340   :  { %v6247_v15 = vpack.c.bf16 %v2984_v26, %v2982_v47  ;;  %v4508_v29 = vadd.f32 %v2540_v20, %v5767_v46  ;;  %v2542_v54 = vpop.f32.mrb[2].mxu0 }
 0x341   :  { %v4509_v10 = vadd.f32 %v2542_v54, %v5763_v36  ;;  %v2544_v41 = vpop.f32.mrb[3].mxu0  ;;  %v2857_v43 = vmax.f32 %v4507_v31, 0.0 }
 0x342   :  { %v4510_v9 = vadd.f32 %v2544_v41, %v5767_v46  ;;  %v2858_v3 = vmax.f32 %v4508_v29, 0.0 }
 0x343   :  { %v2859_v53 = vmax.f32 %v4509_v10, 0.0 }
 0x344   :  { %v2860_v51 = vmax.f32 %v4510_v9, 0.0 }
 0x345   :  { %v2985_v57 = vpack.c.bf16 %v2859_v53, %v2857_v43 }
 0x346   :  { %v2986_v40 = vpack.c.bf16 %v2860_v51, %v2858_v3  ;;  %v2548_v32 = vpop.f32.mrb[4].mxu0 }
 0x347   :  { %v4511_v35 = vadd.f32 %v2548_v32, %v5763_v36  ;;  %v2550_v58 = vpop.f32.mrb[5].mxu0 }
 0x348   :  { %v4512_v19 = vadd.f32 %v2550_v58, %v5767_v46  ;;  %v2552_v25 = vpop.f32.mrb[6].mxu0  ;;  %3216 = vmatprep.mubr.bf16.mxu1 %v2986_v40 }
 0x349   :  { %v4513_v52 = vadd.f32 %v2552_v25, %v5763_v36  ;;  %v2554_v12 = vpop.f32.mrb[7].mxu0  ;;  %3217 = vmatmul.mubr.bf16.vlgmr.msra.gmra.mrb[108].mxu1 %v2985_v57  ;;  %v2861_v38 = vmax.f32 %v4511_v35, 0.0 }
 0x34a   :  { %v4514_v55 = vadd.f32 %v2554_v12, %v5767_v46  ;;  %v2862_v6 = vmax.f32 %v4512_v19, 0.0 }
 0x34b   :  { %v2863_v7 = vmax.f32 %v4513_v52, 0.0 }
 0x34c   :  { %v2864_v34 = vmax.f32 %v4514_v55, 0.0 }
 0x34d   :  { %v2987_v49 = vpack.c.bf16 %v2863_v7, %v2861_v38 }
 0x34e   :  { %v2988_v39 = vpack.c.bf16 %v2864_v34, %v2862_v6  ;;  %v2558_v61 = vpop.f32.mrb[8].mxu0 }
 0x34f   :  { %v4515_v4 = vadd.f32 %v2558_v61, %v5763_v36  ;;  %v2560_v50 = vpop.f32.mrb[9].mxu0 }
 0x350   :  { %v4516_v44 = vadd.f32 %v2560_v50, %v5767_v46  ;;  %v2562_v5 = vpop.f32.mrb[10].mxu0  ;;  %3224 = vmatprep.mubr.bf16.mxu1 %v2988_v39 }
 0x351   :  { %v4517_v13 = vadd.f32 %v2562_v5, %v5763_v36  ;;  %v2564_v62 = vpop.f32.mrb[11].mxu0  ;;  %3225 = vmatmul.mubr.bf16.gmra.mrb[112].mxu1 %v2987_v49  ;;  %v2865_v47 = vmax.f32 %v4515_v4, 0.0  ;;  %v6628_v5 = vld [vmem:[#allocation35_spill] sm:$0xff] }
 0x352   :  { %v4518_v37 = vadd.f32 %v2564_v62, %v5767_v46  ;;  %v2866_v45 = vmax.f32 %v4516_v44, 0.0  ;;  %v6630_v62 = vld [vmem:[#allocation37_spill] sm:$0xff] }
 0x353   :  { %v2867_v26 = vmax.f32 %v4517_v13, 0.0  ;;  %v6629_v13 = vld [vmem:[#allocation34_spill] sm:$0xff] }
 0x354   :  { %v2868_v31 = vmax.f32 %v4518_v37, 0.0  ;;  %v6631_v37 = vld [vmem:[#allocation36_spill] sm:$0xff] }
 0x355   :  { %v2989_v20 = vpack.c.bf16 %v2867_v26, %v2865_v47  ;;  %v6633_v47 = vld [vmem:[#allocation38_spill] sm:$0xff]  ;;  %v6635_v26 = vld [vmem:[#allocation41_spill] sm:$0xff] }
 0x356   :  { %v2990_v29 = vpack.c.bf16 %v2868_v31, %v2866_v45  ;;  %v2568_v54 = vpop.f32.mrb[12].mxu0  ;;  %v6636_v45 = vld [vmem:[#allocation44_spill] sm:$0xff]  ;;  %v6637_v31 = vld [vmem:[#allocation43_spill] sm:$0xff] }
 0x357   :  { %v4519_v10 = vadd.f32 %v2568_v54, %v5763_v36  ;;  %v2570_v41 = vpop.f32.mrb[13].mxu0  ;;  %v6640_v54 = vld [vmem:[#allocation48_spill] sm:$0xff] }
 0x358   :  { %v4520_v9 = vadd.f32 %v2570_v41, %v5767_v46  ;;  %v2572_v43 = vpop.f32.mrb[14].mxu0  ;;  %3232 = vmatprep.mubr.bf16.mxu1 %v2990_v29  ;;  %v6639_v29 = vld [vmem:[#allocation45_spill] sm:$0xff]  ;;  %v6642_v41 = vld [vmem:[#allocation50_spill] sm:$0xff] }
 0x359   :  { %v4521_v53 = vadd.f32 %v2572_v43, %v5763_v36  ;;  %v2574_v3 = vpop.f32.mrb[15].mxu0  ;;  %3233 = vmatmul.mubr.bf16.gmra.mrb[116].mxu1 %v2989_v20  ;;  %v2869_v57 = vmax.f32 %v4519_v10, 0.0  ;;  %v6638_v20 = vld [vmem:[#allocation46_spill] sm:$0xff]  ;;  %v6641_v10 = vld [vmem:[#allocation47_spill] sm:$0xff]  ;;  %v6644_v43 = vld [vmem:[#allocation52_spill] sm:$0xff] }
 0x35a   :  { %v4522_v51 = vadd.f32 %v2574_v3, %v5767_v46  ;;  %v2870_v32 = vmax.f32 %v4520_v9, 0.0  ;;  %v6643_v9 = vld [vmem:[#allocation49_spill] sm:$0xff]  ;;  %v6646_v3 = vld [vmem:[#allocation54_spill] sm:$0xff] }
 0x35b   :  { %v2871_v40 = vmax.f32 %v4521_v53, 0.0  ;;  %v6645_v53 = vld [vmem:[#allocation51_spill] sm:$0xff] }
 0x35c   :  { %v2872_v35 = vmax.f32 %v4522_v51, 0.0  ;;  %v6647_v51 = vld [vmem:[#allocation53_spill] sm:$0xff] }
 0x35d   :  { %v2991_v58 = vpack.c.bf16 %v2871_v40, %v2869_v57  ;;  %v6648_v57 = vld [vmem:[#allocation56_spill] sm:$0xff]  ;;  %v6649_v40 = vld [vmem:[#allocation55_spill] sm:$0xff] }
 0x35e   :  { %v2992_v19 = vpack.c.bf16 %v2872_v35, %v2870_v32  ;;  %v2578_v25 = vpop.f32.mrb[16].mxu0  ;;  %v6650_v32 = vld [vmem:[#allocation13_spill] sm:$0xff]  ;;  %v6651_v35 = vld [vmem:[#allocation12_spill] sm:$0xff] }
 0x35f   :  { %v4523_v52 = vadd.f32 %v2578_v25, %v5763_v36  ;;  %v2580_v12 = vpop.f32.mrb[17].mxu0  ;;  %v6654_v25 = vld [vmem:[#allocation17_spill] sm:$0xff] }
 0x360   :  { %v4524_v55 = vadd.f32 %v2580_v12, %v5767_v46  ;;  %v2582_v38 = vpop.f32.mrb[18].mxu0  ;;  %3240 = vmatprep.mubr.bf16.mxu1 %v2992_v19  ;;  %v6653_v19 = vld [vmem:[#allocation14_spill] sm:$0xff]  ;;  %v6656_v12 = vld [vmem:[#allocation19_spill] sm:$0xff] }
 0x361   :  { %v4525_v7 = vadd.f32 %v2582_v38, %v5763_v36  ;;  %v2584_v6 = vpop.f32.mrb[19].mxu0  ;;  %3241 = vmatmul.mubr.bf16.gmra.mrb[120].mxu1 %v2991_v58  ;;  %v2873_v49 = vmax.f32 %v4523_v52, 0.0  ;;  %v6632_v36 = vld [vmem:[#allocation39_spill] sm:$0xff]  ;;  %v6655_v52 = vld [vmem:[#allocation16_spill] sm:$0xff] }
 0x362   :  { %v4526_v34 = vadd.f32 %v2584_v6, %v5767_v46  ;;  %v2874_v61 = vmax.f32 %v4524_v55, 0.0  ;;  %v6634_v46 = vld [vmem:[#allocation42_spill] sm:$0xff]  ;;  %v6652_v58 = vld [vmem:[#allocation15_spill] sm:$0xff] }
 0x363   :  { %v2875_v39 = vmax.f32 %v4525_v7, 0.0  ;;  %v6657_v55 = vld [vmem:[#allocation18_spill] sm:$0xff] }
 0x364   :  { %v2876_v4 = vmax.f32 %v4526_v34, 0.0 }
 0x365   :  { %v2993_v50 = vpack.c.bf16 %v2875_v39, %v2873_v49 }
 0x366   :  { %v2994_v44 = vpack.c.bf16 %v2876_v4, %v2874_v61 }
 0x368   :  { %3248 = vmatprep.mubr.bf16.mxu1 %v2994_v44 }
 0x369   :  { %3249 = vmatmul.mubr.bf16.gmra.mrb[124].mxu1 %v2993_v50 }
 0x36a   :  { %3256 = vmatprep.mubr.bf16.mxu1 %v6628_v5 }
 0x371   :  { %3257 = vmatmul.mubr.bf16.gmra.mrb[128].mxu1 %v6629_v13 }
 0x372   :  { %3264 = vmatprep.mubr.bf16.mxu1 %v6630_v62 }
 0x379   :  { %3265 = vmatmul.mubr.bf16.gmra.mrb[132].mxu1 %v6631_v37 }
 0x37a   :  { %3272 = vmatprep.mubr.bf16.mxu1 %v6632_v36 }
 0x381   :  { %3273 = vmatmul.mubr.bf16.gmra.mrb[136].mxu1 %v6633_v47 }
 0x382   :  { %3280 = vmatprep.mubr.bf16.mxu1 %v6634_v46 }
 0x389   :  { %3281 = vmatmul.mubr.bf16.gmra.mrb[140].mxu1 %v6635_v26 }
 0x38a   :  { %3288 = vmatprep.mubr.bf16.mxu1 %v6636_v45 }
 0x391   :  { %3289 = vmatmul.mubr.bf16.gmra.mrb[144].mxu1 %v6637_v31 }
 0x392   :  { %3296 = vmatprep.mubr.bf16.mxu1 %v6638_v20 }
 0x399   :  { %3297 = vmatmul.mubr.bf16.gmra.mrb[148].mxu1 %v6639_v29 }
 0x39a   :  { %3304 = vmatprep.mubr.bf16.mxu1 %v6640_v54 }
 0x3a1   :  { %3305 = vmatmul.mubr.bf16.gmra.mrb[152].mxu1 %v6641_v10 }
 0x3a2   :  { %3312 = vmatprep.mubr.bf16.mxu1 %v6642_v41 }
 0x3a9   :  { %3313 = vmatmul.mubr.bf16.gmra.mrb[156].mxu1 %v6643_v9 }
 0x3aa   :  { %3320 = vmatprep.mubr.bf16.mxu1 %v6644_v43 }
 0x3b1   :  { %3321 = vmatmul.mubr.bf16.gmra.mrb[160].mxu1 %v6645_v53 }
 0x3b2   :  { %3328 = vmatprep.mubr.bf16.mxu1 %v6646_v3 }
 0x3b9   :  { %3329 = vmatmul.mubr.bf16.gmra.mrb[164].mxu1 %v6647_v51 }
 0x3ba   :  { %3336 = vmatprep.mubr.bf16.mxu1 %v6648_v57 }
 0x3c1   :  { %3337 = vmatmul.mubr.bf16.gmra.mrb[168].mxu1 %v6649_v40 }
 0x3c2   :  { %3344 = vmatprep.mubr.bf16.mxu1 %v6650_v32 }
 0x3c9   :  { %3345 = vmatmul.mubr.bf16.gmra.mrb[172].mxu1 %v6651_v35 }
 0x3ca   :  { %3352 = vmatprep.mubr.bf16.mxu1 %v6652_v58 }
 0x3d1   :  { %3353 = vmatmul.mubr.bf16.gmra.mrb[176].mxu1 %v6653_v19 }
 0x3d2   :  { %3360 = vmatprep.mubr.bf16.mxu1 %v6654_v25 }
 0x3d9   :  { %3361 = vmatmul.mubr.bf16.gmra.mrb[180].mxu1 %v6655_v52 }
 0x3da   :  { %3368 = vmatprep.mubr.bf16.mxu1 %v6656_v12 }
 0x3e1   :  { %3369 = vmatmul.mubr.bf16.gmra.mrb[184].mxu1 %v6657_v55 }
 0x3e2   :  { %3376 = vmatprep.mubr.bf16.mxu1 %v6115_v17 }
 0x3e9   :  { %3377 = vmatmul.mubr.bf16.gmra.mrb[188].mxu1 %v6112_v22  ;;  %v6316_v22 = vld [vmem:[%s6542_s4] ss:$0 sm:$0xff] }
 0x3ea   :  { %3384 = vmatprep.mubr.bf16.mxu1 %v6127_v56 }
 0x3f1   :  { %3385 = vmatmul.mubr.bf16.gmra.mrb[192].mxu1 %v6124_v16 }
 0x3f2   :  { %3392 = vmatprep.mubr.bf16.mxu1 %v6139_v14 }
 0x3f9   :  { %3393 = vmatmul.mubr.bf16.gmra.mrb[196].mxu1 %v6136_v63 }
 0x3fa   :  { %3400 = vmatprep.mubr.bf16.mxu1 %v6151_v21 }
 0x401   :  { %3401 = vmatmul.mubr.bf16.gmra.mrb[200].mxu1 %v6148_v27 }
 0x402   :  { %3408 = vmatprep.mubr.bf16.mxu1 %v6163_v24 }
 0x409   :  { %3409 = vmatmul.mubr.bf16.gmra.mrb[204].mxu1 %v6160_v59 }
 0x40a   :  { %3416 = vmatprep.mubr.bf16.mxu1 %v6175_v0 }
 0x411   :  { %3417 = vmatmul.mubr.bf16.gmra.mrb[208].mxu1 %v6172_v30 }
 0x412   :  { %3424 = vmatprep.mubr.bf16.mxu1 %v6187_v33 }
 0x419   :  { %3425 = vmatmul.mubr.bf16.gmra.mrb[212].mxu1 %v6184_v48 }
 0x41a   :  { %3432 = vmatprep.mubr.bf16.mxu1 %v6199_v2 }
 0x41c   :  { %v3218_v17 = vpop.f32.mrb[108].mxu1 }
 0x41d   :  { %v3219_v16 = vadd.f32 %v6316_v22, %v3218_v17  ;;  %v3220_v56 = vpop.f32.mrb[109].mxu1 }
 0x41e   :  { %v3221_v63 = vpop.f32.mrb[110].mxu1 }
 0x41f   :  { %v3222_v14 = vadd.f32 %v6316_v22, %v3221_v63  ;;  %v3223_v27 = vpop.f32.mrb[111].mxu1  ;;  %v3473_v21 = vmax.f32 %v3219_v16, 0.0 }
 0x421   :  { %v3474_v59 = vmax.f32 %v3222_v14, 0.0  ;;  %3433 = vmatmul.mubr.bf16.gmra.mrb[216].mxu1 %v6196_v8 }
 0x422   :  { %3440 = vmatprep.mubr.bf16.mxu1 %v6211_v42 }
 0x423   :  { %v6322_v24 = vpack.c.bf16 %v3474_v59, %v3473_v21 }
 0x424   :  { %v3226_v30 = vpop.f32.mrb[112].mxu1 }
 0x425   :  { %v3227_v0 = vadd.f32 %v6316_v22, %v3226_v30  ;;  %v3228_v48 = vpop.f32.mrb[113].mxu1 }
 0x426   :  { %v3229_v33 = vpop.f32.mrb[114].mxu1 }
 0x427   :  { %v3230_v2 = vadd.f32 %v6316_v22, %v3229_v33  ;;  %v3231_v38 = vpop.f32.mrb[115].mxu1  ;;  %v3475_v7 = vmax.f32 %v3227_v0, 0.0 }
 0x429   :  { %v3476_v6 = vmax.f32 %v3230_v2, 0.0  ;;  %3441 = vmatmul.mubr.bf16.gmra.mrb[220].mxu1 %v6208_v60 }
 0x42a   :  { %3448 = vmatprep.mubr.bf16.mxu1 %v6223_v11 }
 0x42b   :  { %v6328_v34 = vpack.c.bf16 %v3476_v6, %v3475_v7 }
 0x42c   :  { %v3234_v8 = vpop.f32.mrb[116].mxu1 }
 0x42d   :  { %v3235_v42 = vadd.f32 %v6316_v22, %v3234_v8  ;;  %v3236_v49 = vpop.f32.mrb[117].mxu1 }
 0x42e   :  { %v3237_v39 = vpop.f32.mrb[118].mxu1 }
 0x42f   :  { %v3238_v61 = vadd.f32 %v6316_v22, %v3237_v39  ;;  %v3239_v4 = vpop.f32.mrb[119].mxu1  ;;  %v3477_v50 = vmax.f32 %v3235_v42, 0.0  ;;  %v6370_v39 = vld [vmem:[%s6543_s5] sm:$0x1]  ;;  %s5437_s5 = smov [#allocation8]  }
 0x430   :  { %s3930_s12 = sshll.u32 %s5437_s5, 4  ;;  %s3931_s12 = int_to_ptr.vmem [resolvable:$true] %s3930_s12 }
 0x431   :  { %v3478_v44 = vmax.f32 %v3238_v61, 0.0  ;;  %3449 = vmatmul.mubr.bf16.gmra.mrb[224].mxu1 %v6220_v28  ;;  %s5401_s13 = scalar_lea.vmem %s3931_s12, 64  ;;  %p5406_p3 = scmp.lt.s32.totalorder %s3931_s12, %s3931_s12 }
 0x432   :  { %3456 = vmatprep.mubr.bf16.mxu1 %v6235_v1  ;;  %p5402_p2 = scmp.ne.s32.totalorder %s3931_s12, %s5401_s13  ;;  %p5407_p4 = scmp.lt.s32.totalorder %s5401_s13, %s5401_s13 }
 0x433   :  { %v6334_v5 = vpack.c.bf16 %v3478_v44, %v3477_v50 }
 0x434   :  { %v3242_v60 = vpop.f32.mrb[120].mxu1  ;;  %p5408_p5 = por %p5407_p4, %p5406_p3 }
 0x435   :  { %v3243_v11 = vadd.f32 %v6316_v22, %v3242_v60  ;;  %v3244_v13 = vpop.f32.mrb[121].mxu1 }
 0x436   :  { %v3245_v62 = vpop.f32.mrb[122].mxu1  ;;  %p5409_p6 = pnand %p5408_p5, %p5402_p2 }
 0x437   :  { %v3246_v37 = vadd.f32 %v6316_v22, %v3245_v62  ;;  %v3247_v36 = vpop.f32.mrb[123].mxu1  ;;  %v3479_v47 = vmax.f32 %v3243_v11, 0.0 }
 0x439   :  { %v3480_v46 = vmax.f32 %v3246_v37, 0.0  ;;  %3457 = vmatmul.mubr.bf16.gmra.mrb[228].mxu1 %v6232_v18 }
 0x43a   :  { %3464 = vmatprep.mubr.bf16.mxu1 %v6247_v15 }
 0x43b   :  { %v6340_v26 = vpack.c.bf16 %v3480_v46, %v3479_v47 }
 0x43c   :  { %v3250_v28 = vpop.f32.mrb[124].mxu1 }
 0x43d   :  { %v3251_v1 = vadd.f32 %v6316_v22, %v3250_v28  ;;  %v3252_v45 = vpop.f32.mrb[125].mxu1 }
 0x43e   :  { %v3253_v31 = vpop.f32.mrb[126].mxu1 }
 0x43f   :  { %v3254_v20 = vadd.f32 %v6316_v22, %v3253_v31  ;;  %v3255_v29 = vpop.f32.mrb[127].mxu1  ;;  %v3481_v54 = vmax.f32 %v3251_v1, 0.0 }
 0x441   :  { %v3482_v10 = vmax.f32 %v3254_v20, 0.0  ;;  %3465 = vmatmul.mubr.bf16.gmra.mrb[232].mxu1 %v6244_v23 }
 0x442   :  { %4343 = vmatprep.mubr.msk.f32.mxu1 %vm3548_vm0, %v6370_v39 }
 0x443   :  { %v6345_v41 = vpack.c.bf16 %v3482_v10, %v3481_v54 }
 0x444   :  { %v3258_v9 = vpop.f32.mrb[128].mxu1 }
 0x445   :  { %v3259_v18 = vadd.f32 %v6316_v22, %v3258_v9  ;;  %v3260_v15 = vpop.f32.mrb[129].mxu1 }
 0x446   :  { %v3261_v43 = vpop.f32.mrb[130].mxu1 }
 0x447   :  { %v3262_v53 = vadd.f32 %v6316_v22, %v3261_v43  ;;  %v3263_v3 = vpop.f32.mrb[131].mxu1  ;;  %v3483_v51 = vmax.f32 %v3259_v18, 0.0 }
 0x449   :  { %v3484_v57 = vmax.f32 %v3262_v53, 0.0 }
 0x44b   :  { %v6349_v40 = vpack.c.bf16 %v3484_v57, %v3483_v51 }
 0x44c   :  { %v3266_v32 = vpop.f32.mrb[132].mxu1 }
 0x44d   :  { %v3267_v35 = vadd.f32 %v6316_v22, %v3266_v32  ;;  %v3268_v58 = vpop.f32.mrb[133].mxu1 }
 0x44e   :  { %v3269_v19 = vpop.f32.mrb[134].mxu1 }
 0x44f   :  { %v3270_v23 = vadd.f32 %v6316_v22, %v3269_v19  ;;  %v3271_v25 = vpop.f32.mrb[135].mxu1  ;;  %v3485_v52 = vmax.f32 %v3267_v35, 0.0 }
 0x451   :  { %v3486_v12 = vmax.f32 %v3270_v23, 0.0 }
 0x453   :  { %v6353_v55 = vpack.c.bf16 %v3486_v12, %v3485_v52 }
 0x454   :  { %v3274_v17 = vpop.f32.mrb[136].mxu1 }
 0x455   :  { %v3275_v16 = vadd.f32 %v6316_v22, %v3274_v17  ;;  %v3276_v56 = vpop.f32.mrb[137].mxu1 }
 0x456   :  { %v3277_v63 = vpop.f32.mrb[138].mxu1 }
 0x457   :  { %v3278_v14 = vadd.f32 %v6316_v22, %v3277_v63  ;;  %v3279_v27 = vpop.f32.mrb[139].mxu1  ;;  %v3487_v21 = vmax.f32 %v3275_v16, 0.0 }
 0x459   :  { %v3488_v59 = vmax.f32 %v3278_v14, 0.0 }
 0x45b   :  { %v6357_v30 = vpack.c.bf16 %v3488_v59, %v3487_v21 }
 0x45c   :  { %v3282_v0 = vpop.f32.mrb[140].mxu1 }
 0x45d   :  { %v3283_v48 = vadd.f32 %v6316_v22, %v3282_v0  ;;  %v3284_v33 = vpop.f32.mrb[141].mxu1 }
 0x45e   :  { %v3285_v2 = vpop.f32.mrb[142].mxu1 }
 0x45f   :  { %v3286_v38 = vadd.f32 %v6316_v22, %v3285_v2  ;;  %v3287_v7 = vpop.f32.mrb[143].mxu1  ;;  %v3489_v6 = vmax.f32 %v3283_v48, 0.0 }
 0x461   :  { %v3490_v8 = vmax.f32 %v3286_v38, 0.0 }
 0x463   :  { %v4379_v49 = vpack.c.bf16 %v3490_v8, %v3489_v6 }
 0x464   :  { %v3290_v61 = vpop.f32.mrb[144].mxu1 }
 0x465   :  { %v3291_v4 = vadd.f32 %v6316_v22, %v3290_v61  ;;  %v3292_v50 = vpop.f32.mrb[145].mxu1  ;;  %4381 = vmatprep.subr.msk.bf16.mxu1 %vm6363_vm1, %v4379_v49 }
 0x466   :  { %v3293_v44 = vpop.f32.mrb[146].mxu1  ;;  %4384 = vmatpush3.bf16.xpose.msk.msra.mxu1 %vm6363_vm1, %v6322_v24 }
 0x467   :  { %v3294_v60 = vadd.f32 %v6316_v22, %v3293_v44  ;;  %v3295_v11 = vpop.f32.mrb[147].mxu1  ;;  %v3491_v13 = vmax.f32 %v3291_v4, 0.0 }
 0x469   :  { %v3492_v62 = vmax.f32 %v3294_v60, 0.0 }
 0x46b   :  { %v4385_v37 = vpack.c.bf16 %v3492_v62, %v3491_v13 }
 0x46c   :  { %v3298_v36 = vpop.f32.mrb[148].mxu1 }
 0x46d   :  { %v3299_v47 = vadd.f32 %v6316_v22, %v3298_v36  ;;  %v3300_v46 = vpop.f32.mrb[149].mxu1  ;;  %4387 = vmatprep.subr.msk.bf16.mxu1 %vm6363_vm1, %v4385_v37 }
 0x46e   :  { %v3301_v28 = vpop.f32.mrb[150].mxu1  ;;  %4390 = vmatpush3.bf16.xpose.msk.msra.mxu1 %vm6363_vm1, %v6328_v34 }
 0x46f   :  { %v3302_v24 = vadd.f32 %v6316_v22, %v3301_v28  ;;  %v3303_v1 = vpop.f32.mrb[151].mxu1  ;;  %v3493_v45 = vmax.f32 %v3299_v47, 0.0 }
 0x471   :  { %v3494_v31 = vmax.f32 %v3302_v24, 0.0 }
 0x473   :  { %v4391_v20 = vpack.c.bf16 %v3494_v31, %v3493_v45  ;;  %v3538_v45 = vld [vmem:[#allocation2] sm:$0x1] }
 0x474   :  { %v3306_v29 = vpop.f32.mrb[152].mxu1  ;;  %3541 = vperm.xlu0 %4900, %v3538_v45  }
 0x475   :  { %v3307_v54 = vadd.f32 %v6316_v22, %v3306_v29  ;;  %v3308_v10 = vpop.f32.mrb[153].mxu1  ;;  %4393 = vmatprep.subr.msk.bf16.mxu1 %vm6363_vm1, %v4391_v20 }
 0x476   :  { %v3309_v9 = vpop.f32.mrb[154].mxu1  ;;  %4396 = vmatpush3.bf16.xpose.msk.msra.mxu1 %vm6363_vm1, %v6334_v5 }
 0x477   :  { %v3310_v34 = vadd.f32 %v6316_v22, %v3309_v9  ;;  %v3311_v18 = vpop.f32.mrb[155].mxu1  ;;  %v3495_v15 = vmax.f32 %v3307_v54, 0.0 }
 0x479   :  { %v3496_v43 = vmax.f32 %v3310_v34, 0.0 }
 0x47b   :  { %v4397_v53 = vpack.c.bf16 %v3496_v43, %v3495_v15 }
 0x47c   :  { %v3314_v3 = vpop.f32.mrb[156].mxu1 }
 0x47d   :  { %v3315_v51 = vadd.f32 %v6316_v22, %v3314_v3  ;;  %v3316_v57 = vpop.f32.mrb[157].mxu1  ;;  %4399 = vmatprep.subr.msk.bf16.mxu1 %vm6363_vm1, %v4397_v53 }
 0x47e   :  { %v3317_v32 = vpop.f32.mrb[158].mxu1  ;;  %4402 = vmatpush3.bf16.xpose.msk.msra.mxu1 %vm6363_vm1, %v6340_v26 }
 0x47f   :  { %v3318_v5 = vadd.f32 %v6316_v22, %v3317_v32  ;;  %v3319_v35 = vpop.f32.mrb[159].mxu1  ;;  %v3497_v58 = vmax.f32 %v3315_v51, 0.0 }
 0x481   :  { %v3498_v19 = vmax.f32 %v3318_v5, 0.0 }
 0x483   :  { %v4403_v23 = vpack.c.bf16 %v3498_v19, %v3497_v58 }
 0x484   :  { %v3322_v25 = vpop.f32.mrb[160].mxu1 }
 0x485   :  { %v3323_v52 = vadd.f32 %v6316_v22, %v3322_v25  ;;  %v3324_v12 = vpop.f32.mrb[161].mxu1  ;;  %4405 = vmatprep.subr.msk.bf16.mxu1 %vm6363_vm1, %v4403_v23 }
 0x486   :  { %v3325_v17 = vpop.f32.mrb[162].mxu1  ;;  %4408 = vmatpush3.bf16.xpose.msk.msra.mxu1 %vm6363_vm1, %v6345_v41 }
 0x487   :  { %v3326_v26 = vadd.f32 %v6316_v22, %v3325_v17  ;;  %v3327_v16 = vpop.f32.mrb[163].mxu1  ;;  %v3499_v56 = vmax.f32 %v3323_v52, 0.0 }
 0x489   :  { %v3500_v63 = vmax.f32 %v3326_v26, 0.0 }
 0x48b   :  { %v4409_v14 = vpack.c.bf16 %v3500_v63, %v3499_v56 }
 0x48c   :  { %v3330_v27 = vpop.f32.mrb[164].mxu1 }
 0x48d   :  { %v3331_v21 = vadd.f32 %v6316_v22, %v3330_v27  ;;  %v3332_v59 = vpop.f32.mrb[165].mxu1  ;;  %4411 = vmatprep.subr.msk.bf16.mxu1 %vm6363_vm1, %v4409_v14 }
 0x48e   :  { %v3333_v0 = vpop.f32.mrb[166].mxu1  ;;  %4414 = vmatpush3.bf16.xpose.msk.msra.mxu1 %vm6363_vm1, %v6349_v40 }
 0x48f   :  { %v3334_v41 = vadd.f32 %v6316_v22, %v3333_v0  ;;  %v3335_v48 = vpop.f32.mrb[167].mxu1  ;;  %v3501_v33 = vmax.f32 %v3331_v21, 0.0 }
 0x491   :  { %v3502_v2 = vmax.f32 %v3334_v41, 0.0 }
 0x493   :  { %v4415_v38 = vpack.c.bf16 %v3502_v2, %v3501_v33 }
 0x494   :  { %v3338_v7 = vpop.f32.mrb[168].mxu1 }
 0x495   :  { %v3339_v6 = vadd.f32 %v6316_v22, %v3338_v7  ;;  %v3340_v8 = vpop.f32.mrb[169].mxu1  ;;  %4417 = vmatprep.subr.msk.bf16.mxu1 %vm6363_vm1, %v4415_v38 }
 0x496   :  { %v3341_v49 = vpop.f32.mrb[170].mxu1  ;;  %4420 = vmatpush3.bf16.xpose.msk.msra.mxu1 %vm6363_vm1, %v6353_v55 }
 0x497   :  { %v3342_v40 = vadd.f32 %v6316_v22, %v3341_v49  ;;  %v3343_v61 = vpop.f32.mrb[171].mxu1  ;;  %v3503_v4 = vmax.f32 %v3339_v6, 0.0 }
 0x499   :  { %v3504_v50 = vmax.f32 %v3342_v40, 0.0 }
 0x49b   :  { %v4421_v44 = vpack.c.bf16 %v3504_v50, %v3503_v4 }
 0x49c   :  { %v3346_v60 = vpop.f32.mrb[172].mxu1 }
 0x49d   :  { %v3347_v11 = vadd.f32 %v6316_v22, %v3346_v60  ;;  %v3348_v13 = vpop.f32.mrb[173].mxu1  ;;  %4423 = vmatprep.subr.msk.bf16.mxu1 %vm6363_vm1, %v4421_v44 }
 0x49e   :  { %v3349_v62 = vpop.f32.mrb[174].mxu1  ;;  %4426 = vmatpush3.bf16.xpose.msk.msra.mxu1 %vm6363_vm1, %v6357_v30 }
 0x49f   :  { %v3350_v55 = vadd.f32 %v6316_v22, %v3349_v62  ;;  %v3351_v37 = vpop.f32.mrb[175].mxu1  ;;  %v3505_v36 = vmax.f32 %v3347_v11, 0.0 }
 0x4a1   :  { %v3506_v47 = vmax.f32 %v3350_v55, 0.0 }
 0x4a3   :  { %v6430_v46 = vpack.c.bf16 %v3506_v47, %v3505_v36 }
 0x4a4   :  { %v3354_v28 = vpop.f32.mrb[176].mxu1 }
 0x4a5   :  { %v3355_v24 = vadd.f32 %v6316_v22, %v3354_v28  ;;  %v3356_v1 = vpop.f32.mrb[177].mxu1  ;;  %4344 = vmatmul.mubr.msk.f32.vlgmr.msra.gmra.mrb[236].mxu1 %vm3548_vm0, %v6370_v39 }
 0x4a6   :  { %v3357_v31 = vpop.f32.mrb[178].mxu1  ;;  %4377 = vmatprep.mubr.msk.f32.mxu1 %vm3548_vm0, %v6370_v39 }
 0x4a7   :  { %v3358_v30 = vadd.f32 %v6316_v22, %v3357_v31  ;;  %v3359_v20 = vpop.f32.mrb[179].mxu1  ;;  %v3507_v29 = vmax.f32 %v3355_v24, 0.0 }
 0x4a9   :  { %v3508_v54 = vmax.f32 %v3358_v30, 0.0 }
 0x4ab   :  { %v6438_v10 = vpack.c.bf16 %v3508_v54, %v3507_v29 }
 0x4ac   :  { %v3362_v9 = vpop.f32.mrb[180].mxu1 }
 0x4ad   :  { %v3363_v34 = vadd.f32 %v6316_v22, %v3362_v9  ;;  %v3364_v18 = vpop.f32.mrb[181].mxu1 }
 0x4ae   :  { %v3365_v15 = vpop.f32.mrb[182].mxu1 }
 0x4af   :  { %v3366_v43 = vadd.f32 %v6316_v22, %v3365_v15  ;;  %v3367_v53 = vpop.f32.mrb[183].mxu1  ;;  %v3509_v3 = vmax.f32 %v3363_v34, 0.0 }
 0x4b1   :  { %v3510_v51 = vmax.f32 %v3366_v43, 0.0 }
 0x4b3   :  { %v6442_v57 = vpack.c.bf16 %v3510_v51, %v3509_v3 }
 0x4b4   :  { %v3370_v32 = vpop.f32.mrb[184].mxu1 }
 0x4b5   :  { %v3371_v5 = vadd.f32 %v6316_v22, %v3370_v32  ;;  %v3372_v35 = vpop.f32.mrb[185].mxu1 }
 0x4b6   :  { %v3373_v58 = vpop.f32.mrb[186].mxu1 }
 0x4b7   :  { %v3374_v19 = vadd.f32 %v6316_v22, %v3373_v58  ;;  %v3375_v23 = vpop.f32.mrb[187].mxu1  ;;  %v3511_v25 = vmax.f32 %v3371_v5, 0.0 }
 0x4b9   :  { %v3512_v52 = vmax.f32 %v3374_v19, 0.0 }
 0x4bb   :  { %v6446_v12 = vpack.c.bf16 %v3512_v52, %v3511_v25 }
 0x4bc   :  { %v3378_v17 = vpop.f32.mrb[188].mxu1 }
 0x4bd   :  { %v3379_v26 = vadd.f32 %v6316_v22, %v3378_v17  ;;  %v3380_v16 = vpop.f32.mrb[189].mxu1 }
 0x4be   :  { %v3381_v56 = vpop.f32.mrb[190].mxu1 }
 0x4bf   :  { %v3382_v63 = vadd.f32 %v6316_v22, %v3381_v56  ;;  %v3383_v14 = vpop.f32.mrb[191].mxu1  ;;  %v3513_v27 = vmax.f32 %v3379_v26, 0.0 }
 0x4c1   :  { %v3514_v21 = vmax.f32 %v3382_v63, 0.0 }
 0x4c3   :  { %v6450_v59 = vpack.c.bf16 %v3514_v21, %v3513_v27 }
 0x4c4   :  { %v3386_v0 = vpop.f32.mrb[192].mxu1 }
 0x4c5   :  { %v3387_v41 = vadd.f32 %v6316_v22, %v3386_v0  ;;  %v3388_v48 = vpop.f32.mrb[193].mxu1 }
 0x4c6   :  { %v3389_v33 = vpop.f32.mrb[194].mxu1 }
 0x4c7   :  { %v3390_v2 = vadd.f32 %v6316_v22, %v3389_v33  ;;  %v3391_v38 = vpop.f32.mrb[195].mxu1  ;;  %v3515_v7 = vmax.f32 %v3387_v41, 0.0 }
 0x4c9   :  { %v3516_v6 = vmax.f32 %v3390_v2, 0.0 }
 0x4cb   :  { %v6454_v8 = vpack.c.bf16 %v3516_v6, %v3515_v7 }
 0x4cc   :  { %v3394_v49 = vpop.f32.mrb[196].mxu1 }
 0x4cd   :  { %v3395_v40 = vadd.f32 %v6316_v22, %v3394_v49  ;;  %v3396_v61 = vpop.f32.mrb[197].mxu1 }
 0x4ce   :  { %v3397_v4 = vpop.f32.mrb[198].mxu1 }
 0x4cf   :  { %v3398_v50 = vadd.f32 %v6316_v22, %v3397_v4  ;;  %v3399_v44 = vpop.f32.mrb[199].mxu1  ;;  %v3517_v60 = vmax.f32 %v3395_v40, 0.0 }
 0x4d1   :  { %v3518_v11 = vmax.f32 %v3398_v50, 0.0 }
 0x4d3   :  { %v6458_v13 = vpack.c.bf16 %v3518_v11, %v3517_v60 }
 0x4d4   :  { %v3402_v62 = vpop.f32.mrb[200].mxu1 }
 0x4d5   :  { %v3403_v55 = vadd.f32 %v6316_v22, %v3402_v62  ;;  %v3404_v37 = vpop.f32.mrb[201].mxu1 }
 0x4d6   :  { %v3405_v36 = vpop.f32.mrb[202].mxu1 }
 0x4d7   :  { %v3406_v47 = vadd.f32 %v6316_v22, %v3405_v36  ;;  %v3407_v28 = vpop.f32.mrb[203].mxu1  ;;  %v3519_v24 = vmax.f32 %v3403_v55, 0.0 }
 0x4d9   :  { %v3520_v1 = vmax.f32 %v3406_v47, 0.0 }
 0x4db   :  { %v6462_v45 = vpack.c.bf16 %v3520_v1, %v3519_v24 }
 0x4dc   :  { %v3410_v31 = vpop.f32.mrb[204].mxu1 }
 0x4dd   :  { %v3411_v30 = vadd.f32 %v6316_v22, %v3410_v31  ;;  %v3412_v20 = vpop.f32.mrb[205].mxu1 }
 0x4de   :  { %v3413_v29 = vpop.f32.mrb[206].mxu1 }
 0x4df   :  { %v3414_v54 = vadd.f32 %v6316_v22, %v3413_v29  ;;  %v3415_v9 = vpop.f32.mrb[207].mxu1  ;;  %v3521_v34 = vmax.f32 %v3411_v30, 0.0 }
 0x4e1   :  { %v3522_v18 = vmax.f32 %v3414_v54, 0.0 }
 0x4e3   :  { %v4427_v15 = vpack.c.bf16 %v3522_v18, %v3521_v34 }
 0x4e4   :  { %v3418_v43 = vpop.f32.mrb[208].mxu1 }
 0x4e5   :  { %v3419_v53 = vadd.f32 %v6316_v22, %v3418_v43  ;;  %v3420_v3 = vpop.f32.mrb[209].mxu1  ;;  %4429 = vmatprep.subr.msk.bf16.mxu1 %vm6363_vm1, %v4427_v15 }
 0x4e6   :  { %v3421_v51 = vpop.f32.mrb[210].mxu1  ;;  %4432 = vmatpush3.bf16.xpose.msk.msra.mxu1 %vm6363_vm1, %v6430_v46 }
 0x4e7   :  { %v3422_v32 = vadd.f32 %v6316_v22, %v3421_v51  ;;  %v3423_v5 = vpop.f32.mrb[211].mxu1  ;;  %v3523_v35 = vmax.f32 %v3419_v53, 0.0 }
 0x4e8   :  { %v6660_v5 = vld [vmem:[#allocation25_spill] sm:$0xff] }
 0x4e9   :  { %v3524_v58 = vmax.f32 %v3422_v32, 0.0 }
 0x4eb   :  { %v4433_v19 = vpack.c.bf16 %v3524_v58, %v3523_v35  ;;  %v6661_v35 = vsub.s32 0, %v6660_v5 }
 0x4ec   :  { %v3426_v23 = vpop.f32.mrb[212].mxu1 }
 0x4ed   :  { %v3427_v25 = vadd.f32 %v6316_v22, %v3426_v23  ;;  %v3428_v52 = vpop.f32.mrb[213].mxu1  ;;  %4435 = vmatprep.subr.msk.bf16.mxu1 %vm6363_vm1, %v4433_v19 }
 0x4ee   :  { %v3429_v17 = vpop.f32.mrb[214].mxu1  ;;  %4438 = vmatpush3.bf16.xpose.msk.msra.mxu1 %vm6363_vm1, %v6438_v10 }
 0x4ef   :  { %v3430_v46 = vadd.f32 %v6316_v22, %v3429_v17  ;;  %v3431_v26 = vpop.f32.mrb[215].mxu1  ;;  %v3525_v16 = vmax.f32 %v3427_v25, 0.0 }
 0x4f1   :  { %v3526_v56 = vmax.f32 %v3430_v46, 0.0 }
 0x4f3   :  { %v4439_v63 = vpack.c.bf16 %v3526_v56, %v3525_v16  ;;  %v3542_v32 = vpop.permute.xlu0 %3541 }
 0x4f4   :  { %v3434_v14 = vpop.f32.mrb[216].mxu1 }
 0x4f5   :  { %v3435_v27 = vadd.f32 %v6316_v22, %v3434_v14  ;;  %v3436_v21 = vpop.f32.mrb[217].mxu1  ;;  %4441 = vmatprep.subr.msk.bf16.mxu1 %vm6363_vm1, %v4439_v63 }
 0x4f6   :  { %v3437_v0 = vpop.f32.mrb[218].mxu1  ;;  %4444 = vmatpush3.bf16.xpose.msk.msra.mxu1 %vm6363_vm1, %v6442_v57 }
 0x4f7   :  { %v3438_v10 = vadd.f32 %v6316_v22, %v3437_v0  ;;  %v3439_v41 = vpop.f32.mrb[219].mxu1  ;;  %v3527_v48 = vmax.f32 %v3435_v27, 0.0 }
 0x4f9   :  { %v3528_v33 = vmax.f32 %v3438_v10, 0.0 }
 0x4fb   :  { %v4445_v2 = vpack.c.bf16 %v3528_v33, %v3527_v48  ;;  %v6662_v48 = vlaneseq }
 0x4fc   :  { %v3442_v38 = vpop.f32.mrb[220].mxu1 }
 0x4fd   :  { %v3443_v7 = vadd.f32 %v6316_v22, %v3442_v38  ;;  %v3444_v6 = vpop.f32.mrb[221].mxu1  ;;  %4447 = vmatprep.subr.msk.bf16.mxu1 %vm6363_vm1, %v4445_v2  ;;  %vm3921_vm2 = vcmp.lt.s32.totalorder %v6662_v48, 512 }
 0x4fe   :  { %v3445_v49 = vpop.f32.mrb[222].mxu1  ;;  %4450 = vmatpush3.bf16.xpose.msk.msra.mxu1 %vm6363_vm1, %v6446_v12 }
 0x4ff   :  { %v3446_v57 = vadd.f32 %v6316_v22, %v3445_v49  ;;  %v3447_v40 = vpop.f32.mrb[223].mxu1  ;;  %v3529_v61 = vmax.f32 %v3443_v7, 0.0 }
 0x501   :  { %v3530_v4 = vmax.f32 %v3446_v57, 0.0 }
 0x503   :  { %v4451_v50 = vpack.c.bf16 %v3530_v4, %v3529_v61 }
 0x504   :  { %v3450_v44 = vpop.f32.mrb[224].mxu1 }
 0x505   :  { %v3451_v60 = vadd.f32 %v6316_v22, %v3450_v44  ;;  %v3452_v11 = vpop.f32.mrb[225].mxu1  ;;  %4453 = vmatprep.subr.msk.bf16.mxu1 %vm6363_vm1, %v4451_v50 }
 0x506   :  { %v3453_v62 = vpop.f32.mrb[226].mxu1  ;;  %4456 = vmatpush3.bf16.xpose.msk.msra.mxu1 %vm6363_vm1, %v6450_v59 }
 0x507   :  { %v3454_v12 = vadd.f32 %v6316_v22, %v3453_v62  ;;  %v3455_v55 = vpop.f32.mrb[227].mxu1  ;;  %v3531_v37 = vmax.f32 %v3451_v60, 0.0 }
 0x509   :  { %v3532_v36 = vmax.f32 %v3454_v12, 0.0 }
 0x50b   :  { %v4457_v47 = vpack.c.bf16 %v3532_v36, %v3531_v37 }
 0x50c   :  { %v3458_v28 = vpop.f32.mrb[228].mxu1 }
 0x50d   :  { %v3459_v24 = vadd.f32 %v6316_v22, %v3458_v28  ;;  %v3460_v1 = vpop.f32.mrb[229].mxu1  ;;  %4459 = vmatprep.subr.msk.bf16.mxu1 %vm6363_vm1, %v4457_v47 }
 0x50e   :  { %v3461_v31 = vpop.f32.mrb[230].mxu1  ;;  %4462 = vmatpush3.bf16.xpose.msk.msra.mxu1 %vm6363_vm1, %v6454_v8 }
 0x50f   :  { %v3462_v59 = vadd.f32 %v6316_v22, %v3461_v31  ;;  %v3463_v30 = vpop.f32.mrb[231].mxu1  ;;  %v3533_v20 = vmax.f32 %v3459_v24, 0.0 }
 0x511   :  { %v3534_v29 = vmax.f32 %v3462_v59, 0.0 }
 0x513   :  { %v4463_v54 = vpack.c.bf16 %v3534_v29, %v3533_v20 }
 0x514   :  { %v3466_v9 = vpop.f32.mrb[232].mxu1 }
 0x515   :  { %v3467_v34 = vadd.f32 %v6316_v22, %v3466_v9  ;;  %v3468_v18 = vpop.f32.mrb[233].mxu1  ;;  %4465 = vmatprep.subr.msk.bf16.mxu1 %vm6363_vm1, %v4463_v54 }
 0x516   :  { %v3469_v15 = vpop.f32.mrb[234].mxu1  ;;  %4468 = vmatpush3.bf16.xpose.msk.msra.mxu1 %vm6363_vm1, %v6458_v13  ;;  %v3547_v13 = vrot.slane %v3542_v32, %v6661_v35 }
 0x517   :  { %v3470_v8 = vadd.f32 %v6316_v22, %v3469_v15  ;;  %v3471_v43 = vpop.f32.mrb[235].mxu1  ;;  %v3535_v53 = vmax.f32 %v3467_v34, 0.0 }
 0x519   :  { %v3536_v3 = vmax.f32 %v3470_v8, 0.0 }
 0x51b   :  { %v4469_v51 = vpack.c.bf16 %v3536_v3, %v3535_v53 }
 0x51d   :  { %4471 = vmatprep.subr.msk.bf16.mxu1 %vm6363_vm1, %v4469_v51 }
 0x51e   :  { %4474 = vmatpush3.bf16.xpose.msk.msra.mxu1 %vm6363_vm1, %v6462_v45 }
 0x525   :  { %4378 = vmatmul.mubr.msk.f32.vlgmr.msra.gmra.mrb[238].mxu1 %vm3548_vm0, %v6370_v39  ;;  %v5436_v39 = vmov 1966171168  }
 0x526   :  { %v3897_v16 = vunpack.c.l.s4 %v5436_v39 }
 0x528   :  { %v3898_v56 = vunpack.c.0.s8 %v3897_v16 }
 0x52a   :  { %v3901_v14 = vsub.s32 %v3898_v56, %v6660_v5 }
 0x578   :  { %v3810_v58 = vpop.f32.mrb[236].mxu1 }
 0x579   :  { %v3811_v22 = vadd.f32 %v3810_v58, %v3547_v13  ;;  %v3812_v19 = vpop.f32.mrb[237].mxu1 }
 0x57a   :  { %v3813_v23 = vadd.f32 %v3812_v19, %v3547_v13 }
 0x57b   :  { %5349 = vtanh.f32 %v3811_v22 }
 0x57c   :  { %5351 = vtanh.f32 %v3813_v23 }
 0x585   :  { %v5350_v25 = vpop.eup %5349 }
 0x586   :  { %v5352_v52 = vpop.eup %5351 }
 0x587   :  { %v3894_v17 = vcombine.low %v5350_v25, %v5352_v52 }
 0x589   :  { %v3902_v0 = vrot.slane %v3894_v17, %v3901_v14 }
 0x5f8   :  { %v3881_v46 = vpop.f32.mrb[238].mxu1 }
 0x5f9   :  { %v3882_v26 = vadd.f32 %v3881_v46, %v3547_v13  ;;  %v3883_v42 = vpop.f32.mrb[239].mxu1 }
 0x5fa   :  { %v3884_v45 = vadd.f32 %v3883_v42, %v3547_v13 }
 0x5fb   :  { %5353 = vtanh.f32 %v3882_v26 }
 0x5fc   :  { %5355 = vtanh.f32 %v3884_v45 }
 0x605   :  { %v5354_v63 = vpop.eup %5353 }
 0x606   :  { %v5356_v27 = vpop.eup %5355 }
 0x607   :  { %v3895_v21 = vcombine.low %v5354_v63, %v5356_v27 }
 0x609   :  { %v3909_v10 = vrot.slane %v3895_v21, %v3901_v14 }
 0x60b   :  { %v3910_v41 = vcombine.low %v3902_v0, %v3909_v10 }
 0x60d   :  { %v3917_v33 = vrot.slane %v3910_v41, %v3901_v14 }
 0x60f   :  { %3923 = vst.msk [vmem:[#allocation8] sm:$0xf] %vm3921_vm2, %v3917_v33 }
 0x610   :  { %5412 = shalt.err (!%p5409_p6)
}
 0x611   :  { %s5413_s16 = scalar_lea.hbm %s6545_s7, 64 }
 0x612   :  { %p5414_p7 = scmp.ne.s32.totalorder %s6545_s7, %s5413_s16  ;;  %p5417_p8 = scmp.lt.u32.totalorder %s5413_s16, %s6545_s7 }
 0x614   :  { %p5419_p9 = pnand %p5417_p8, %p5414_p7 }
 0x616   :  { %5422 = shalt.err (!%p5419_p9)
}
 0x617   :  { %3933 = dma.vmem_to_hbm [thread:$0]  %s3931_s12, 64, %s6545_s7, [#allocation5]  }
 0x618   :  { %5427 = dma.done.wait [#allocation5], 64  }
 0x619   :  { %5428 = vsyncadd [#allocation5], 4294967232 }
 0x61a   :  { %3937 = vsyncpa [#allocation4], 1 }
 0x61b   :  { %3938 = vsyncpa [#allocation7], 1 }
 0x61c   :  { %3939 = vsyncpa [#allocation5], 1 }

</bundles_post_ra>
